<compile_context>
chip_gen: v7x
topology: tpu7x:2x2x1
jax: 0.10.0
libtpu: 0.0.40
codegen_flags: <defaults>
</compile_context>

<pallas_src>
import functools

import numpy as np
import jax
import jax.numpy as jnp
from jax import lax
from jax.experimental import pallas as pl
from jax.experimental.pallas import tpu as pltpu

_LANE = 128


def _round_up(x, m):
    return (x + m - 1) // m * m


def _lshift(a, s):
    """Columns shifted left by `s`: result[:, c] = a[:, c + s] (cyclic).

    The wrapped tail only ever lands in the pad region (columns >= valid
    width), which downstream ops never read.  Implemented with slice+concat
    (well-supported Mosaic ops) so the shift direction is unambiguous.
    """
    if s == 0:
        return a
    return jnp.concatenate([a[:, s:], a[:, :s]], axis=1)


def _lenet_fused_kernel(p1_ref, w1_ref, b1_ref, w2_ref, b2_ref, s2_ref,
                        w1fc_ref, b1fc_ref, w2fc_ref, b2fc_ref, w3fc_ref,
                        b3fc_ref, o_ref, *, n_batch, m1p):
    f32 = jnp.float32

    # ---------- conv1 + bias + ReLU: one GEMM over the 4 pool-quadrant slabs --
    # p1: (25, 4*m1p) quadrant patch slabs; w1: (8, 25) (OC padded 6->8).
    z1 = jnp.dot(w1_ref[...], p1_ref[...], preferred_element_type=f32)  # (8,4*m1p)
    z1 = jnp.maximum(z1 + b1_ref[...], 0.0)

    # ---------- maxpool1: VPU max over the 4 aligned quadrant chunks ----------
    h1 = jnp.maximum(
        jnp.maximum(z1[:, 0:m1p], z1[:, m1p:2 * m1p]),
        jnp.maximum(z1[:, 2 * m1p:3 * m1p], z1[:, 3 * m1p:4 * m1p]))
    # h1[ic, n*196 + y*14 + x] = pooled conv1 activation, shape (8, m1p).

    # ---------- conv2 + bias + ReLU: in-kernel im2col via lane shifts ---------
    acc2 = jnp.zeros((16, m1p), dtype=f32)
    for t in range(25):
        i, j = divmod(t, 5)
        acc2 = acc2 + jnp.dot(w2_ref[t], _lshift(h1, i * 14 + j),
                              preferred_element_type=f32)               # (16,m1p)
    z2 = jnp.maximum(acc2 + b2_ref[...], 0.0)
    # valid at columns n*196 + y*14 + x with y, x in [0, 10).

    # ---------- maxpool2 + compaction to a dense, 128-aligned layout ----------
    m2 = jnp.maximum(jnp.maximum(z2, _lshift(z2, 1)),
                     jnp.maximum(_lshift(z2, 14), _lshift(z2, 15)))
    # m2[oc, n*196 + 28*ph + 2*pw] holds the pooled value; compact those
    # strided columns to pooled[oc, n*25 + 5*ph + pw] with a 0/1 selection GEMM.
    pooled = jnp.dot(m2, s2_ref[...], preferred_element_type=f32)       # (16,m3p)

    # ---------- flatten (torch (c, h, w) order) + fc1 + ReLU ------------------
    w1fc = w1fc_ref[...]                                                # (400,120)
    acc_fc = jnp.zeros((n_batch, 120), dtype=f32) + b1fc_ref[...]
    for oc in range(16):
        rows = [pooled[oc:oc + 1, n * 25:(n + 1) * 25] for n in range(n_batch)]
        q = jnp.concatenate(rows, axis=0)                               # (N, 25)
        acc_fc = acc_fc + jnp.dot(q, w1fc[oc * 25:(oc + 1) * 25, :],
                                  preferred_element_type=f32)
    h_fc = jnp.maximum(acc_fc, 0.0)                                     # (N, 120)

    # ---------- fc2 + ReLU, fc3 -----------------------------------------------
    h_fc = jnp.maximum(
        jnp.dot(h_fc, w2fc_ref[...], preferred_element_type=f32) + b2fc_ref[...],
        0.0)                                                            # (N, 84)
    out = jnp.dot(h_fc, w3fc_ref[...], preferred_element_type=f32) + b3fc_ref[...]
    o_ref[...] = out.astype(o_ref.dtype)                                # (N, 10)


def _conv1_pool_quadrant_patches(x, m1p):
    """x: (N, 1, 32, 32) -> (25, 4*m1p) conv1 im2col slabs, one lane-chunk per
    2x2-maxpool quadrant (dy, dx); within a chunk the column order is
    n*196 + ph*14 + pw.  Pad columns are zero."""
    # TODO(synk): this strided window gather stays in XLA (depends only on the
    # raw input; pulling it in-kernel needs a 4 MB selection matrix or
    # data-dependent DMA, which costs more than the ~200 KB it saves).
    n = x.shape[0]
    x0 = x[:, 0].astype(jnp.float32)                                    # (N,32,32)
    quads = []
    for dy in (0, 1):
        for dx in (0, 1):
            taps = []
            for i in range(5):
                for j in range(5):
                    sub = x0[:, dy + i:dy + i + 27:2, dx + j:dx + j + 27:2]
                    taps.append(sub.reshape(-1))                        # (N*196,)
            quad = jnp.stack(taps, axis=0)                              # (25,N*196)
            quads.append(jnp.pad(quad, ((0, 0), (0, m1p - n * 196))))
    return jnp.concatenate(quads, axis=1)                               # (25,4*m1p)


def init_params(key):
    """PyTorch-layout parameters for Net (Conv2d(1,6,5), Conv2d(6,16,5),
    Linear 400-120-84-10)."""
    def nrm(k, shape, scale=0.05):
        return scale * jax.random.normal(k, shape, dtype=jnp.float32)
    ks = jax.random.split(key, 10)
    return {
        "conv1_w": nrm(ks[0], (6, 1, 5, 5)), "conv1_b": nrm(ks[1], (6,)),
        "conv2_w": nrm(ks[2], (16, 6, 5, 5)), "conv2_b": nrm(ks[3], (16,)),
        "fc1_w": nrm(ks[4], (120, 400)), "fc1_b": nrm(ks[5], (120,)),
        "fc2_w": nrm(ks[6], (84, 120)), "fc2_b": nrm(ks[7], (84,)),
        "fc3_w": nrm(ks[8], (10, 84)), "fc3_b": nrm(ks[9], (10,)),
    }


def prepare_params(p, n_batch):
    """One-time re-layout OUTSIDE jit into kernel-friendly GEMM matrices."""
    m1p = _round_up(n_batch * 196, _LANE)   # conv1-pooled / conv2 lane width
    m3p = _round_up(n_batch * 25, _LANE)    # conv2-pooled lane width
    w1 = np.asarray(p["conv1_w"], np.float32).reshape(6, 25)
    w1 = np.pad(w1, ((0, 2), (0, 0)))                                   # OC 6->8
    b1 = np.pad(np.asarray(p["conv1_b"], np.float32).reshape(6, 1),
                ((0, 2), (0, 0)))
    # conv2 weights per tap: w2p[t, oc, ic] = conv2_w[oc, ic, i, j], IC 6->8.
    w2 = np.transpose(np.asarray(p["conv2_w"], np.float32), (2, 3, 0, 1))
    w2 = np.pad(w2.reshape(25, 16, 6), ((0, 0), (0, 0), (0, 2)))
    b2 = np.asarray(p["conv2_b"], np.float32).reshape(16, 1)
    # 0/1 selection matrix compacting maxpool2's stride-2 columns.
    s2 = np.zeros((m1p, m3p), np.float32)
    for n in range(n_batch):
        for ph in range(5):
            for pw in range(5):
                s2[n * 196 + 28 * ph + 2 * pw, n * 25 + 5 * ph + pw] = 1.0
    return {
        "conv1_w": jnp.asarray(w1), "conv1_b": jnp.asarray(b1),
        "conv2_w": jnp.asarray(w2), "conv2_b": jnp.asarray(b2),
        "s2": jnp.asarray(s2),
        "fc1_w": jnp.asarray(np.asarray(p["fc1_w"], np.float32).T),
        "fc1_b": jnp.asarray(np.asarray(p["fc1_b"], np.float32).reshape(1, -1)),
        "fc2_w": jnp.asarray(np.asarray(p["fc2_w"], np.float32).T),
        "fc2_b": jnp.asarray(np.asarray(p["fc2_b"], np.float32).reshape(1, -1)),
        "fc3_w": jnp.asarray(np.asarray(p["fc3_w"], np.float32).T),
        "fc3_b": jnp.asarray(np.asarray(p["fc3_b"], np.float32).reshape(1, -1)),
    }


def _zero_block(ndim, i):
    return (0,) * ndim


def net_forward(prep, x):
    """x: (N, 1, 32, 32) -> (N, 10) logits, single fused Pallas kernel."""
    n = x.shape[0]
    m1p, m3p = prep["s2"].shape
    assert m1p == _round_up(n * 196, _LANE) and m3p == _round_up(n * 25, _LANE)
    p1 = _conv1_pool_quadrant_patches(x, m1p)
    args = (p1, prep["conv1_w"], prep["conv1_b"], prep["conv2_w"],
            prep["conv2_b"], prep["s2"], prep["fc1_w"], prep["fc1_b"],
            prep["fc2_w"], prep["fc2_b"], prep["fc3_w"], prep["fc3_b"])
    in_specs = [pl.BlockSpec(a.shape, functools.partial(_zero_block, a.ndim))
                for a in args]
    kernel = functools.partial(_lenet_fused_kernel, n_batch=n, m1p=m1p)
    return pl.pallas_call(
        kernel,
        out_shape=jax.ShapeDtypeStruct((n, 10), jnp.float32),
        grid=(1,),   # whole working set (~1 MB) fits VMEM; one step, no pipeline
        in_specs=in_specs,
        out_specs=pl.BlockSpec((n, 10), lambda i: (0, 0)),
        compiler_params=pltpu.CompilerParams(
            dimension_semantics=("arbitrary",),
            vmem_limit_bytes=32 * 1024 * 1024),
    )(*args)


def _reference_forward(p, x):
    """Pure-XLA reference (lax conv / reduce_window / dense), for validation."""
    hp = jax.lax.Precision.HIGHEST

    def conv(v, w, b):
        y = lax.conv_general_dilated(v, w, (1, 1), "VALID",
                                     dimension_numbers=("NCHW", "OIHW", "NCHW"),
                                     precision=hp)
        return y + b.reshape(1, -1, 1, 1)

    def pool(v):
        return lax.reduce_window(v, -jnp.inf, lax.max, (1, 1, 2, 2),
                                 (1, 1, 2, 2), "VALID")

    h = pool(jnp.maximum(conv(x, p["conv1_w"], p["conv1_b"]), 0.0))
    h = pool(jnp.maximum(conv(h, p["conv2_w"], p["conv2_b"]), 0.0))
    h = h.reshape(h.shape[0], -1)
    h = jnp.maximum(jnp.dot(h, p["fc1_w"].T, precision=hp) + p["fc1_b"], 0.0)
    h = jnp.maximum(jnp.dot(h, p["fc2_w"].T, precision=hp) + p["fc2_b"], 0.0)
    return jnp.dot(h, p["fc3_w"].T, precision=hp) + p["fc3_b"]


if __name__ == "__main__":
    key = jax.random.PRNGKey(0)
    pkey, xkey = jax.random.split(key)
    raw = init_params(pkey)
    n_batch = 2
    prep = prepare_params(raw, n_batch)
    # 32x32 single-channel input is implied by fc1 expecting 16*5*5 features.
    x = jax.random.normal(xkey, (n_batch, 1, 32, 32), dtype=jnp.float32)

    out = jax.block_until_ready(jax.jit(net_forward)(prep, x))
    assert out.shape == (n_batch, 10), out.shape
    assert bool(jnp.all(jnp.isfinite(out)))

    ref = jax.block_until_ready(jax.jit(_reference_forward)(raw, x))
    assert bool(jnp.allclose(out, ref, rtol=2e-2, atol=2e-3)), (
        float(jnp.max(jnp.abs(out - ref))))
    print("KERNEL_OK")
</pallas_src>

<mosaic_0001>
module attributes {stable_mosaic.version = 11 : i64} {
  func.func @_lenet_fused_kernel(%arg0: i32, %arg1: memref<25x2048xf32, #tpu.memory_space<vmem>>, %arg2: memref<8x25xf32, #tpu.memory_space<vmem>>, %arg3: memref<8x1xf32, #tpu.memory_space<vmem>>, %arg4: memref<25x16x8xf32, #tpu.memory_space<vmem>>, %arg5: memref<16x1xf32, #tpu.memory_space<vmem>>, %arg6: memref<512x128xf32, #tpu.memory_space<vmem>>, %arg7: memref<400x120xf32, #tpu.memory_space<vmem>>, %arg8: memref<1x120xf32, #tpu.memory_space<vmem>>, %arg9: memref<120x84xf32, #tpu.memory_space<vmem>>, %arg10: memref<1x84xf32, #tpu.memory_space<vmem>>, %arg11: memref<84x10xf32, #tpu.memory_space<vmem>>, %arg12: memref<1x10xf32, #tpu.memory_space<vmem>>, %arg13: memref<2x10xf32, #tpu.memory_space<vmem>>) attributes {dimension_semantics = [#tpu.dimension_semantics<arbitrary>], iteration_bounds = array<i64: 1>, scalar_prefetch = 0 : i64, scratch_operands = 0 : i64, tpu.core_type = #tpu.core_type<tc>, window_params = [{pipeline_mode = #tpu.pipeline_mode<synchronous>, transform_indices = @transform_0, window_bounds = array<i64: 25, 2048>}, {pipeline_mode = #tpu.pipeline_mode<synchronous>, transform_indices = @transform_1, window_bounds = array<i64: 8, 25>}, {pipeline_mode = #tpu.pipeline_mode<synchronous>, transform_indices = @transform_2, window_bounds = array<i64: 8, 1>}, {pipeline_mode = #tpu.pipeline_mode<synchronous>, transform_indices = @transform_3, window_bounds = array<i64: 25, 16, 8>}, {pipeline_mode = #tpu.pipeline_mode<synchronous>, transform_indices = @transform_4, window_bounds = array<i64: 16, 1>}, {pipeline_mode = #tpu.pipeline_mode<synchronous>, transform_indices = @transform_5, window_bounds = array<i64: 512, 128>}, {pipeline_mode = #tpu.pipeline_mode<synchronous>, transform_indices = @transform_6, window_bounds = array<i64: 400, 120>}, {pipeline_mode = #tpu.pipeline_mode<synchronous>, transform_indices = @transform_7, window_bounds = array<i64: 1, 120>}, {pipeline_mode = #tpu.pipeline_mode<synchronous>, transform_indices = @transform_8, window_bounds = array<i64: 120, 84>}, {pipeline_mode = #tpu.pipeline_mode<synchronous>, transform_indices = @transform_9, window_bounds = array<i64: 1, 84>}, {pipeline_mode = #tpu.pipeline_mode<synchronous>, transform_indices = @transform_10, window_bounds = array<i64: 84, 10>}, {pipeline_mode = #tpu.pipeline_mode<synchronous>, transform_indices = @transform_11, window_bounds = array<i64: 1, 10>}, {pipeline_mode = #tpu.pipeline_mode<synchronous>, transform_indices = @transform_12, window_bounds = array<i64: 2, 10>}]} {
    %c0 = arith.constant 0 : index
    %c0_0 = arith.constant 0 : index
    %0 = vector.load %arg2[%c0, %c0_0] : memref<8x25xf32, #tpu.memory_space<vmem>>, vector<8x25xf32>
    %c0_1 = arith.constant 0 : index
    %c0_2 = arith.constant 0 : index
    %1 = vector.load %arg1[%c0_1, %c0_2] : memref<25x2048xf32, #tpu.memory_space<vmem>>, vector<25x2048xf32>
    %cst = arith.constant dense<0.000000e+00> : vector<8x2048xf32>
    %2 = tpu.matmul %0, %1, %cst {dimension_numbers = #tpu.dot_dimension_numbers<[1], [0], [0], [1], [0, 0, 1, 1], [], []>} : vector<8x25xf32>, vector<25x2048xf32>, vector<8x2048xf32> -> vector<8x2048xf32>
    %c0_3 = arith.constant 0 : index
    %c0_4 = arith.constant 0 : index
    %3 = vector.load %arg3[%c0_3, %c0_4] : memref<8x1xf32, #tpu.memory_space<vmem>>, vector<8x1xf32>
    %4 = vector.broadcast %3 : vector<8x1xf32> to vector<8x2048xf32>
    %5 = arith.addf %2, %4 : vector<8x2048xf32>
    %cst_5 = arith.constant 0.000000e+00 : f32
    %6 = vector.broadcast %cst_5 : f32 to vector<8x2048xf32>
    %7 = arith.maximumf %5, %6 : vector<8x2048xf32>
    %8 = vector.extract_strided_slice %7 {offsets = [0, 0], sizes = [8, 512], strides = [1, 1]} : vector<8x2048xf32> to vector<8x512xf32>
    %9 = vector.extract_strided_slice %7 {offsets = [0, 512], sizes = [8, 512], strides = [1, 1]} : vector<8x2048xf32> to vector<8x512xf32>
    %10 = arith.maximumf %8, %9 : vector<8x512xf32>
    %11 = vector.extract_strided_slice %7 {offsets = [0, 1024], sizes = [8, 512], strides = [1, 1]} : vector<8x2048xf32> to vector<8x512xf32>
    %12 = vector.extract_strided_slice %7 {offsets = [0, 1536], sizes = [8, 512], strides = [1, 1]} : vector<8x2048xf32> to vector<8x512xf32>
    %13 = arith.maximumf %11, %12 : vector<8x512xf32>
    %14 = arith.maximumf %10, %13 : vector<8x512xf32>
    %cst_6 = arith.constant 0.000000e+00 : f32
    %15 = vector.broadcast %cst_6 : f32 to vector<16x512xf32>
    %c0_7 = arith.constant 0 : index
    %c0_8 = arith.constant 0 : index
    %c0_9 = arith.constant 0 : index
    %16 = vector.load %arg4[%c0_7, %c0_8, %c0_9] : memref<25x16x8xf32, #tpu.memory_space<vmem>>, vector<1x16x8xf32>
    %17 = vector.shape_cast %16 : vector<1x16x8xf32> to vector<16x8xf32>
    %cst_10 = arith.constant dense<0.000000e+00> : vector<16x512xf32>
    %18 = tpu.matmul %17, %14, %cst_10 {dimension_numbers = #tpu.dot_dimension_numbers<[1], [0], [0], [1], [0, 0, 1, 1], [], []>} : vector<16x8xf32>, vector<8x512xf32>, vector<16x512xf32> -> vector<16x512xf32>
    %19 = arith.addf %15, %18 : vector<16x512xf32>
    %c1 = arith.constant 1 : index
    %c0_11 = arith.constant 0 : index
    %c0_12 = arith.constant 0 : index
    %20 = vector.load %arg4[%c1, %c0_11, %c0_12] : memref<25x16x8xf32, #tpu.memory_space<vmem>>, vector<1x16x8xf32>
    %21 = vector.shape_cast %20 : vector<1x16x8xf32> to vector<16x8xf32>
    %22 = vector.extract_strided_slice %14 {offsets = [0, 1], sizes = [8, 511], strides = [1, 1]} : vector<8x512xf32> to vector<8x511xf32>
    %23 = vector.extract_strided_slice %14 {offsets = [0, 0], sizes = [8, 1], strides = [1, 1]} : vector<8x512xf32> to vector<8x1xf32>
    %24 = tpu.concatenate %22, %23 in 1 : vector<8x511xf32>, vector<8x1xf32> -> vector<8x512xf32>
    %cst_13 = arith.constant dense<0.000000e+00> : vector<16x512xf32>
    %25 = tpu.matmul %21, %24, %cst_13 {dimension_numbers = #tpu.dot_dimension_numbers<[1], [0], [0], [1], [0, 0, 1, 1], [], []>} : vector<16x8xf32>, vector<8x512xf32>, vector<16x512xf32> -> vector<16x512xf32>
    %26 = arith.addf %19, %25 : vector<16x512xf32>
    %c2 = arith.constant 2 : index
    %c0_14 = arith.constant 0 : index
    %c0_15 = arith.constant 0 : index
    %27 = vector.load %arg4[%c2, %c0_14, %c0_15] : memref<25x16x8xf32, #tpu.memory_space<vmem>>, vector<1x16x8xf32>
    %28 = vector.shape_cast %27 : vector<1x16x8xf32> to vector<16x8xf32>
    %29 = vector.extract_strided_slice %14 {offsets = [0, 2], sizes = [8, 510], strides = [1, 1]} : vector<8x512xf32> to vector<8x510xf32>
    %30 = vector.extract_strided_slice %14 {offsets = [0, 0], sizes = [8, 2], strides = [1, 1]} : vector<8x512xf32> to vector<8x2xf32>
    %31 = tpu.concatenate %29, %30 in 1 : vector<8x510xf32>, vector<8x2xf32> -> vector<8x512xf32>
    %cst_16 = arith.constant dense<0.000000e+00> : vector<16x512xf32>
    %32 = tpu.matmul %28, %31, %cst_16 {dimension_numbers = #tpu.dot_dimension_numbers<[1], [0], [0], [1], [0, 0, 1, 1], [], []>} : vector<16x8xf32>, vector<8x512xf32>, vector<16x512xf32> -> vector<16x512xf32>
    %33 = arith.addf %26, %32 : vector<16x512xf32>
    %c3 = arith.constant 3 : index
    %c0_17 = arith.constant 0 : index
    %c0_18 = arith.constant 0 : index
    %34 = vector.load %arg4[%c3, %c0_17, %c0_18] : memref<25x16x8xf32, #tpu.memory_space<vmem>>, vector<1x16x8xf32>
    %35 = vector.shape_cast %34 : vector<1x16x8xf32> to vector<16x8xf32>
    %36 = vector.extract_strided_slice %14 {offsets = [0, 3], sizes = [8, 509], strides = [1, 1]} : vector<8x512xf32> to vector<8x509xf32>
    %37 = vector.extract_strided_slice %14 {offsets = [0, 0], sizes = [8, 3], strides = [1, 1]} : vector<8x512xf32> to vector<8x3xf32>
    %38 = tpu.concatenate %36, %37 in 1 : vector<8x509xf32>, vector<8x3xf32> -> vector<8x512xf32>
    %cst_19 = arith.constant dense<0.000000e+00> : vector<16x512xf32>
    %39 = tpu.matmul %35, %38, %cst_19 {dimension_numbers = #tpu.dot_dimension_numbers<[1], [0], [0], [1], [0, 0, 1, 1], [], []>} : vector<16x8xf32>, vector<8x512xf32>, vector<16x512xf32> -> vector<16x512xf32>
    %40 = arith.addf %33, %39 : vector<16x512xf32>
    %c4 = arith.constant 4 : index
    %c0_20 = arith.constant 0 : index
    %c0_21 = arith.constant 0 : index
    %41 = vector.load %arg4[%c4, %c0_20, %c0_21] : memref<25x16x8xf32, #tpu.memory_space<vmem>>, vector<1x16x8xf32>
    %42 = vector.shape_cast %41 : vector<1x16x8xf32> to vector<16x8xf32>
    %43 = vector.extract_strided_slice %14 {offsets = [0, 4], sizes = [8, 508], strides = [1, 1]} : vector<8x512xf32> to vector<8x508xf32>
    %44 = vector.extract_strided_slice %14 {offsets = [0, 0], sizes = [8, 4], strides = [1, 1]} : vector<8x512xf32> to vector<8x4xf32>
    %45 = tpu.concatenate %43, %44 in 1 : vector<8x508xf32>, vector<8x4xf32> -> vector<8x512xf32>
    %cst_22 = arith.constant dense<0.000000e+00> : vector<16x512xf32>
    %46 = tpu.matmul %42, %45, %cst_22 {dimension_numbers = #tpu.dot_dimension_numbers<[1], [0], [0], [1], [0, 0, 1, 1], [], []>} : vector<16x8xf32>, vector<8x512xf32>, vector<16x512xf32> -> vector<16x512xf32>
    %47 = arith.addf %40, %46 : vector<16x512xf32>
    %c5 = arith.constant 5 : index
    %c0_23 = arith.constant 0 : index
    %c0_24 = arith.constant 0 : index
    %48 = vector.load %arg4[%c5, %c0_23, %c0_24] : memref<25x16x8xf32, #tpu.memory_space<vmem>>, vector<1x16x8xf32>
    %49 = vector.shape_cast %48 : vector<1x16x8xf32> to vector<16x8xf32>
    %50 = vector.extract_strided_slice %14 {offsets = [0, 14], sizes = [8, 498], strides = [1, 1]} : vector<8x512xf32> to vector<8x498xf32>
    %51 = vector.extract_strided_slice %14 {offsets = [0, 0], sizes = [8, 14], strides = [1, 1]} : vector<8x512xf32> to vector<8x14xf32>
    %52 = tpu.concatenate %50, %51 in 1 : vector<8x498xf32>, vector<8x14xf32> -> vector<8x512xf32>
    %cst_25 = arith.constant dense<0.000000e+00> : vector<16x512xf32>
    %53 = tpu.matmul %49, %52, %cst_25 {dimension_numbers = #tpu.dot_dimension_numbers<[1], [0], [0], [1], [0, 0, 1, 1], [], []>} : vector<16x8xf32>, vector<8x512xf32>, vector<16x512xf32> -> vector<16x512xf32>
    %54 = arith.addf %47, %53 : vector<16x512xf32>
    %c6 = arith.constant 6 : index
    %c0_26 = arith.constant 0 : index
    %c0_27 = arith.constant 0 : index
    %55 = vector.load %arg4[%c6, %c0_26, %c0_27] : memref<25x16x8xf32, #tpu.memory_space<vmem>>, vector<1x16x8xf32>
    %56 = vector.shape_cast %55 : vector<1x16x8xf32> to vector<16x8xf32>
    %57 = vector.extract_strided_slice %14 {offsets = [0, 15], sizes = [8, 497], strides = [1, 1]} : vector<8x512xf32> to vector<8x497xf32>
    %58 = vector.extract_strided_slice %14 {offsets = [0, 0], sizes = [8, 15], strides = [1, 1]} : vector<8x512xf32> to vector<8x15xf32>
    %59 = tpu.concatenate %57, %58 in 1 : vector<8x497xf32>, vector<8x15xf32> -> vector<8x512xf32>
    %cst_28 = arith.constant dense<0.000000e+00> : vector<16x512xf32>
    %60 = tpu.matmul %56, %59, %cst_28 {dimension_numbers = #tpu.dot_dimension_numbers<[1], [0], [0], [1], [0, 0, 1, 1], [], []>} : vector<16x8xf32>, vector<8x512xf32>, vector<16x512xf32> -> vector<16x512xf32>
    %61 = arith.addf %54, %60 : vector<16x512xf32>
    %c7 = arith.constant 7 : index
    %c0_29 = arith.constant 0 : index
    %c0_30 = arith.constant 0 : index
    %62 = vector.load %arg4[%c7, %c0_29, %c0_30] : memref<25x16x8xf32, #tpu.memory_space<vmem>>, vector<1x16x8xf32>
    %63 = vector.shape_cast %62 : vector<1x16x8xf32> to vector<16x8xf32>
    %64 = vector.extract_strided_slice %14 {offsets = [0, 16], sizes = [8, 496], strides = [1, 1]} : vector<8x512xf32> to vector<8x496xf32>
    %65 = vector.extract_strided_slice %14 {offsets = [0, 0], sizes = [8, 16], strides = [1, 1]} : vector<8x512xf32> to vector<8x16xf32>
    %66 = tpu.concatenate %64, %65 in 1 : vector<8x496xf32>, vector<8x16xf32> -> vector<8x512xf32>
    %cst_31 = arith.constant dense<0.000000e+00> : vector<16x512xf32>
    %67 = tpu.matmul %63, %66, %cst_31 {dimension_numbers = #tpu.dot_dimension_numbers<[1], [0], [0], [1], [0, 0, 1, 1], [], []>} : vector<16x8xf32>, vector<8x512xf32>, vector<16x512xf32> -> vector<16x512xf32>
    %68 = arith.addf %61, %67 : vector<16x512xf32>
    %c8 = arith.constant 8 : index
    %c0_32 = arith.constant 0 : index
    %c0_33 = arith.constant 0 : index
    %69 = vector.load %arg4[%c8, %c0_32, %c0_33] : memref<25x16x8xf32, #tpu.memory_space<vmem>>, vector<1x16x8xf32>
    %70 = vector.shape_cast %69 : vector<1x16x8xf32> to vector<16x8xf32>
    %71 = vector.extract_strided_slice %14 {offsets = [0, 17], sizes = [8, 495], strides = [1, 1]} : vector<8x512xf32> to vector<8x495xf32>
    %72 = vector.extract_strided_slice %14 {offsets = [0, 0], sizes = [8, 17], strides = [1, 1]} : vector<8x512xf32> to vector<8x17xf32>
    %73 = tpu.concatenate %71, %72 in 1 : vector<8x495xf32>, vector<8x17xf32> -> vector<8x512xf32>
    %cst_34 = arith.constant dense<0.000000e+00> : vector<16x512xf32>
    %74 = tpu.matmul %70, %73, %cst_34 {dimension_numbers = #tpu.dot_dimension_numbers<[1], [0], [0], [1], [0, 0, 1, 1], [], []>} : vector<16x8xf32>, vector<8x512xf32>, vector<16x512xf32> -> vector<16x512xf32>
    %75 = arith.addf %68, %74 : vector<16x512xf32>
    %c9 = arith.constant 9 : index
    %c0_35 = arith.constant 0 : index
    %c0_36 = arith.constant 0 : index
    %76 = vector.load %arg4[%c9, %c0_35, %c0_36] : memref<25x16x8xf32, #tpu.memory_space<vmem>>, vector<1x16x8xf32>
    %77 = vector.shape_cast %76 : vector<1x16x8xf32> to vector<16x8xf32>
    %78 = vector.extract_strided_slice %14 {offsets = [0, 18], sizes = [8, 494], strides = [1, 1]} : vector<8x512xf32> to vector<8x494xf32>
    %79 = vector.extract_strided_slice %14 {offsets = [0, 0], sizes = [8, 18], strides = [1, 1]} : vector<8x512xf32> to vector<8x18xf32>
    %80 = tpu.concatenate %78, %79 in 1 : vector<8x494xf32>, vector<8x18xf32> -> vector<8x512xf32>
    %cst_37 = arith.constant dense<0.000000e+00> : vector<16x512xf32>
    %81 = tpu.matmul %77, %80, %cst_37 {dimension_numbers = #tpu.dot_dimension_numbers<[1], [0], [0], [1], [0, 0, 1, 1], [], []>} : vector<16x8xf32>, vector<8x512xf32>, vector<16x512xf32> -> vector<16x512xf32>
    %82 = arith.addf %75, %81 : vector<16x512xf32>
    %c10 = arith.constant 10 : index
    %c0_38 = arith.constant 0 : index
    %c0_39 = arith.constant 0 : index
    %83 = vector.load %arg4[%c10, %c0_38, %c0_39] : memref<25x16x8xf32, #tpu.memory_space<vmem>>, vector<1x16x8xf32>
    %84 = vector.shape_cast %83 : vector<1x16x8xf32> to vector<16x8xf32>
    %85 = vector.extract_strided_slice %14 {offsets = [0, 28], sizes = [8, 484], strides = [1, 1]} : vector<8x512xf32> to vector<8x484xf32>
    %86 = vector.extract_strided_slice %14 {offsets = [0, 0], sizes = [8, 28], strides = [1, 1]} : vector<8x512xf32> to vector<8x28xf32>
    %87 = tpu.concatenate %85, %86 in 1 : vector<8x484xf32>, vector<8x28xf32> -> vector<8x512xf32>
    %cst_40 = arith.constant dense<0.000000e+00> : vector<16x512xf32>
    %88 = tpu.matmul %84, %87, %cst_40 {dimension_numbers = #tpu.dot_dimension_numbers<[1], [0], [0], [1], [0, 0, 1, 1], [], []>} : vector<16x8xf32>, vector<8x512xf32>, vector<16x512xf32> -> vector<16x512xf32>
    %89 = arith.addf %82, %88 : vector<16x512xf32>
    %c11 = arith.constant 11 : index
    %c0_41 = arith.constant 0 : index
    %c0_42 = arith.constant 0 : index
    %90 = vector.load %arg4[%c11, %c0_41, %c0_42] : memref<25x16x8xf32, #tpu.memory_space<vmem>>, vector<1x16x8xf32>
    %91 = vector.shape_cast %90 : vector<1x16x8xf32> to vector<16x8xf32>
    %92 = vector.extract_strided_slice %14 {offsets = [0, 29], sizes = [8, 483], strides = [1, 1]} : vector<8x512xf32> to vector<8x483xf32>
    %93 = vector.extract_strided_slice %14 {offsets = [0, 0], sizes = [8, 29], strides = [1, 1]} : vector<8x512xf32> to vector<8x29xf32>
    %94 = tpu.concatenate %92, %93 in 1 : vector<8x483xf32>, vector<8x29xf32> -> vector<8x512xf32>
    %cst_43 = arith.constant dense<0.000000e+00> : vector<16x512xf32>
    %95 = tpu.matmul %91, %94, %cst_43 {dimension_numbers = #tpu.dot_dimension_numbers<[1], [0], [0], [1], [0, 0, 1, 1], [], []>} : vector<16x8xf32>, vector<8x512xf32>, vector<16x512xf32> -> vector<16x512xf32>
    %96 = arith.addf %89, %95 : vector<16x512xf32>
    %c12 = arith.constant 12 : index
    %c0_44 = arith.constant 0 : index
    %c0_45 = arith.constant 0 : index
    %97 = vector.load %arg4[%c12, %c0_44, %c0_45] : memref<25x16x8xf32, #tpu.memory_space<vmem>>, vector<1x16x8xf32>
    %98 = vector.shape_cast %97 : vector<1x16x8xf32> to vector<16x8xf32>
    %99 = vector.extract_strided_slice %14 {offsets = [0, 30], sizes = [8, 482], strides = [1, 1]} : vector<8x512xf32> to vector<8x482xf32>
    %100 = vector.extract_strided_slice %14 {offsets = [0, 0], sizes = [8, 30], strides = [1, 1]} : vector<8x512xf32> to vector<8x30xf32>
    %101 = tpu.concatenate %99, %100 in 1 : vector<8x482xf32>, vector<8x30xf32> -> vector<8x512xf32>
    %cst_46 = arith.constant dense<0.000000e+00> : vector<16x512xf32>
    %102 = tpu.matmul %98, %101, %cst_46 {dimension_numbers = #tpu.dot_dimension_numbers<[1], [0], [0], [1], [0, 0, 1, 1], [], []>} : vector<16x8xf32>, vector<8x512xf32>, vector<16x512xf32> -> vector<16x512xf32>
    %103 = arith.addf %96, %102 : vector<16x512xf32>
    %c13 = arith.constant 13 : index
    %c0_47 = arith.constant 0 : index
    %c0_48 = arith.constant 0 : index
    %104 = vector.load %arg4[%c13, %c0_47, %c0_48] : memref<25x16x8xf32, #tpu.memory_space<vmem>>, vector<1x16x8xf32>
    %105 = vector.shape_cast %104 : vector<1x16x8xf32> to vector<16x8xf32>
    %106 = vector.extract_strided_slice %14 {offsets = [0, 31], sizes = [8, 481], strides = [1, 1]} : vector<8x512xf32> to vector<8x481xf32>
    %107 = vector.extract_strided_slice %14 {offsets = [0, 0], sizes = [8, 31], strides = [1, 1]} : vector<8x512xf32> to vector<8x31xf32>
    %108 = tpu.concatenate %106, %107 in 1 : vector<8x481xf32>, vector<8x31xf32> -> vector<8x512xf32>
    %cst_49 = arith.constant dense<0.000000e+00> : vector<16x512xf32>
    %109 = tpu.matmul %105, %108, %cst_49 {dimension_numbers = #tpu.dot_dimension_numbers<[1], [0], [0], [1], [0, 0, 1, 1], [], []>} : vector<16x8xf32>, vector<8x512xf32>, vector<16x512xf32> -> vector<16x512xf32>
    %110 = arith.addf %103, %109 : vector<16x512xf32>
    %c14 = arith.constant 14 : index
    %c0_50 = arith.constant 0 : index
    %c0_51 = arith.constant 0 : index
    %111 = vector.load %arg4[%c14, %c0_50, %c0_51] : memref<25x16x8xf32, #tpu.memory_space<vmem>>, vector<1x16x8xf32>
    %112 = vector.shape_cast %111 : vector<1x16x8xf32> to vector<16x8xf32>
    %113 = vector.extract_strided_slice %14 {offsets = [0, 32], sizes = [8, 480], strides = [1, 1]} : vector<8x512xf32> to vector<8x480xf32>
    %114 = vector.extract_strided_slice %14 {offsets = [0, 0], sizes = [8, 32], strides = [1, 1]} : vector<8x512xf32> to vector<8x32xf32>
    %115 = tpu.concatenate %113, %114 in 1 : vector<8x480xf32>, vector<8x32xf32> -> vector<8x512xf32>
    %cst_52 = arith.constant dense<0.000000e+00> : vector<16x512xf32>
    %116 = tpu.matmul %112, %115, %cst_52 {dimension_numbers = #tpu.dot_dimension_numbers<[1], [0], [0], [1], [0, 0, 1, 1], [], []>} : vector<16x8xf32>, vector<8x512xf32>, vector<16x512xf32> -> vector<16x512xf32>
    %117 = arith.addf %110, %116 : vector<16x512xf32>
    %c15 = arith.constant 15 : index
    %c0_53 = arith.constant 0 : index
    %c0_54 = arith.constant 0 : index
    %118 = vector.load %arg4[%c15, %c0_53, %c0_54] : memref<25x16x8xf32, #tpu.memory_space<vmem>>, vector<1x16x8xf32>
    %119 = vector.shape_cast %118 : vector<1x16x8xf32> to vector<16x8xf32>
    %120 = vector.extract_strided_slice %14 {offsets = [0, 42], sizes = [8, 470], strides = [1, 1]} : vector<8x512xf32> to vector<8x470xf32>
    %121 = vector.extract_strided_slice %14 {offsets = [0, 0], sizes = [8, 42], strides = [1, 1]} : vector<8x512xf32> to vector<8x42xf32>
    %122 = tpu.concatenate %120, %121 in 1 : vector<8x470xf32>, vector<8x42xf32> -> vector<8x512xf32>
    %cst_55 = arith.constant dense<0.000000e+00> : vector<16x512xf32>
    %123 = tpu.matmul %119, %122, %cst_55 {dimension_numbers = #tpu.dot_dimension_numbers<[1], [0], [0], [1], [0, 0, 1, 1], [], []>} : vector<16x8xf32>, vector<8x512xf32>, vector<16x512xf32> -> vector<16x512xf32>
    %124 = arith.addf %117, %123 : vector<16x512xf32>
    %c16 = arith.constant 16 : index
    %c0_56 = arith.constant 0 : index
    %c0_57 = arith.constant 0 : index
    %125 = vector.load %arg4[%c16, %c0_56, %c0_57] : memref<25x16x8xf32, #tpu.memory_space<vmem>>, vector<1x16x8xf32>
    %126 = vector.shape_cast %125 : vector<1x16x8xf32> to vector<16x8xf32>
    %127 = vector.extract_strided_slice %14 {offsets = [0, 43], sizes = [8, 469], strides = [1, 1]} : vector<8x512xf32> to vector<8x469xf32>
    %128 = vector.extract_strided_slice %14 {offsets = [0, 0], sizes = [8, 43], strides = [1, 1]} : vector<8x512xf32> to vector<8x43xf32>
    %129 = tpu.concatenate %127, %128 in 1 : vector<8x469xf32>, vector<8x43xf32> -> vector<8x512xf32>
    %cst_58 = arith.constant dense<0.000000e+00> : vector<16x512xf32>
    %130 = tpu.matmul %126, %129, %cst_58 {dimension_numbers = #tpu.dot_dimension_numbers<[1], [0], [0], [1], [0, 0, 1, 1], [], []>} : vector<16x8xf32>, vector<8x512xf32>, vector<16x512xf32> -> vector<16x512xf32>
    %131 = arith.addf %124, %130 : vector<16x512xf32>
    %c17 = arith.constant 17 : index
    %c0_59 = arith.constant 0 : index
    %c0_60 = arith.constant 0 : index
    %132 = vector.load %arg4[%c17, %c0_59, %c0_60] : memref<25x16x8xf32, #tpu.memory_space<vmem>>, vector<1x16x8xf32>
    %133 = vector.shape_cast %132 : vector<1x16x8xf32> to vector<16x8xf32>
    %134 = vector.extract_strided_slice %14 {offsets = [0, 44], sizes = [8, 468], strides = [1, 1]} : vector<8x512xf32> to vector<8x468xf32>
    %135 = vector.extract_strided_slice %14 {offsets = [0, 0], sizes = [8, 44], strides = [1, 1]} : vector<8x512xf32> to vector<8x44xf32>
    %136 = tpu.concatenate %134, %135 in 1 : vector<8x468xf32>, vector<8x44xf32> -> vector<8x512xf32>
    %cst_61 = arith.constant dense<0.000000e+00> : vector<16x512xf32>
    %137 = tpu.matmul %133, %136, %cst_61 {dimension_numbers = #tpu.dot_dimension_numbers<[1], [0], [0], [1], [0, 0, 1, 1], [], []>} : vector<16x8xf32>, vector<8x512xf32>, vector<16x512xf32> -> vector<16x512xf32>
    %138 = arith.addf %131, %137 : vector<16x512xf32>
    %c18 = arith.constant 18 : index
    %c0_62 = arith.constant 0 : index
    %c0_63 = arith.constant 0 : index
    %139 = vector.load %arg4[%c18, %c0_62, %c0_63] : memref<25x16x8xf32, #tpu.memory_space<vmem>>, vector<1x16x8xf32>
    %140 = vector.shape_cast %139 : vector<1x16x8xf32> to vector<16x8xf32>
    %141 = vector.extract_strided_slice %14 {offsets = [0, 45], sizes = [8, 467], strides = [1, 1]} : vector<8x512xf32> to vector<8x467xf32>
    %142 = vector.extract_strided_slice %14 {offsets = [0, 0], sizes = [8, 45], strides = [1, 1]} : vector<8x512xf32> to vector<8x45xf32>
    %143 = tpu.concatenate %141, %142 in 1 : vector<8x467xf32>, vector<8x45xf32> -> vector<8x512xf32>
    %cst_64 = arith.constant dense<0.000000e+00> : vector<16x512xf32>
    %144 = tpu.matmul %140, %143, %cst_64 {dimension_numbers = #tpu.dot_dimension_numbers<[1], [0], [0], [1], [0, 0, 1, 1], [], []>} : vector<16x8xf32>, vector<8x512xf32>, vector<16x512xf32> -> vector<16x512xf32>
    %145 = arith.addf %138, %144 : vector<16x512xf32>
    %c19 = arith.constant 19 : index
    %c0_65 = arith.constant 0 : index
    %c0_66 = arith.constant 0 : index
    %146 = vector.load %arg4[%c19, %c0_65, %c0_66] : memref<25x16x8xf32, #tpu.memory_space<vmem>>, vector<1x16x8xf32>
    %147 = vector.shape_cast %146 : vector<1x16x8xf32> to vector<16x8xf32>
    %148 = vector.extract_strided_slice %14 {offsets = [0, 46], sizes = [8, 466], strides = [1, 1]} : vector<8x512xf32> to vector<8x466xf32>
    %149 = vector.extract_strided_slice %14 {offsets = [0, 0], sizes = [8, 46], strides = [1, 1]} : vector<8x512xf32> to vector<8x46xf32>
    %150 = tpu.concatenate %148, %149 in 1 : vector<8x466xf32>, vector<8x46xf32> -> vector<8x512xf32>
    %cst_67 = arith.constant dense<0.000000e+00> : vector<16x512xf32>
    %151 = tpu.matmul %147, %150, %cst_67 {dimension_numbers = #tpu.dot_dimension_numbers<[1], [0], [0], [1], [0, 0, 1, 1], [], []>} : vector<16x8xf32>, vector<8x512xf32>, vector<16x512xf32> -> vector<16x512xf32>
    %152 = arith.addf %145, %151 : vector<16x512xf32>
    %c20 = arith.constant 20 : index
    %c0_68 = arith.constant 0 : index
    %c0_69 = arith.constant 0 : index
    %153 = vector.load %arg4[%c20, %c0_68, %c0_69] : memref<25x16x8xf32, #tpu.memory_space<vmem>>, vector<1x16x8xf32>
    %154 = vector.shape_cast %153 : vector<1x16x8xf32> to vector<16x8xf32>
    %155 = vector.extract_strided_slice %14 {offsets = [0, 56], sizes = [8, 456], strides = [1, 1]} : vector<8x512xf32> to vector<8x456xf32>
    %156 = vector.extract_strided_slice %14 {offsets = [0, 0], sizes = [8, 56], strides = [1, 1]} : vector<8x512xf32> to vector<8x56xf32>
    %157 = tpu.concatenate %155, %156 in 1 : vector<8x456xf32>, vector<8x56xf32> -> vector<8x512xf32>
    %cst_70 = arith.constant dense<0.000000e+00> : vector<16x512xf32>
    %158 = tpu.matmul %154, %157, %cst_70 {dimension_numbers = #tpu.dot_dimension_numbers<[1], [0], [0], [1], [0, 0, 1, 1], [], []>} : vector<16x8xf32>, vector<8x512xf32>, vector<16x512xf32> -> vector<16x512xf32>
    %159 = arith.addf %152, %158 : vector<16x512xf32>
    %c21 = arith.constant 21 : index
    %c0_71 = arith.constant 0 : index
    %c0_72 = arith.constant 0 : index
    %160 = vector.load %arg4[%c21, %c0_71, %c0_72] : memref<25x16x8xf32, #tpu.memory_space<vmem>>, vector<1x16x8xf32>
    %161 = vector.shape_cast %160 : vector<1x16x8xf32> to vector<16x8xf32>
    %162 = vector.extract_strided_slice %14 {offsets = [0, 57], sizes = [8, 455], strides = [1, 1]} : vector<8x512xf32> to vector<8x455xf32>
    %163 = vector.extract_strided_slice %14 {offsets = [0, 0], sizes = [8, 57], strides = [1, 1]} : vector<8x512xf32> to vector<8x57xf32>
    %164 = tpu.concatenate %162, %163 in 1 : vector<8x455xf32>, vector<8x57xf32> -> vector<8x512xf32>
    %cst_73 = arith.constant dense<0.000000e+00> : vector<16x512xf32>
    %165 = tpu.matmul %161, %164, %cst_73 {dimension_numbers = #tpu.dot_dimension_numbers<[1], [0], [0], [1], [0, 0, 1, 1], [], []>} : vector<16x8xf32>, vector<8x512xf32>, vector<16x512xf32> -> vector<16x512xf32>
    %166 = arith.addf %159, %165 : vector<16x512xf32>
    %c22 = arith.constant 22 : index
    %c0_74 = arith.constant 0 : index
    %c0_75 = arith.constant 0 : index
    %167 = vector.load %arg4[%c22, %c0_74, %c0_75] : memref<25x16x8xf32, #tpu.memory_space<vmem>>, vector<1x16x8xf32>
    %168 = vector.shape_cast %167 : vector<1x16x8xf32> to vector<16x8xf32>
    %169 = vector.extract_strided_slice %14 {offsets = [0, 58], sizes = [8, 454], strides = [1, 1]} : vector<8x512xf32> to vector<8x454xf32>
    %170 = vector.extract_strided_slice %14 {offsets = [0, 0], sizes = [8, 58], strides = [1, 1]} : vector<8x512xf32> to vector<8x58xf32>
    %171 = tpu.concatenate %169, %170 in 1 : vector<8x454xf32>, vector<8x58xf32> -> vector<8x512xf32>
    %cst_76 = arith.constant dense<0.000000e+00> : vector<16x512xf32>
    %172 = tpu.matmul %168, %171, %cst_76 {dimension_numbers = #tpu.dot_dimension_numbers<[1], [0], [0], [1], [0, 0, 1, 1], [], []>} : vector<16x8xf32>, vector<8x512xf32>, vector<16x512xf32> -> vector<16x512xf32>
    %173 = arith.addf %166, %172 : vector<16x512xf32>
    %c23 = arith.constant 23 : index
    %c0_77 = arith.constant 0 : index
    %c0_78 = arith.constant 0 : index
    %174 = vector.load %arg4[%c23, %c0_77, %c0_78] : memref<25x16x8xf32, #tpu.memory_space<vmem>>, vector<1x16x8xf32>
    %175 = vector.shape_cast %174 : vector<1x16x8xf32> to vector<16x8xf32>
    %176 = vector.extract_strided_slice %14 {offsets = [0, 59], sizes = [8, 453], strides = [1, 1]} : vector<8x512xf32> to vector<8x453xf32>
    %177 = vector.extract_strided_slice %14 {offsets = [0, 0], sizes = [8, 59], strides = [1, 1]} : vector<8x512xf32> to vector<8x59xf32>
    %178 = tpu.concatenate %176, %177 in 1 : vector<8x453xf32>, vector<8x59xf32> -> vector<8x512xf32>
    %cst_79 = arith.constant dense<0.000000e+00> : vector<16x512xf32>
    %179 = tpu.matmul %175, %178, %cst_79 {dimension_numbers = #tpu.dot_dimension_numbers<[1], [0], [0], [1], [0, 0, 1, 1], [], []>} : vector<16x8xf32>, vector<8x512xf32>, vector<16x512xf32> -> vector<16x512xf32>
    %180 = arith.addf %173, %179 : vector<16x512xf32>
    %c24 = arith.constant 24 : index
    %c0_80 = arith.constant 0 : index
    %c0_81 = arith.constant 0 : index
    %181 = vector.load %arg4[%c24, %c0_80, %c0_81] : memref<25x16x8xf32, #tpu.memory_space<vmem>>, vector<1x16x8xf32>
    %182 = vector.shape_cast %181 : vector<1x16x8xf32> to vector<16x8xf32>
    %183 = vector.extract_strided_slice %14 {offsets = [0, 60], sizes = [8, 452], strides = [1, 1]} : vector<8x512xf32> to vector<8x452xf32>
    %184 = vector.extract_strided_slice %14 {offsets = [0, 0], sizes = [8, 60], strides = [1, 1]} : vector<8x512xf32> to vector<8x60xf32>
    %185 = tpu.concatenate %183, %184 in 1 : vector<8x452xf32>, vector<8x60xf32> -> vector<8x512xf32>
    %cst_82 = arith.constant dense<0.000000e+00> : vector<16x512xf32>
    %186 = tpu.matmul %182, %185, %cst_82 {dimension_numbers = #tpu.dot_dimension_numbers<[1], [0], [0], [1], [0, 0, 1, 1], [], []>} : vector<16x8xf32>, vector<8x512xf32>, vector<16x512xf32> -> vector<16x512xf32>
    %187 = arith.addf %180, %186 : vector<16x512xf32>
    %c0_83 = arith.constant 0 : index
    %c0_84 = arith.constant 0 : index
    %188 = vector.load %arg5[%c0_83, %c0_84] : memref<16x1xf32, #tpu.memory_space<vmem>>, vector<16x1xf32>
    %189 = vector.broadcast %188 : vector<16x1xf32> to vector<16x512xf32>
    %190 = arith.addf %187, %189 : vector<16x512xf32>
    %cst_85 = arith.constant 0.000000e+00 : f32
    %191 = vector.broadcast %cst_85 : f32 to vector<16x512xf32>
    %192 = arith.maximumf %190, %191 : vector<16x512xf32>
    %193 = vector.extract_strided_slice %192 {offsets = [0, 1], sizes = [16, 511], strides = [1, 1]} : vector<16x512xf32> to vector<16x511xf32>
    %194 = vector.extract_strided_slice %192 {offsets = [0, 0], sizes = [16, 1], strides = [1, 1]} : vector<16x512xf32> to vector<16x1xf32>
    %195 = tpu.concatenate %193, %194 in 1 : vector<16x511xf32>, vector<16x1xf32> -> vector<16x512xf32>
    %196 = arith.maximumf %192, %195 : vector<16x512xf32>
    %197 = vector.extract_strided_slice %192 {offsets = [0, 14], sizes = [16, 498], strides = [1, 1]} : vector<16x512xf32> to vector<16x498xf32>
    %198 = vector.extract_strided_slice %192 {offsets = [0, 0], sizes = [16, 14], strides = [1, 1]} : vector<16x512xf32> to vector<16x14xf32>
    %199 = tpu.concatenate %197, %198 in 1 : vector<16x498xf32>, vector<16x14xf32> -> vector<16x512xf32>
    %200 = vector.extract_strided_slice %192 {offsets = [0, 15], sizes = [16, 497], strides = [1, 1]} : vector<16x512xf32> to vector<16x497xf32>
    %201 = vector.extract_strided_slice %192 {offsets = [0, 0], sizes = [16, 15], strides = [1, 1]} : vector<16x512xf32> to vector<16x15xf32>
    %202 = tpu.concatenate %200, %201 in 1 : vector<16x497xf32>, vector<16x15xf32> -> vector<16x512xf32>
    %203 = arith.maximumf %199, %202 : vector<16x512xf32>
    %204 = arith.maximumf %196, %203 : vector<16x512xf32>
    %c0_86 = arith.constant 0 : index
    %c0_87 = arith.constant 0 : index
    %205 = vector.load %arg6[%c0_86, %c0_87] : memref<512x128xf32, #tpu.memory_space<vmem>>, vector<512x128xf32>
    %cst_88 = arith.constant dense<0.000000e+00> : vector<16x128xf32>
    %206 = tpu.matmul %204, %205, %cst_88 {dimension_numbers = #tpu.dot_dimension_numbers<[1], [0], [0], [1], [0, 0, 1, 1], [], []>} : vector<16x512xf32>, vector<512x128xf32>, vector<16x128xf32> -> vector<16x128xf32>
    %c0_89 = arith.constant 0 : index
    %c0_90 = arith.constant 0 : index
    %207 = vector.load %arg7[%c0_89, %c0_90] : memref<400x120xf32, #tpu.memory_space<vmem>>, vector<400x120xf32>
    %cst_91 = arith.constant 0.000000e+00 : f32
    %208 = vector.broadcast %cst_91 : f32 to vector<2x120xf32>
    %c0_92 = arith.constant 0 : index
    %c0_93 = arith.constant 0 : index
    %209 = vector.load %arg8[%c0_92, %c0_93] : memref<1x120xf32, #tpu.memory_space<vmem>>, vector<1x120xf32>
    %210 = vector.broadcast %209 : vector<1x120xf32> to vector<2x120xf32>
    %211 = arith.addf %208, %210 : vector<2x120xf32>
    %212 = vector.extract_strided_slice %206 {offsets = [0, 0], sizes = [1, 25], strides = [1, 1]} : vector<16x128xf32> to vector<1x25xf32>
    %213 = vector.extract_strided_slice %206 {offsets = [0, 25], sizes = [1, 25], strides = [1, 1]} : vector<16x128xf32> to vector<1x25xf32>
    %214 = tpu.concatenate %212, %213 in 0 : vector<1x25xf32>, vector<1x25xf32> -> vector<2x25xf32>
    %215 = vector.extract_strided_slice %207 {offsets = [0, 0], sizes = [25, 120], strides = [1, 1]} : vector<400x120xf32> to vector<25x120xf32>
    %cst_94 = arith.constant dense<0.000000e+00> : vector<2x120xf32>
    %216 = tpu.matmul %214, %215, %cst_94 {dimension_numbers = #tpu.dot_dimension_numbers<[1], [0], [0], [1], [0, 0, 1, 1], [], []>} : vector<2x25xf32>, vector<25x120xf32>, vector<2x120xf32> -> vector<2x120xf32>
    %217 = arith.addf %211, %216 : vector<2x120xf32>
    %218 = vector.extract_strided_slice %206 {offsets = [1, 0], sizes = [1, 25], strides = [1, 1]} : vector<16x128xf32> to vector<1x25xf32>
    %219 = vector.extract_strided_slice %206 {offsets = [1, 25], sizes = [1, 25], strides = [1, 1]} : vector<16x128xf32> to vector<1x25xf32>
    %220 = tpu.concatenate %218, %219 in 0 : vector<1x25xf32>, vector<1x25xf32> -> vector<2x25xf32>
    %221 = vector.extract_strided_slice %207 {offsets = [25, 0], sizes = [25, 120], strides = [1, 1]} : vector<400x120xf32> to vector<25x120xf32>
    %cst_95 = arith.constant dense<0.000000e+00> : vector<2x120xf32>
    %222 = tpu.matmul %220, %221, %cst_95 {dimension_numbers = #tpu.dot_dimension_numbers<[1], [0], [0], [1], [0, 0, 1, 1], [], []>} : vector<2x25xf32>, vector<25x120xf32>, vector<2x120xf32> -> vector<2x120xf32>
    %223 = arith.addf %217, %222 : vector<2x120xf32>
    %224 = vector.extract_strided_slice %206 {offsets = [2, 0], sizes = [1, 25], strides = [1, 1]} : vector<16x128xf32> to vector<1x25xf32>
    %225 = vector.extract_strided_slice %206 {offsets = [2, 25], sizes = [1, 25], strides = [1, 1]} : vector<16x128xf32> to vector<1x25xf32>
    %226 = tpu.concatenate %224, %225 in 0 : vector<1x25xf32>, vector<1x25xf32> -> vector<2x25xf32>
    %227 = vector.extract_strided_slice %207 {offsets = [50, 0], sizes = [25, 120], strides = [1, 1]} : vector<400x120xf32> to vector<25x120xf32>
    %cst_96 = arith.constant dense<0.000000e+00> : vector<2x120xf32>
    %228 = tpu.matmul %226, %227, %cst_96 {dimension_numbers = #tpu.dot_dimension_numbers<[1], [0], [0], [1], [0, 0, 1, 1], [], []>} : vector<2x25xf32>, vector<25x120xf32>, vector<2x120xf32> -> vector<2x120xf32>
    %229 = arith.addf %223, %228 : vector<2x120xf32>
    %230 = vector.extract_strided_slice %206 {offsets = [3, 0], sizes = [1, 25], strides = [1, 1]} : vector<16x128xf32> to vector<1x25xf32>
    %231 = vector.extract_strided_slice %206 {offsets = [3, 25], sizes = [1, 25], strides = [1, 1]} : vector<16x128xf32> to vector<1x25xf32>
    %232 = tpu.concatenate %230, %231 in 0 : vector<1x25xf32>, vector<1x25xf32> -> vector<2x25xf32>
    %233 = vector.extract_strided_slice %207 {offsets = [75, 0], sizes = [25, 120], strides = [1, 1]} : vector<400x120xf32> to vector<25x120xf32>
    %cst_97 = arith.constant dense<0.000000e+00> : vector<2x120xf32>
    %234 = tpu.matmul %232, %233, %cst_97 {dimension_numbers = #tpu.dot_dimension_numbers<[1], [0], [0], [1], [0, 0, 1, 1], [], []>} : vector<2x25xf32>, vector<25x120xf32>, vector<2x120xf32> -> vector<2x120xf32>
    %235 = arith.addf %229, %234 : vector<2x120xf32>
    %236 = vector.extract_strided_slice %206 {offsets = [4, 0], sizes = [1, 25], strides = [1, 1]} : vector<16x128xf32> to vector<1x25xf32>
    %237 = vector.extract_strided_slice %206 {offsets = [4, 25], sizes = [1, 25], strides = [1, 1]} : vector<16x128xf32> to vector<1x25xf32>
    %238 = tpu.concatenate %236, %237 in 0 : vector<1x25xf32>, vector<1x25xf32> -> vector<2x25xf32>
    %239 = vector.extract_strided_slice %207 {offsets = [100, 0], sizes = [25, 120], strides = [1, 1]} : vector<400x120xf32> to vector<25x120xf32>
    %cst_98 = arith.constant dense<0.000000e+00> : vector<2x120xf32>
    %240 = tpu.matmul %238, %239, %cst_98 {dimension_numbers = #tpu.dot_dimension_numbers<[1], [0], [0], [1], [0, 0, 1, 1], [], []>} : vector<2x25xf32>, vector<25x120xf32>, vector<2x120xf32> -> vector<2x120xf32>
    %241 = arith.addf %235, %240 : vector<2x120xf32>
    %242 = vector.extract_strided_slice %206 {offsets = [5, 0], sizes = [1, 25], strides = [1, 1]} : vector<16x128xf32> to vector<1x25xf32>
    %243 = vector.extract_strided_slice %206 {offsets = [5, 25], sizes = [1, 25], strides = [1, 1]} : vector<16x128xf32> to vector<1x25xf32>
    %244 = tpu.concatenate %242, %243 in 0 : vector<1x25xf32>, vector<1x25xf32> -> vector<2x25xf32>
    %245 = vector.extract_strided_slice %207 {offsets = [125, 0], sizes = [25, 120], strides = [1, 1]} : vector<400x120xf32> to vector<25x120xf32>
    %cst_99 = arith.constant dense<0.000000e+00> : vector<2x120xf32>
    %246 = tpu.matmul %244, %245, %cst_99 {dimension_numbers = #tpu.dot_dimension_numbers<[1], [0], [0], [1], [0, 0, 1, 1], [], []>} : vector<2x25xf32>, vector<25x120xf32>, vector<2x120xf32> -> vector<2x120xf32>
    %247 = arith.addf %241, %246 : vector<2x120xf32>
    %248 = vector.extract_strided_slice %206 {offsets = [6, 0], sizes = [1, 25], strides = [1, 1]} : vector<16x128xf32> to vector<1x25xf32>
    %249 = vector.extract_strided_slice %206 {offsets = [6, 25], sizes = [1, 25], strides = [1, 1]} : vector<16x128xf32> to vector<1x25xf32>
    %250 = tpu.concatenate %248, %249 in 0 : vector<1x25xf32>, vector<1x25xf32> -> vector<2x25xf32>
    %251 = vector.extract_strided_slice %207 {offsets = [150, 0], sizes = [25, 120], strides = [1, 1]} : vector<400x120xf32> to vector<25x120xf32>
    %cst_100 = arith.constant dense<0.000000e+00> : vector<2x120xf32>
    %252 = tpu.matmul %250, %251, %cst_100 {dimension_numbers = #tpu.dot_dimension_numbers<[1], [0], [0], [1], [0, 0, 1, 1], [], []>} : vector<2x25xf32>, vector<25x120xf32>, vector<2x120xf32> -> vector<2x120xf32>
    %253 = arith.addf %247, %252 : vector<2x120xf32>
    %254 = vector.extract_strided_slice %206 {offsets = [7, 0], sizes = [1, 25], strides = [1, 1]} : vector<16x128xf32> to vector<1x25xf32>
    %255 = vector.extract_strided_slice %206 {offsets = [7, 25], sizes = [1, 25], strides = [1, 1]} : vector<16x128xf32> to vector<1x25xf32>
    %256 = tpu.concatenate %254, %255 in 0 : vector<1x25xf32>, vector<1x25xf32> -> vector<2x25xf32>
    %257 = vector.extract_strided_slice %207 {offsets = [175, 0], sizes = [25, 120], strides = [1, 1]} : vector<400x120xf32> to vector<25x120xf32>
    %cst_101 = arith.constant dense<0.000000e+00> : vector<2x120xf32>
    %258 = tpu.matmul %256, %257, %cst_101 {dimension_numbers = #tpu.dot_dimension_numbers<[1], [0], [0], [1], [0, 0, 1, 1], [], []>} : vector<2x25xf32>, vector<25x120xf32>, vector<2x120xf32> -> vector<2x120xf32>
    %259 = arith.addf %253, %258 : vector<2x120xf32>
    %260 = vector.extract_strided_slice %206 {offsets = [8, 0], sizes = [1, 25], strides = [1, 1]} : vector<16x128xf32> to vector<1x25xf32>
    %261 = vector.extract_strided_slice %206 {offsets = [8, 25], sizes = [1, 25], strides = [1, 1]} : vector<16x128xf32> to vector<1x25xf32>
    %262 = tpu.concatenate %260, %261 in 0 : vector<1x25xf32>, vector<1x25xf32> -> vector<2x25xf32>
    %263 = vector.extract_strided_slice %207 {offsets = [200, 0], sizes = [25, 120], strides = [1, 1]} : vector<400x120xf32> to vector<25x120xf32>
    %cst_102 = arith.constant dense<0.000000e+00> : vector<2x120xf32>
    %264 = tpu.matmul %262, %263, %cst_102 {dimension_numbers = #tpu.dot_dimension_numbers<[1], [0], [0], [1], [0, 0, 1, 1], [], []>} : vector<2x25xf32>, vector<25x120xf32>, vector<2x120xf32> -> vector<2x120xf32>
    %265 = arith.addf %259, %264 : vector<2x120xf32>
    %266 = vector.extract_strided_slice %206 {offsets = [9, 0], sizes = [1, 25], strides = [1, 1]} : vector<16x128xf32> to vector<1x25xf32>
    %267 = vector.extract_strided_slice %206 {offsets = [9, 25], sizes = [1, 25], strides = [1, 1]} : vector<16x128xf32> to vector<1x25xf32>
    %268 = tpu.concatenate %266, %267 in 0 : vector<1x25xf32>, vector<1x25xf32> -> vector<2x25xf32>
    %269 = vector.extract_strided_slice %207 {offsets = [225, 0], sizes = [25, 120], strides = [1, 1]} : vector<400x120xf32> to vector<25x120xf32>
    %cst_103 = arith.constant dense<0.000000e+00> : vector<2x120xf32>
    %270 = tpu.matmul %268, %269, %cst_103 {dimension_numbers = #tpu.dot_dimension_numbers<[1], [0], [0], [1], [0, 0, 1, 1], [], []>} : vector<2x25xf32>, vector<25x120xf32>, vector<2x120xf32> -> vector<2x120xf32>
    %271 = arith.addf %265, %270 : vector<2x120xf32>
    %272 = vector.extract_strided_slice %206 {offsets = [10, 0], sizes = [1, 25], strides = [1, 1]} : vector<16x128xf32> to vector<1x25xf32>
    %273 = vector.extract_strided_slice %206 {offsets = [10, 25], sizes = [1, 25], strides = [1, 1]} : vector<16x128xf32> to vector<1x25xf32>
    %274 = tpu.concatenate %272, %273 in 0 : vector<1x25xf32>, vector<1x25xf32> -> vector<2x25xf32>
    %275 = vector.extract_strided_slice %207 {offsets = [250, 0], sizes = [25, 120], strides = [1, 1]} : vector<400x120xf32> to vector<25x120xf32>
    %cst_104 = arith.constant dense<0.000000e+00> : vector<2x120xf32>
    %276 = tpu.matmul %274, %275, %cst_104 {dimension_numbers = #tpu.dot_dimension_numbers<[1], [0], [0], [1], [0, 0, 1, 1], [], []>} : vector<2x25xf32>, vector<25x120xf32>, vector<2x120xf32> -> vector<2x120xf32>
    %277 = arith.addf %271, %276 : vector<2x120xf32>
    %278 = vector.extract_strided_slice %206 {offsets = [11, 0], sizes = [1, 25], strides = [1, 1]} : vector<16x128xf32> to vector<1x25xf32>
    %279 = vector.extract_strided_slice %206 {offsets = [11, 25], sizes = [1, 25], strides = [1, 1]} : vector<16x128xf32> to vector<1x25xf32>
    %280 = tpu.concatenate %278, %279 in 0 : vector<1x25xf32>, vector<1x25xf32> -> vector<2x25xf32>
    %281 = vector.extract_strided_slice %207 {offsets = [275, 0], sizes = [25, 120], strides = [1, 1]} : vector<400x120xf32> to vector<25x120xf32>
    %cst_105 = arith.constant dense<0.000000e+00> : vector<2x120xf32>
    %282 = tpu.matmul %280, %281, %cst_105 {dimension_numbers = #tpu.dot_dimension_numbers<[1], [0], [0], [1], [0, 0, 1, 1], [], []>} : vector<2x25xf32>, vector<25x120xf32>, vector<2x120xf32> -> vector<2x120xf32>
    %283 = arith.addf %277, %282 : vector<2x120xf32>
    %284 = vector.extract_strided_slice %206 {offsets = [12, 0], sizes = [1, 25], strides = [1, 1]} : vector<16x128xf32> to vector<1x25xf32>
    %285 = vector.extract_strided_slice %206 {offsets = [12, 25], sizes = [1, 25], strides = [1, 1]} : vector<16x128xf32> to vector<1x25xf32>
    %286 = tpu.concatenate %284, %285 in 0 : vector<1x25xf32>, vector<1x25xf32> -> vector<2x25xf32>
    %287 = vector.extract_strided_slice %207 {offsets = [300, 0], sizes = [25, 120], strides = [1, 1]} : vector<400x120xf32> to vector<25x120xf32>
    %cst_106 = arith.constant dense<0.000000e+00> : vector<2x120xf32>
    %288 = tpu.matmul %286, %287, %cst_106 {dimension_numbers = #tpu.dot_dimension_numbers<[1], [0], [0], [1], [0, 0, 1, 1], [], []>} : vector<2x25xf32>, vector<25x120xf32>, vector<2x120xf32> -> vector<2x120xf32>
    %289 = arith.addf %283, %288 : vector<2x120xf32>
    %290 = vector.extract_strided_slice %206 {offsets = [13, 0], sizes = [1, 25], strides = [1, 1]} : vector<16x128xf32> to vector<1x25xf32>
    %291 = vector.extract_strided_slice %206 {offsets = [13, 25], sizes = [1, 25], strides = [1, 1]} : vector<16x128xf32> to vector<1x25xf32>
    %292 = tpu.concatenate %290, %291 in 0 : vector<1x25xf32>, vector<1x25xf32> -> vector<2x25xf32>
    %293 = vector.extract_strided_slice %207 {offsets = [325, 0], sizes = [25, 120], strides = [1, 1]} : vector<400x120xf32> to vector<25x120xf32>
    %cst_107 = arith.constant dense<0.000000e+00> : vector<2x120xf32>
    %294 = tpu.matmul %292, %293, %cst_107 {dimension_numbers = #tpu.dot_dimension_numbers<[1], [0], [0], [1], [0, 0, 1, 1], [], []>} : vector<2x25xf32>, vector<25x120xf32>, vector<2x120xf32> -> vector<2x120xf32>
    %295 = arith.addf %289, %294 : vector<2x120xf32>
    %296 = vector.extract_strided_slice %206 {offsets = [14, 0], sizes = [1, 25], strides = [1, 1]} : vector<16x128xf32> to vector<1x25xf32>
    %297 = vector.extract_strided_slice %206 {offsets = [14, 25], sizes = [1, 25], strides = [1, 1]} : vector<16x128xf32> to vector<1x25xf32>
    %298 = tpu.concatenate %296, %297 in 0 : vector<1x25xf32>, vector<1x25xf32> -> vector<2x25xf32>
    %299 = vector.extract_strided_slice %207 {offsets = [350, 0], sizes = [25, 120], strides = [1, 1]} : vector<400x120xf32> to vector<25x120xf32>
    %cst_108 = arith.constant dense<0.000000e+00> : vector<2x120xf32>
    %300 = tpu.matmul %298, %299, %cst_108 {dimension_numbers = #tpu.dot_dimension_numbers<[1], [0], [0], [1], [0, 0, 1, 1], [], []>} : vector<2x25xf32>, vector<25x120xf32>, vector<2x120xf32> -> vector<2x120xf32>
    %301 = arith.addf %295, %300 : vector<2x120xf32>
    %302 = vector.extract_strided_slice %206 {offsets = [15, 0], sizes = [1, 25], strides = [1, 1]} : vector<16x128xf32> to vector<1x25xf32>
    %303 = vector.extract_strided_slice %206 {offsets = [15, 25], sizes = [1, 25], strides = [1, 1]} : vector<16x128xf32> to vector<1x25xf32>
    %304 = tpu.concatenate %302, %303 in 0 : vector<1x25xf32>, vector<1x25xf32> -> vector<2x25xf32>
    %305 = vector.extract_strided_slice %207 {offsets = [375, 0], sizes = [25, 120], strides = [1, 1]} : vector<400x120xf32> to vector<25x120xf32>
    %cst_109 = arith.constant dense<0.000000e+00> : vector<2x120xf32>
    %306 = tpu.matmul %304, %305, %cst_109 {dimension_numbers = #tpu.dot_dimension_numbers<[1], [0], [0], [1], [0, 0, 1, 1], [], []>} : vector<2x25xf32>, vector<25x120xf32>, vector<2x120xf32> -> vector<2x120xf32>
    %307 = arith.addf %301, %306 : vector<2x120xf32>
    %cst_110 = arith.constant 0.000000e+00 : f32
    %308 = vector.broadcast %cst_110 : f32 to vector<2x120xf32>
    %309 = arith.maximumf %307, %308 : vector<2x120xf32>
    %c0_111 = arith.constant 0 : index
    %c0_112 = arith.constant 0 : index
    %310 = vector.load %arg9[%c0_111, %c0_112] : memref<120x84xf32, #tpu.memory_space<vmem>>, vector<120x84xf32>
    %cst_113 = arith.constant dense<0.000000e+00> : vector<2x84xf32>
    %311 = tpu.matmul %309, %310, %cst_113 {dimension_numbers = #tpu.dot_dimension_numbers<[1], [0], [0], [1], [0, 0, 1, 1], [], []>} : vector<2x120xf32>, vector<120x84xf32>, vector<2x84xf32> -> vector<2x84xf32>
    %c0_114 = arith.constant 0 : index
    %c0_115 = arith.constant 0 : index
    %312 = vector.load %arg10[%c0_114, %c0_115] : memref<1x84xf32, #tpu.memory_space<vmem>>, vector<1x84xf32>
    %313 = vector.broadcast %312 : vector<1x84xf32> to vector<2x84xf32>
    %314 = arith.addf %311, %313 : vector<2x84xf32>
    %cst_116 = arith.constant 0.000000e+00 : f32
    %315 = vector.broadcast %cst_116 : f32 to vector<2x84xf32>
    %316 = arith.maximumf %314, %315 : vector<2x84xf32>
    %c0_117 = arith.constant 0 : index
    %c0_118 = arith.constant 0 : index
    %317 = vector.load %arg11[%c0_117, %c0_118] : memref<84x10xf32, #tpu.memory_space<vmem>>, vector<84x10xf32>
    %cst_119 = arith.constant dense<0.000000e+00> : vector<2x10xf32>
    %318 = tpu.matmul %316, %317, %cst_119 {dimension_numbers = #tpu.dot_dimension_numbers<[1], [0], [0], [1], [0, 0, 1, 1], [], []>} : vector<2x84xf32>, vector<84x10xf32>, vector<2x10xf32> -> vector<2x10xf32>
    %c0_120 = arith.constant 0 : index
    %c0_121 = arith.constant 0 : index
    %319 = vector.load %arg12[%c0_120, %c0_121] : memref<1x10xf32, #tpu.memory_space<vmem>>, vector<1x10xf32>
    %320 = vector.broadcast %319 : vector<1x10xf32> to vector<2x10xf32>
    %321 = arith.addf %318, %320 : vector<2x10xf32>
    %c0_122 = arith.constant 0 : index
    %c0_123 = arith.constant 0 : index
    %322 = vector.load %arg13[%c0_122, %c0_123] : memref<2x10xf32, #tpu.memory_space<vmem>>, vector<2x10xf32>
    tpu.vector_store %arg13[%c0_122, %c0_123], %321 {strides = array<i32>} : memref<2x10xf32, #tpu.memory_space<vmem>>, vector<2x10xf32>,
    return
  }
  func.func @transform_0(%arg0: i32) -> (i32, i32) {
    %c0_i32 = arith.constant 0 : i32
    %c0_i32_0 = arith.constant 0 : i32
    %c0_i32_1 = arith.constant 0 : i32
    return %c0_i32, %c0_i32_0 : i32, i32
  }
  func.func @transform_1(%arg0: i32) -> (i32, i32) {
    %c0_i32 = arith.constant 0 : i32
    %c0_i32_0 = arith.constant 0 : i32
    %c0_i32_1 = arith.constant 0 : i32
    return %c0_i32, %c0_i32_0 : i32, i32
  }
  func.func @transform_2(%arg0: i32) -> (i32, i32) {
    %c0_i32 = arith.constant 0 : i32
    %c0_i32_0 = arith.constant 0 : i32
    %c0_i32_1 = arith.constant 0 : i32
    return %c0_i32, %c0_i32_0 : i32, i32
  }
  func.func @transform_3(%arg0: i32) -> (i32, i32, i32) {
    %c0_i32 = arith.constant 0 : i32
    %c0_i32_0 = arith.constant 0 : i32
    %c0_i32_1 = arith.constant 0 : i32
    %c0_i32_2 = arith.constant 0 : i32
    return %c0_i32, %c0_i32_0, %c0_i32_1 : i32, i32, i32
  }
  func.func @transform_4(%arg0: i32) -> (i32, i32) {
    %c0_i32 = arith.constant 0 : i32
    %c0_i32_0 = arith.constant 0 : i32
    %c0_i32_1 = arith.constant 0 : i32
    return %c0_i32, %c0_i32_0 : i32, i32
  }
  func.func @transform_5(%arg0: i32) -> (i32, i32) {
    %c0_i32 = arith.constant 0 : i32
    %c0_i32_0 = arith.constant 0 : i32
    %c0_i32_1 = arith.constant 0 : i32
    return %c0_i32, %c0_i32_0 : i32, i32
  }
  func.func @transform_6(%arg0: i32) -> (i32, i32) {
    %c0_i32 = arith.constant 0 : i32
    %c0_i32_0 = arith.constant 0 : i32
    %c0_i32_1 = arith.constant 0 : i32
    return %c0_i32, %c0_i32_0 : i32, i32
  }
  func.func @transform_7(%arg0: i32) -> (i32, i32) {
    %c0_i32 = arith.constant 0 : i32
    %c0_i32_0 = arith.constant 0 : i32
    %c0_i32_1 = arith.constant 0 : i32
    return %c0_i32, %c0_i32_0 : i32, i32
  }
  func.func @transform_8(%arg0: i32) -> (i32, i32) {
    %c0_i32 = arith.constant 0 : i32
    %c0_i32_0 = arith.constant 0 : i32
    %c0_i32_1 = arith.constant 0 : i32
    return %c0_i32, %c0_i32_0 : i32, i32
  }
  func.func @transform_9(%arg0: i32) -> (i32, i32) {
    %c0_i32 = arith.constant 0 : i32
    %c0_i32_0 = arith.constant 0 : i32
    %c0_i32_1 = arith.constant 0 : i32
    return %c0_i32, %c0_i32_0 : i32, i32
  }
  func.func @transform_10(%arg0: i32) -> (i32, i32) {
    %c0_i32 = arith.constant 0 : i32
    %c0_i32_0 = arith.constant 0 : i32
    %c0_i32_1 = arith.constant 0 : i32
    return %c0_i32, %c0_i32_0 : i32, i32
  }
  func.func @transform_11(%arg0: i32) -> (i32, i32) {
    %c0_i32 = arith.constant 0 : i32
    %c0_i32_0 = arith.constant 0 : i32
    %c0_i32_1 = arith.constant 0 : i32
    return %c0_i32, %c0_i32_0 : i32, i32
  }
  func.func @transform_12(%arg0: i32) -> (i32, i32) {
    %c0_i32 = arith.constant 0 : i32
    %c0_i32_0 = arith.constant 0 : i32
    %c0_i32_1 = arith.constant 0 : i32
    return %c0_i32, %c0_i32_0 : i32, i32
  }
}

</mosaic_0001>

<bundles_post_ra>
// kernel: net_forward.1
= control target key start
LH: loop header
LB: loop body
LE: loop exit
PB: predicated region body
PF: predicated region fallthrough
CT: control target
= control target key end

     0   :  { %vm117_vm0 = vcmask 1040384   ;;  %v8839_v7 = vmov 0.0   ;;  %v8840_v13 = vmov 0   ;;  %vm8841_vm1 = vmmov 1   ;;  %s10663_s0 = inlined_call_operand.vmem [shape: f32[25,2048], index: 0, kind: input, shape index: {}]   ;;  %s10664_s1 = inlined_call_operand.vmem [shape: f32[8,25], index: 1, kind: input, shape index: {}]   ;;  %s10665_s2 = inlined_call_operand.vmem [shape: f32[8,1], index: 2, kind: input, shape index: {}]   ;;  %s10666_s3 = inlined_call_operand.vmem [shape: f32[25,16,8], index: 3, kind: input, shape index: {}]   ;;  %s10667_s4 = inlined_call_operand.vmem [shape: f32[16,1], index: 4, kind: input, shape index: {}]   ;;  %s10668_s5 = inlined_call_operand.vmem [shape: f32[512,128], index: 5, kind: input, shape index: {}]   ;;  %s10669_s6 = inlined_call_operand.vmem [shape: f32[400,120], index: 6, kind: input, shape index: {}]   ;;  %s10670_s7 = inlined_call_operand.vmem [shape: f32[1,120], index: 7, kind: input, shape index: {}]   ;;  %s10671_s8 = inlined_call_operand.vmem [shape: f32[120,84], index: 8, kind: input, shape index: {}]   ;;  %s10672_s9 = inlined_call_operand.vmem [shape: f32[1,84], index: 9, kind: input, shape index: {}]   ;;  %s10673_s10 = inlined_call_operand.vmem [shape: f32[84,10], index: 10, kind: input, shape index: {}]   ;;  %s10674_s11 = inlined_call_operand.vmem [shape: f32[1,10], index: 11, kind: input, shape index: {}]   ;;  %s10675_s12 = inlined_call_operand.hbm [shape: f32[2,10], index: 12, kind: output, shape index: {}]  }
   0x1   :  { %v44_v0 = vld [vmem:[%s10663_s0 + $0x8] sm:$0xff]  ;;  %v43_v5 = vld [vmem:[%s10663_s0] sm:$0xff]  ;;  %230 = vmatprep.mubr.f32.mxu1 %v8839_v7  ;;  %372 = vmatprep.mubr.f32.mxu0 %v8839_v7  ;;  %vm8968_vm2 = vmpackc.low %vm117_vm0, %vm8841_vm1  ;;  %vm113_vm3 = vcmask 203776  }
   0x2   :  { %v60_v1 = vld [vmem:[%s10663_s0 + $0x88] sm:$0xff]  ;;  %v59_v6 = vld [vmem:[%s10663_s0 + $0x80] sm:$0xff]  ;;  %8773 = vset.pattern.permute.xlu0 %v8840_v13  ;;  %8774 = vset.pattern.permute.xlu1 %v8840_v13  ;;  %v46_v28 = vld [vmem:[%s10663_s0 + $0x18] sm:$0xff] }
   0x3   :  { %v48_v2 = vld [vmem:[%s10663_s0 + $0x28] sm:$0xff]  ;;  %v8227_v3 = vpack.c.bf16 %v60_v1, %v44_v0  ;;  %v8229_v9 = vpack.c.bf16 %v59_v6, %v43_v5  ;;  %v47_v10 = vld [vmem:[%s10663_s0 + $0x20] sm:$0xff]  ;;  %v62_v29 = vld [vmem:[%s10663_s0 + $0x98] sm:$0xff] }
   0x4   :  { %v64_v4 = vld [vmem:[%s10663_s0 + $0xa8] sm:$0xff]  ;;  %v63_v11 = vld [vmem:[%s10663_s0 + $0xa0] sm:$0xff]  ;;  %v8237_v31 = vpack.c.bf16 %v62_v29, %v46_v28  ;;  %v45_v33 = vld [vmem:[%s10663_s0 + $0x10] sm:$0xff] }
   0x5   :  { %v8247_v8 = vpack.c.bf16 %v64_v4, %v48_v2  ;;  %v76_v12 = vld [vmem:[%s10663_s0 + $0x108] sm:$0xff]  ;;  %8228 = vmatprep.subr.bf16.mxu1 %v8227_v3  ;;  %v8249_v14 = vpack.c.bf16 %v63_v11, %v47_v10  ;;  %v75_v20 = vld [vmem:[%s10663_s0 + $0x100] sm:$0xff]  ;;  %v61_v34 = vld [vmem:[%s10663_s0 + $0x90] sm:$0xff] }
   0x6   :  { %v92_v15 = vld [vmem:[%s10663_s0 + $0x188] sm:$0x1]  ;;  %8230 = vmatpush1.bf16.msra.mxu1 %v8229_v9  ;;  %v91_v21 = vld [vmem:[%s10663_s0 + $0x180] sm:$0x1]  ;;  %v8239_v36 = vpack.c.bf16 %v61_v34, %v45_v33  ;;  %v78_v39 = vld [vmem:[%s10663_s0 + $0x118] sm:$0xff] }
   0x7   :  { %v80_v17 = vld [vmem:[%s10663_s0 + $0x128] sm:$0xff]  ;;  %8248 = vmatprep.subr.bf16.mxu0 %v8247_v8  ;;  %v8231_v18 = vpack.c.bf16 %v92_v15, %v76_v12  ;;  %v8234_v23 = vpack.c.bf16 %v91_v21, %v75_v20  ;;  %v79_v24 = vld [vmem:[%s10663_s0 + $0x120] sm:$0xff]  ;;  %v94_v41 = vld [vmem:[%s10663_s0 + $0x198] sm:$0x1] }
   0x8   :  { %v96_v19 = vld [vmem:[%s10663_s0 + $0x1a8] sm:$0x1]  ;;  %8250 = vmatpush1.bf16.msra.mxu0 %v8249_v14  ;;  %v95_v25 = vld [vmem:[%s10663_s0 + $0x1a0] sm:$0x1]  ;;  %v8241_v44 = vpack.c.bf16 %v94_v41, %v78_v39  ;;  %v77_v46 = vld [vmem:[%s10663_s0 + $0x110] sm:$0xff] }
   0x9   :  { %v8251_v22 = vpack.c.bf16 %v96_v19, %v80_v17  ;;  %8233 = vmatprep.subr.msk.bf16.mxu1 %vm8968_vm2, %v8231_v18  ;;  %v8254_v26 = vpack.c.bf16 %v95_v25, %v79_v24  ;;  %v8995_v27 = vld [vmem:[%s10664_s1] sm:$0xff]  ;;  %v52_v30 = vld [vmem:[%s10663_s0 + $0x48] sm:$0xff]  ;;  %v93_v47 = vld [vmem:[%s10663_s0 + $0x190] sm:$0x1] }
   0xa   :  { %v68_v32 = vld [vmem:[%s10663_s0 + $0xc8] sm:$0xff]  ;;  %8236 = vmatpush1.bf16.msk.msra.mxu1 %vm8968_vm2, %v8234_v23  ;;  %v51_v37 = vld [vmem:[%s10663_s0 + $0x40] sm:$0xff]  ;;  %v50_v50 = vld [vmem:[%s10663_s0 + $0x38] sm:$0xff]  ;;  %v8244_v52 = vpack.c.bf16 %v93_v47, %v77_v46 }
   0xb   :  { %8253 = vmatprep.subr.msk.bf16.mxu0 %vm8968_vm2, %v8251_v22  ;;  %v8267_v35 = vpack.c.bf16 %v68_v32, %v52_v30  ;;  %v67_v38 = vld [vmem:[%s10663_s0 + $0xc0] sm:$0xff]  ;;  %8238 = vmatprep.subr.bf16.mxu1 %v8237_v31  ;;  %v84_v42 = vld [vmem:[%s10663_s0 + $0x148] sm:$0xff]  ;;  %v66_v51 = vld [vmem:[%s10663_s0 + $0xb8] sm:$0xff] }
   0xc   :  { %8256 = vmatpush1.bf16.msk.msra.mxu0 %vm8968_vm2, %v8254_v26  ;;  %v8269_v40 = vpack.c.bf16 %v67_v38, %v51_v37  ;;  %v100_v43 = vld [vmem:[%s10663_s0 + $0x1c8] sm:$0x1]  ;;  %v83_v48 = vld [vmem:[%s10663_s0 + $0x140] sm:$0xff]  ;;  %v8257_v56 = vpack.c.bf16 %v66_v51, %v50_v50  ;;  %v49_v57 = vld [vmem:[%s10663_s0 + $0x30] sm:$0xff] }
   0xd   :  { %8268 = vmatprep.subr.bf16.mxu0 %v8267_v35  ;;  %v8271_v45 = vpack.c.bf16 %v100_v43, %v84_v42  ;;  %7601 = vmatmul.mubr.msk.f32.vlgmr.msra.gmra.mrb[0].mxu1 %vm113_vm3, %v8995_v27  ;;  %v99_v49 = vld [vmem:[%s10663_s0 + $0x1c0] sm:$0x1]  ;;  %v56_v53 = vld [vmem:[%s10663_s0 + $0x68] sm:$0xff]  ;;  %v65_v58 = vld [vmem:[%s10663_s0 + $0xb0] sm:$0xff] }
   0xe   :  { %8240 = vmatpush1.bf16.msra.mxu1 %v8239_v36  ;;  %v72_v54 = vld [vmem:[%s10663_s0 + $0xe8] sm:$0xff]  ;;  %v8274_v55 = vpack.c.bf16 %v99_v49, %v83_v48  ;;  %v55_v59 = vld [vmem:[%s10663_s0 + $0x60] sm:$0xff]  ;;  %301 = vmatprep.mubr.f32.mxu1 %v8839_v7  ;;  %v82_v62 = vld [vmem:[%s10663_s0 + $0x138] sm:$0xff]  ;;  %v8259_v2 = vpack.c.bf16 %v65_v58, %v49_v57 }
   0xf   :  { %7607 = vmatmul.mubr.msk.f32.vlgmr.msra.gmra.mrb[0].mxu0 %vm113_vm3, %v8995_v27  ;;  %8243 = vmatprep.subr.msk.bf16.mxu1 %vm8968_vm2, %v8241_v44  ;;  %v8287_v60 = vpack.c.bf16 %v72_v54, %v56_v53  ;;  %v71_v61 = vld [vmem:[%s10663_s0 + $0xe0] sm:$0xff]  ;;  %v98_v63 = vld [vmem:[%s10663_s0 + $0x1b8] sm:$0x1]  ;;  %v88_v0 = vld [vmem:[%s10663_s0 + $0x168] sm:$0xff] }
  0x10   :  { %8270 = vmatpush1.bf16.msra.mxu0 %v8269_v40  ;;  %514 = vmatprep.mubr.f32.mxu0 %v8839_v7  ;;  %v104_v1 = vld [vmem:[%s10663_s0 + $0x1e8] sm:$0x1]  ;;  %v8289_v3 = vpack.c.bf16 %v71_v61, %v55_v59  ;;  %v8261_v4 = vpack.c.bf16 %v98_v63, %v82_v62  ;;  %v81_v5 = vld [vmem:[%s10663_s0 + $0x130] sm:$0xff]  ;;  %v87_v8 = vld [vmem:[%s10663_s0 + $0x160] sm:$0xff] }
  0x11   :  { %8273 = vmatprep.subr.msk.bf16.mxu0 %vm8968_vm2, %v8271_v45  ;;  %v97_v6 = vld [vmem:[%s10663_s0 + $0x1b0] sm:$0x1]  ;;  %v8291_v9 = vpack.c.bf16 %v104_v1, %v88_v0  ;;  %v103_v10 = vld [vmem:[%s10663_s0 + $0x1e0] sm:$0x1]  ;;  %v54_v11 = vld [vmem:[%s10663_s0 + $0x58] sm:$0xff] }
  0x12   :  { %8246 = vmatpush1.bf16.msk.msra.mxu1 %vm8968_vm2, %v8244_v52  ;;  %v70_v12 = vld [vmem:[%s10663_s0 + $0xd8] sm:$0xff]  ;;  %v8264_v13 = vpack.c.bf16 %v97_v6, %v81_v5  ;;  %v8294_v14 = vpack.c.bf16 %v103_v10, %v87_v8  ;;  %v53_v17 = vld [vmem:[%s10663_s0 + $0x50] sm:$0xff]  ;;  %v107_v21 = vld [vmem:[%s10665_s2] sm:$0xff] }
  0x13   :  { %8258 = vmatprep.subr.bf16.mxu1 %v8257_v56  ;;  %v8277_v15 = vpack.c.bf16 %v70_v12, %v54_v11  ;;  %v69_v18 = vld [vmem:[%s10663_s0 + $0xd0] sm:$0xff]  ;;  %v86_v19 = vld [vmem:[%s10663_s0 + $0x158] sm:$0xff] }
  0x14   :  { %8276 = vmatpush1.bf16.msk.msra.mxu0 %vm8968_vm2, %v8274_v55  ;;  %v102_v20 = vld [vmem:[%s10663_s0 + $0x1d8] sm:$0x1] }
  0x15   :  { %8288 = vmatprep.subr.bf16.mxu0 %v8287_v60  ;;  %7604 = vmatmul.mubr.msk.f32.vlgmr.msra.gmra.mrb[2].mxu1 %vm113_vm3, %v8995_v27 }
  0x16   :  { %8260 = vmatpush1.bf16.msra.mxu1 %v8259_v2  ;;  %443 = vmatprep.mubr.f32.mxu1 %v8839_v7 }
  0x17   :  { %7613 = vmatmul.mubr.msk.f32.vlgmr.msra.gmra.mrb[2].mxu0 %vm113_vm3, %v8995_v27  ;;  %8263 = vmatprep.subr.msk.bf16.mxu1 %vm8968_vm2, %v8261_v4 }
  0x18   :  { %8290 = vmatpush1.bf16.msra.mxu0 %v8289_v3 }
  0x19   :  { %8293 = vmatprep.subr.msk.bf16.mxu0 %vm8968_vm2, %v8291_v9 }
  0x1a   :  { %17 = vsyncpa [#allocation3], 0  ;;  %656 = vmatprep.mubr.f32.mxu0 %v8839_v7  ;;  %110 = vperm.xlu0 %8773, %v107_v21   ;;  %v8279_v22 = vpack.c.bf16 %v69_v18, %v53_v17  ;;  %v8281_v23 = vpack.c.bf16 %v102_v20, %v86_v19  ;;  %v85_v24 = vld [vmem:[%s10663_s0 + $0x150] sm:$0xff]  ;;  %v58_v26 = vld [vmem:[%s10663_s0 + $0x78] sm:$0xff]  ;;  %s8843_s21 = smov 126   ;;  %s8844_s22 = smov 125  }
  0x1b   :  { %8266 = vmatpush1.bf16.msk.msra.mxu1 %vm8968_vm2, %v8264_v13  ;;  %v101_v25 = vld [vmem:[%s10663_s0 + $0x1d0] sm:$0x1]  ;;  %v74_v28 = vld [vmem:[%s10663_s0 + $0xf8] sm:$0xff]  ;;  %s8845_s23 = smov 124   ;;  %s8846_s24 = smov 114   ;;  %vm779_vm4 = vcmask 1039360  }
  0x1c   :  { %8296 = vmatpush1.bf16.msk.msra.mxu0 %vm8968_vm2, %v8294_v14  ;;  %8278 = vmatprep.subr.bf16.mxu1 %v8277_v15  ;;  %v8284_v29 = vpack.c.bf16 %v101_v25, %v85_v24  ;;  %v8297_v30 = vpack.c.bf16 %v74_v28, %v58_v26  ;;  %v57_v31 = vld [vmem:[%s10663_s0 + $0x70] sm:$0xff]  ;;  %v90_v33 = vld [vmem:[%s10663_s0 + $0x178] sm:$0xff]  ;;  %s8847_s2 = smov 113   ;;  %s8848_s25 = smov 112   ;;  %vm789_vm5 = vcmask 64512   ;;  %vm1121_vm6 = vcmask 1031168  }
  0x1d   :  { %v73_v32 = vld [vmem:[%s10663_s0 + $0xf0] sm:$0xff]  ;;  %v106_v34 = vld [vmem:[%s10663_s0 + $0x1f8] sm:$0x1]  ;;  %s8849_s26 = smov 111   ;;  %s8850_s1 = smov 110   ;;  %vm1310_vm7 = vcmask 1022976  }
  0x1e   :  { %7610 = vmatmul.mubr.msk.f32.vlgmr.msra.gmra.mrb[4].mxu1 %vm113_vm3, %v8995_v27  ;;  %v8299_v35 = vpack.c.bf16 %v73_v32, %v57_v31  ;;  %v8301_v36 = vpack.c.bf16 %v106_v34, %v90_v33  ;;  %v89_v37 = vld [vmem:[%s10663_s0 + $0x170] sm:$0xff]  ;;  %s8851_s27 = smov 100   ;;  %s8852_s28 = smov 99   ;;  %vm1499_vm8 = vcmask 1014784   ;;  %vm1688_vm9 = vcmask 932864  }
  0x1f   :  { %7619 = vmatmul.mubr.msk.f32.vlgmr.msra.gmra.mrb[4].mxu0 %vm113_vm3, %v8995_v27  ;;  %8280 = vmatpush1.bf16.msra.mxu1 %v8279_v22  ;;  %v105_v38 = vld [vmem:[%s10663_s0 + $0x1f0] sm:$0x1]  ;;  %s8842_s0 = smov 127   ;;  %s8853_s29 = smov 98   ;;  %vm1877_vm10 = vcmask 924672   ;;  %vm2066_vm11 = vcmask 916480  }
  0x20   :  { %8283 = vmatprep.subr.msk.bf16.mxu1 %vm8968_vm2, %v8281_v23  ;;  %585 = vmatprep.mubr.f32.mxu1 %v8839_v7  ;;  %v8304_v39 = vpack.c.bf16 %v105_v38, %v89_v37  ;;  %s8854_s30 = smov 97   ;;  %s8855_s13 = smov 96   ;;  %vm2255_vm12 = vcmask 908288   ;;  %vm2444_vm13 = vcmask 900096   ;;  %vm2633_vm14 = vcmask 818176   ;;  %v7406_v16 = vld [vmem:[%s10671_s8 + $0x70] sm:$0xff] }
  0x21   :  { %860 = vmatprep.mubr.f32.mxu0 %v8839_v7  ;;  %s8856_s14 = smov 86   ;;  %s8857_s15 = smov 85   ;;  %vm2822_vm15 = vcmask 809984   ;;  %vm3011_vm1 = vcmask 801792  }
  0x22   :  { %s8858_s20 = smov 84   ;;  %s8861_s17 = smov 72  }
  0x23   :  { %8286 = vmatpush1.bf16.msk.msra.mxu1 %vm8968_vm2, %v8284_v29  ;;  %s8865_s19 = smov 68  }
  0x24   :  { %8298 = vmatprep.subr.bf16.mxu1 %v8297_v30 }
  0x26   :  { %7616 = vmatmul.mubr.msk.f32.vlgmr.msra.gmra.mrb[6].mxu1 %vm113_vm3, %v8995_v27 }
  0x27   :  { %8300 = vmatpush1.bf16.msra.mxu1 %v8299_v35  ;;  %727 = vmatprep.mubr.f32.mxu1 %v8839_v7 }
  0x28   :  { %8303 = vmatprep.subr.msk.bf16.mxu1 %vm8968_vm2, %v8301_v36 }
  0x2b   :  { %8306 = vmatpush1.bf16.msk.msra.mxu1 %vm8968_vm2, %v8304_v39 }
  0x2e   :  { %7622 = vmatmul.mubr.msk.f32.vlgmr.msra.gmra.mrb[8].mxu1 %vm113_vm3, %v8995_v27 }
  0x2f   :  { %937 = vmatprep.mubr.f32.mxu1 %v8839_v7 }
  0x99   :  { %v111_v40 = vpop.permute.xlu0 %110 }
  0xe0   :  { %v232_v41 = vpop.f32.mrb[0].mxu1 }
  0xe1   :  { %v234_v43 = vpop.f32.mrb[1].mxu1  ;;  %v233_v44 = vadd.f32 %v232_v41, %v111_v40 }
  0xe2   :  { %v374_v42 = vpop.f32.mrb[0].mxu0  ;;  %v235_v45 = vadd.f32 %v234_v43, %v111_v40 }
  0xe3   :  { %v376_v46 = vpop.f32.mrb[1].mxu0  ;;  %v375_v47 = vadd.f32 %v374_v42, %v111_v40  ;;  %v734_v49 = vmax.f32 %v233_v44, 0.0 }
  0xe4   :  { %v377_v48 = vadd.f32 %v376_v46, %v111_v40  ;;  %v735_v50 = vmax.f32 %v235_v45, 0.0 }
  0xe5   :  { %v738_v51 = vmax.f32 %v375_v47, 0.0  ;;  %v7623_v47 = vld [vmem:[%s10666_s3 + $0x10] sm:$0xff] }
  0xe6   :  { %v739_v52 = vmax.f32 %v377_v48, 0.0 }
  0xe7   :  { %v750_v53 = vmax.f32 %v734_v49, %v738_v51 }
  0xe8   :  { %v751_v54 = vmax.f32 %v735_v50, %v739_v52  ;;  %v303_v55 = vpop.f32.mrb[2].mxu1  ;;  %v7624_v52 = vld [vmem:[%s10666_s3 + $0x18] sm:$0xff] }
  0xe9   :  { %v305_v56 = vpop.f32.mrb[3].mxu1  ;;  %v304_v59 = vadd.f32 %v303_v55, %v111_v40 }
  0xea   :  { %v516_v27 = vpop.f32.mrb[2].mxu0  ;;  %v306_v61 = vadd.f32 %v305_v56, %v111_v40  ;;  %v762_v56 = vld [vmem:[%s10666_s3] sm:$0xff] }
  0xeb   :  { %v518_v57 = vpop.f32.mrb[3].mxu0  ;;  %v517_v58 = vadd.f32 %v516_v27, %v111_v40  ;;  %v736_v6 = vmax.f32 %v304_v59, 0.0 }
  0xec   :  { %v519_v60 = vadd.f32 %v518_v57, %v111_v40  ;;  %v737_v11 = vmax.f32 %v306_v61, 0.0 }
  0xed   :  { %v742_v2 = vmax.f32 %v517_v58, 0.0 }
  0xee   :  { %v743_v8 = vmax.f32 %v519_v60, 0.0  ;;  %v763_v60 = vld [vmem:[%s10666_s3 + $0x8] sm:$0xff] }
  0xf1   :  { %v445_v62 = vpop.f32.mrb[4].mxu1 }
  0xf2   :  { %v446_v63 = vadd.f32 %v445_v62, %v111_v40  ;;  %v658_v0 = vpop.f32.mrb[4].mxu0  ;;  %v447_v1 = vpop.f32.mrb[5].mxu1 }
  0xf3   :  { %v659_v3 = vadd.f32 %v658_v0, %v111_v40  ;;  %v448_v4 = vadd.f32 %v447_v1, %v111_v40  ;;  %v660_v5 = vpop.f32.mrb[5].mxu0  ;;  %v7633_v1 = vld [vmem:[%s10666_s3 + $0x20] sm:$0xff] }
  0xf4   :  { %v740_v9 = vmax.f32 %v446_v63, 0.0  ;;  %v661_v10 = vadd.f32 %v660_v5, %v111_v40 }
  0xf5   :  { %v746_v12 = vmax.f32 %v659_v3, 0.0  ;;  %v741_v13 = vmax.f32 %v448_v4, 0.0 }
  0xf6   :  { %v752_v14 = vmax.f32 %v736_v6, %v740_v9  ;;  %v747_v15 = vmax.f32 %v661_v10, 0.0  ;;  %v7634_v6 = vld [vmem:[%s10666_s3 + $0x28] sm:$0xff] }
  0xf7   :  { %v754_v17 = vmax.f32 %v742_v2, %v746_v12  ;;  %v753_v18 = vmax.f32 %v737_v11, %v741_v13  ;;  %v7639_v12 = vld [vmem:[%s10666_s3 + $0x30] sm:$0xff] }
  0xf8   :  { %v755_v19 = vmax.f32 %v743_v8, %v747_v15 }
  0xf9   :  { %v9198_v20 = vmax.f32 %v750_v53, %v754_v17  ;;  %v587_v21 = vpop.f32.mrb[6].mxu1 }
  0xfa   :  { %v9200_v22 = vmax.f32 %v751_v54, %v755_v19  ;;  %v589_v23 = vpop.f32.mrb[7].mxu1  ;;  %v588_v24 = vadd.f32 %v587_v21, %v111_v40 }
  0xfb   :  { %v590_v25 = vadd.f32 %v589_v23, %v111_v40 }
  0xfc   :  { %773 = vrot.lane.b32.xlu0 %v9200_v22, %s8842_s0  ;;  %v744_v31 = vmax.f32 %v588_v24, 0.0 }
  0xfd   :  { %v745_v33 = vmax.f32 %v590_v25, 0.0  ;;  %v7645_v25 = vld [vmem:[%s10666_s3 + $0x40] sm:$0xff] }
 0x101   :  { %v729_v26 = vpop.f32.mrb[8].mxu1 }
 0x102   :  { %v730_v28 = vadd.f32 %v729_v26, %v111_v40  ;;  %v731_v29 = vpop.f32.mrb[9].mxu1 }
 0x103   :  { %v732_v30 = vadd.f32 %v731_v29, %v111_v40 }
 0x104   :  { %v748_v32 = vmax.f32 %v730_v28, 0.0 }
 0x105   :  { %v749_v34 = vmax.f32 %v732_v30, 0.0 }
 0x106   :  { %v756_v35 = vmax.f32 %v744_v31, %v748_v32  ;;  %v7646_v31 = vld [vmem:[%s10666_s3 + $0x48] sm:$0xff] }
 0x107   :  { %v757_v36 = vmax.f32 %v745_v33, %v749_v34 }
 0x108   :  { %v9204_v37 = vmax.f32 %v752_v14, %v756_v35 }
 0x109   :  { %v9206_v38 = vmax.f32 %v753_v18, %v757_v36  ;;  %v7640_v18 = vld [vmem:[%s10666_s3 + $0x38] sm:$0xff]  ;;  %v7651_v36 = vld [vmem:[%s10666_s3 + $0x50] sm:$0xff] }
 0x10a   :  { %775 = vrot.lane.b32.xlu1 %v9204_v37, %s8842_s0 }
 0x10b   :  { %777 = vrot.lane.b32.xlu0 %v9206_v38, %s8842_s0 }
 0x10e   :  { %771 = vrot.lane.b32.xlu1 %v9198_v20, %s8842_s0 }
 0x10f   :  { %1117 = vrot.lane.b32.xlu0 %v9204_v37, %s8843_s21 }
 0x112   :  { %1115 = vrot.lane.b32.xlu1 %v9200_v22, %s8843_s21 }
 0x113   :  { %1119 = vrot.lane.b32.xlu0 %v9206_v38, %s8843_s21 }
 0x116   :  { %1113 = vrot.lane.b32.xlu1 %v9198_v20, %s8843_s21 }
 0x117   :  { %1306 = vrot.lane.b32.xlu0 %v9204_v37, %s8844_s22 }
 0x11a   :  { %1304 = vrot.lane.b32.xlu1 %v9200_v22, %s8844_s22 }
 0x11b   :  { %1308 = vrot.lane.b32.xlu0 %v9206_v38, %s8844_s22 }
 0x11e   :  { %1302 = vrot.lane.b32.xlu1 %v9198_v20, %s8844_s22  ;;  %s8862_s22 = smov 71  }
 0x11f   :  { %1495 = vrot.lane.b32.xlu0 %v9204_v37, %s8845_s23 }
 0x122   :  { %1493 = vrot.lane.b32.xlu1 %v9200_v22, %s8845_s23 }
 0x123   :  { %1497 = vrot.lane.b32.xlu0 %v9206_v38, %s8845_s23 }
 0x126   :  { %1491 = vrot.lane.b32.xlu1 %v9198_v20, %s8845_s23 }
 0x127   :  { %1684 = vrot.lane.b32.xlu0 %v9204_v37, %s8846_s24 }
 0x12a   :  { %1682 = vrot.lane.b32.xlu1 %v9200_v22, %s8846_s24 }
 0x12b   :  { %1686 = vrot.lane.b32.xlu0 %v9206_v38, %s8846_s24 }
 0x12e   :  { %1680 = vrot.lane.b32.xlu1 %v9198_v20, %s8846_s24 }
 0x12f   :  { %1873 = vrot.lane.b32.xlu0 %v9204_v37, %s8847_s2 }
 0x132   :  { %1871 = vrot.lane.b32.xlu1 %v9200_v22, %s8847_s2 }
 0x133   :  { %1875 = vrot.lane.b32.xlu0 %v9206_v38, %s8847_s2 }
 0x136   :  { %1869 = vrot.lane.b32.xlu1 %v9198_v20, %s8847_s2 }
 0x137   :  { %2062 = vrot.lane.b32.xlu0 %v9204_v37, %s8848_s25 }
 0x13a   :  { %2060 = vrot.lane.b32.xlu1 %v9200_v22, %s8848_s25 }
 0x13b   :  { %2064 = vrot.lane.b32.xlu0 %v9206_v38, %s8848_s25 }
 0x13e   :  { %2058 = vrot.lane.b32.xlu1 %v9198_v20, %s8848_s25 }
 0x13f   :  { %2251 = vrot.lane.b32.xlu0 %v9204_v37, %s8849_s26 }
 0x142   :  { %2249 = vrot.lane.b32.xlu1 %v9200_v22, %s8849_s26 }
 0x143   :  { %2253 = vrot.lane.b32.xlu0 %v9206_v38, %s8849_s26 }
 0x146   :  { %2247 = vrot.lane.b32.xlu1 %v9198_v20, %s8849_s26  ;;  %s8859_s26 = smov 83  }
 0x147   :  { %2440 = vrot.lane.b32.xlu0 %v9204_v37, %s8850_s1 }
 0x14a   :  { %2438 = vrot.lane.b32.xlu1 %v9200_v22, %s8850_s1 }
 0x14b   :  { %2442 = vrot.lane.b32.xlu0 %v9206_v38, %s8850_s1 }
 0x14e   :  { %2436 = vrot.lane.b32.xlu1 %v9198_v20, %s8850_s1 }
 0x14f   :  { %2629 = vrot.lane.b32.xlu0 %v9204_v37, %s8851_s27 }
 0x152   :  { %2627 = vrot.lane.b32.xlu1 %v9200_v22, %s8851_s27 }
 0x153   :  { %2631 = vrot.lane.b32.xlu0 %v9206_v38, %s8851_s27 }
 0x156   :  { %2625 = vrot.lane.b32.xlu1 %v9198_v20, %s8851_s27  ;;  %s8863_s27 = smov 70  }
 0x157   :  { %2818 = vrot.lane.b32.xlu0 %v9204_v37, %s8852_s28 }
 0x15a   :  { %2816 = vrot.lane.b32.xlu1 %v9200_v22, %s8852_s28 }
 0x15b   :  { %2820 = vrot.lane.b32.xlu0 %v9206_v38, %s8852_s28 }
 0x15e   :  { %2814 = vrot.lane.b32.xlu1 %v9198_v20, %s8852_s28 }
 0x15f   :  { %3007 = vrot.lane.b32.xlu0 %v9204_v37, %s8853_s29 }
 0x162   :  { %3005 = vrot.lane.b32.xlu1 %v9200_v22, %s8853_s29 }
 0x163   :  { %3009 = vrot.lane.b32.xlu0 %v9206_v38, %s8853_s29 }
 0x166   :  { %3003 = vrot.lane.b32.xlu1 %v9198_v20, %s8853_s29 }
 0x167   :  { %3196 = vrot.lane.b32.xlu0 %v9204_v37, %s8854_s30 }
 0x16a   :  { %3194 = vrot.lane.b32.xlu1 %v9200_v22, %s8854_s30 }
 0x16b   :  { %3198 = vrot.lane.b32.xlu0 %v9206_v38, %s8854_s30 }
 0x16e   :  { %3192 = vrot.lane.b32.xlu1 %v9198_v20, %s8854_s30  ;;  %v774_v39 = vpop.permute.xlu0 %773  ;;  %s8860_s30 = smov 82  }
 0x16f   :  { %3385 = vrot.lane.b32.xlu0 %v9204_v37, %s8855_s13 }
 0x172   :  { %3383 = vrot.lane.b32.xlu1 %v9200_v22, %s8855_s13 }
 0x173   :  { %3387 = vrot.lane.b32.xlu0 %v9206_v38, %s8855_s13 }
 0x176   :  { %3381 = vrot.lane.b32.xlu1 %v9198_v20, %s8855_s13 }
 0x177   :  { %3574 = vrot.lane.b32.xlu0 %v9204_v37, %s8856_s14 }
 0x17a   :  { %3572 = vrot.lane.b32.xlu1 %v9200_v22, %s8856_s14 }
 0x17b   :  { %3576 = vrot.lane.b32.xlu0 %v9206_v38, %s8856_s14 }
 0x17c   :  { %v776_v40 = vpop.permute.xlu1 %775 }
 0x17d   :  { %v778_v41 = vpop.permute.xlu0 %777  ;;  %v781_v42 = vsel %vm779_vm4, %v774_v39, %v776_v40 }
 0x17e   :  { %796 = vmatprep.subr.mxu0 %v781_v42  ;;  %3570 = vrot.lane.b32.xlu1 %v9198_v20, %s8856_s14  ;;  %v782_v48 = vsel %vm779_vm4, %v776_v40, %v778_v41  ;;  %s8864_s14 = smov 69  }
 0x17f   :  { %3763 = vrot.lane.b32.xlu0 %v9204_v37, %s8857_s15 }
 0x180   :  { %v772_v43 = vpop.permute.xlu1 %771 }
 0x181   :  { %v1118_v44 = vpop.permute.xlu0 %1117  ;;  %v780_v45 = vsel %vm779_vm4, %v772_v43, %v774_v39  ;;  %v788_v46 = vsel %vm779_vm4, %v778_v41, %v772_v43  ;;  %v7652_v43 = vld [vmem:[%s10666_s3 + $0x58] sm:$0xff] }
 0x182   :  { %3761 = vrot.lane.b32.xlu1 %v9200_v22, %s8857_s15  ;;  %797 = vmatpush1.msra.mxu0 %v780_v45 }
 0x183   :  { %873 = vmatprep.subr.mxu1 %v788_v46  ;;  %3765 = vrot.lane.b32.xlu0 %v9206_v38, %s8857_s15 }
 0x184   :  { %7625 = vmatmul.mubr.msk.f32.vlgmr.msra.gmra.mrb[6].mxu0 %vm789_vm5, %v7623_v47  ;;  %874 = vmatpush1.msra.mxu1 %v782_v48  ;;  %v1116_v49 = vpop.permute.xlu1 %1115  ;;  %v7657_v48 = vld [vmem:[%s10666_s3 + $0x60] sm:$0xff] }
 0x185   :  { %956 = vmatprep.subr.mxu0 %v9200_v22  ;;  %7627 = vmatmul.mubr.msk.f32.vlgmr.msra.gmra.mrb[10].mxu1 %vm789_vm5, %v7623_v47  ;;  %v1120_v50 = vpop.permute.xlu0 %1119  ;;  %v1123_v51 = vsel %vm1121_vm6, %v1116_v49, %v1118_v44 }
 0x186   :  { %957 = vmatpush1.msra.mxu0 %v9198_v20  ;;  %1033 = vmatprep.subr.mxu1 %v9206_v38  ;;  %v1124_v61 = vsel %vm1121_vm6, %v1118_v44, %v1120_v50 }
 0x187   :  { %1034 = vmatpush1.msra.mxu1 %v9204_v37  ;;  %3759 = vrot.lane.b32.xlu1 %v9198_v20, %s8857_s15 }
 0x188   :  { %866 = vmatprep.mubr.f32.mxu0 %v8839_v7  ;;  %1137 = vmatprep.subr.mxu0 %v1123_v51  ;;  %v1114_v53 = vpop.permute.xlu1 %1113 }
 0x189   :  { %3952 = vrot.lane.b32.xlu0 %v9204_v37, %s8858_s20  ;;  %7626 = vmatmul.mubr.msk.f32.gmra.mrb[8].mxu0 %vm789_vm5, %v7624_v52  ;;  %v1307_v54 = vpop.permute.xlu0 %1306  ;;  %v1130_v55 = vsel %vm1121_vm6, %v1120_v50, %v1114_v53  ;;  %v1122_v27 = vsel %vm1121_vm6, %v1114_v53, %v1116_v49  ;;  %v7658_v53 = vld [vmem:[%s10666_s3 + $0x68] sm:$0xff]  ;;  %vm3200_vm6 = vcmask 793600  }
 0x18a   :  { %943 = vmatprep.mubr.f32.mxu1 %v8839_v7  ;;  %1020 = vmatprep.mubr.f32.mxu0 %v8839_v7 }
 0x18b   :  { %7628 = vmatmul.mubr.msk.f32.gmra.mrb[12].mxu1 %vm789_vm5, %v7624_v52  ;;  %3950 = vrot.lane.b32.xlu1 %v9200_v22, %s8858_s20 }
 0x18c   :  { %1214 = vmatprep.subr.mxu1 %v1130_v55  ;;  %1097 = vmatprep.mubr.f32.mxu1 %v8839_v7  ;;  %v1305_v57 = vpop.permute.xlu1 %1304 }
 0x18d   :  { %3954 = vrot.lane.b32.xlu0 %v9206_v38, %s8858_s20  ;;  %7629 = vmatmul.mubr.msk.f32.vlgmr.msra.gmra.mrb[6].mxu0 %vm789_vm5, %v762_v56  ;;  %v1309_v58 = vpop.permute.xlu0 %1308  ;;  %v1312_v59 = vsel %vm1310_vm7, %v1305_v57, %v1307_v54 }
 0x18e   :  { %1138 = vmatpush1.msra.mxu0 %v1122_v27  ;;  %1026 = vmatprep.mubr.f32.mxu0 %v8839_v7  ;;  %v1313_v8 = vsel %vm1310_vm7, %v1307_v54, %v1309_v58 }
 0x18f   :  { %7631 = vmatmul.mubr.msk.f32.vlgmr.msra.gmra.mrb[10].mxu1 %vm789_vm5, %v762_v56  ;;  %3948 = vrot.lane.b32.xlu1 %v9198_v20, %s8858_s20 }
 0x190   :  { %1215 = vmatpush1.msra.mxu1 %v1124_v61  ;;  %1326 = vmatprep.subr.mxu0 %v1312_v59  ;;  %v1303_v62 = vpop.permute.xlu1 %1302 }
 0x191   :  { %4141 = vrot.lane.b32.xlu0 %v9204_v37, %s8859_s26  ;;  %7630 = vmatmul.mubr.msk.f32.gmra.mrb[8].mxu0 %vm789_vm5, %v763_v60  ;;  %v1496_v63 = vpop.permute.xlu0 %1495  ;;  %v1319_v0 = vsel %vm1310_vm7, %v1309_v58, %v1303_v62  ;;  %v1311_v2 = vsel %vm1310_vm7, %v1303_v62, %v1305_v57  ;;  %v7663_v57 = vld [vmem:[%s10666_s3 + $0x70] sm:$0xff]  ;;  %v7664_v62 = vld [vmem:[%s10666_s3 + $0x78] sm:$0xff]  ;;  %vm3389_vm7 = vcmask 785408  }
 0x192   :  { %1103 = vmatprep.mubr.f32.mxu1 %v8839_v7  ;;  %1201 = vmatprep.mubr.f32.mxu0 %v8839_v7 }
 0x193   :  { %7632 = vmatmul.mubr.msk.f32.gmra.mrb[12].mxu1 %vm789_vm5, %v763_v60  ;;  %4139 = vrot.lane.b32.xlu1 %v9200_v22, %s8859_s26 }
 0x194   :  { %1403 = vmatprep.subr.mxu1 %v1319_v0  ;;  %1278 = vmatprep.mubr.f32.mxu1 %v8839_v7  ;;  %v1494_v3 = vpop.permute.xlu1 %1493 }
 0x195   :  { %4143 = vrot.lane.b32.xlu0 %v9206_v38, %s8859_s26  ;;  %7635 = vmatmul.mubr.msk.f32.vlgmr.msra.gmra.mrb[6].mxu0 %vm789_vm5, %v7633_v1  ;;  %v1498_v4 = vpop.permute.xlu0 %1497  ;;  %v1501_v5 = vsel %vm1499_vm8, %v1494_v3, %v1496_v63 }
 0x196   :  { %1327 = vmatpush1.msra.mxu0 %v1311_v2  ;;  %1207 = vmatprep.mubr.f32.mxu0 %v8839_v7  ;;  %v1502_v19 = vsel %vm1499_vm8, %v1496_v63, %v1498_v4 }
 0x197   :  { %7637 = vmatmul.mubr.msk.f32.vlgmr.msra.gmra.mrb[10].mxu1 %vm789_vm5, %v7633_v1  ;;  %4137 = vrot.lane.b32.xlu1 %v9198_v20, %s8859_s26 }
 0x198   :  { %1404 = vmatpush1.msra.mxu1 %v1313_v8  ;;  %1515 = vmatprep.subr.mxu0 %v1501_v5  ;;  %v1492_v9 = vpop.permute.xlu1 %1491  ;;  %v5458_v8 = vld [vmem:[%s10667_s4 + $0x8] sm:$0xff] }
 0x199   :  { %4330 = vrot.lane.b32.xlu0 %v9204_v37, %s8860_s30  ;;  %7636 = vmatmul.mubr.msk.f32.gmra.mrb[8].mxu0 %vm789_vm5, %v7634_v6  ;;  %v1685_v10 = vpop.permute.xlu0 %1684  ;;  %v1508_v11 = vsel %vm1499_vm8, %v1498_v4, %v1492_v9  ;;  %v1500_v13 = vsel %vm1499_vm8, %v1492_v9, %v1494_v3  ;;  %v7669_v3 = vld [vmem:[%s10666_s3 + $0x80] sm:$0xff]  ;;  %vm3578_vm8 = vcmask 703488  }
 0x19a   :  { %1284 = vmatprep.mubr.f32.mxu1 %v8839_v7  ;;  %1390 = vmatprep.mubr.f32.mxu0 %v8839_v7 }
 0x19b   :  { %7638 = vmatmul.mubr.msk.f32.gmra.mrb[12].mxu1 %vm789_vm5, %v7634_v6  ;;  %4328 = vrot.lane.b32.xlu1 %v9200_v22, %s8860_s30 }
 0x19c   :  { %1592 = vmatprep.subr.mxu1 %v1508_v11  ;;  %1467 = vmatprep.mubr.f32.mxu1 %v8839_v7  ;;  %v1683_v14 = vpop.permute.xlu1 %1682 }
 0x19d   :  { %4332 = vrot.lane.b32.xlu0 %v9206_v38, %s8860_s30  ;;  %7641 = vmatmul.mubr.msk.f32.vlgmr.msra.gmra.mrb[6].mxu0 %vm789_vm5, %v7639_v12  ;;  %v1687_v15 = vpop.permute.xlu0 %1686  ;;  %v1690_v17 = vsel %vm1688_vm9, %v1683_v14, %v1685_v10 }
 0x19e   :  { %1516 = vmatpush1.msra.mxu0 %v1500_v13  ;;  %1396 = vmatprep.mubr.f32.mxu0 %v8839_v7  ;;  %v1691_v32 = vsel %vm1688_vm9, %v1685_v10, %v1687_v15  ;;  %v5457_v13 = vld [vmem:[%s10667_s4] sm:$0xff] }
 0x19f   :  { %7643 = vmatmul.mubr.msk.f32.vlgmr.msra.gmra.mrb[10].mxu1 %vm789_vm5, %v7639_v12  ;;  %4326 = vrot.lane.b32.xlu1 %v9198_v20, %s8860_s30  ;;  %v7675_v12 = vld [vmem:[%s10666_s3 + $0x90] sm:$0xff] }
 0x1a0   :  { %1593 = vmatpush1.msra.mxu1 %v1502_v19  ;;  %1704 = vmatprep.subr.mxu0 %v1690_v17  ;;  %v1681_v21 = vpop.permute.xlu1 %1680 }
 0x1a1   :  { %4519 = vrot.lane.b32.xlu0 %v9204_v37, %s8861_s17  ;;  %7642 = vmatmul.mubr.msk.f32.gmra.mrb[8].mxu0 %vm789_vm5, %v7640_v18  ;;  %v1874_v23 = vpop.permute.xlu0 %1873  ;;  %v1697_v24 = vsel %vm1688_vm9, %v1687_v15, %v1681_v21  ;;  %v1689_v26 = vsel %vm1688_vm9, %v1681_v21, %v1683_v14 }
 0x1a2   :  { %1473 = vmatprep.mubr.f32.mxu1 %v8839_v7  ;;  %1579 = vmatprep.mubr.f32.mxu0 %v8839_v7 }
 0x1a3   :  { %7644 = vmatmul.mubr.msk.f32.gmra.mrb[12].mxu1 %vm789_vm5, %v7640_v18  ;;  %4517 = vrot.lane.b32.xlu1 %v9200_v22, %s8861_s17  ;;  %v7676_v18 = vld [vmem:[%s10666_s3 + $0x98] sm:$0xff] }
 0x1a4   :  { %1781 = vmatprep.subr.mxu1 %v1697_v24  ;;  %1656 = vmatprep.mubr.f32.mxu1 %v8839_v7  ;;  %v1872_v28 = vpop.permute.xlu1 %1871 }
 0x1a5   :  { %4521 = vrot.lane.b32.xlu0 %v9206_v38, %s8861_s17  ;;  %7647 = vmatmul.mubr.msk.f32.vlgmr.msra.gmra.mrb[6].mxu0 %vm789_vm5, %v7645_v25  ;;  %v1876_v29 = vpop.permute.xlu0 %1875  ;;  %v1879_v30 = vsel %vm1877_vm10, %v1872_v28, %v1874_v23 }
 0x1a6   :  { %1705 = vmatpush1.msra.mxu0 %v1689_v26  ;;  %1585 = vmatprep.mubr.f32.mxu0 %v8839_v7  ;;  %v1880_v44 = vsel %vm1877_vm10, %v1874_v23, %v1876_v29 }
 0x1a7   :  { %7649 = vmatmul.mubr.msk.f32.vlgmr.msra.gmra.mrb[10].mxu1 %vm789_vm5, %v7645_v25  ;;  %4515 = vrot.lane.b32.xlu1 %v9198_v20, %s8861_s17  ;;  %v7681_v25 = vld [vmem:[%s10666_s3 + $0xa0] sm:$0xff] }
 0x1a8   :  { %1782 = vmatpush1.msra.mxu1 %v1691_v32  ;;  %1893 = vmatprep.subr.mxu0 %v1879_v30  ;;  %v1870_v33 = vpop.permute.xlu1 %1869 }
 0x1a9   :  { %4708 = vrot.lane.b32.xlu0 %v9204_v37, %s8862_s22  ;;  %7648 = vmatmul.mubr.msk.f32.gmra.mrb[8].mxu0 %vm789_vm5, %v7646_v31  ;;  %v2063_v34 = vpop.permute.xlu0 %2062  ;;  %v1886_v35 = vsel %vm1877_vm10, %v1876_v29, %v1870_v33  ;;  %v1878_v39 = vsel %vm1877_vm10, %v1870_v33, %v1872_v28 }
 0x1aa   :  { %1662 = vmatprep.mubr.f32.mxu1 %v8839_v7  ;;  %1768 = vmatprep.mubr.f32.mxu0 %v8839_v7 }
 0x1ab   :  { %7650 = vmatmul.mubr.msk.f32.gmra.mrb[12].mxu1 %vm789_vm5, %v7646_v31  ;;  %4706 = vrot.lane.b32.xlu1 %v9200_v22, %s8862_s22  ;;  %v7682_v31 = vld [vmem:[%s10666_s3 + $0xa8] sm:$0xff] }
 0x1ac   :  { %1970 = vmatprep.subr.mxu1 %v1886_v35  ;;  %1845 = vmatprep.mubr.f32.mxu1 %v8839_v7  ;;  %v2061_v40 = vpop.permute.xlu1 %2060 }
 0x1ad   :  { %4710 = vrot.lane.b32.xlu0 %v9206_v38, %s8862_s22  ;;  %7653 = vmatmul.mubr.msk.f32.vlgmr.msra.gmra.mrb[6].mxu0 %vm789_vm5, %v7651_v36  ;;  %v2065_v41 = vpop.permute.xlu0 %2064  ;;  %v2068_v42 = vsel %vm2066_vm11, %v2061_v40, %v2063_v34 }
 0x1ae   :  { %1894 = vmatpush1.msra.mxu0 %v1878_v39  ;;  %1774 = vmatprep.mubr.f32.mxu0 %v8839_v7  ;;  %v2069_v54 = vsel %vm2066_vm11, %v2063_v34, %v2065_v41 }
 0x1af   :  { %7655 = vmatmul.mubr.msk.f32.vlgmr.msra.gmra.mrb[10].mxu1 %vm789_vm5, %v7651_v36  ;;  %4704 = vrot.lane.b32.xlu1 %v9198_v20, %s8862_s22  ;;  %v7687_v36 = vld [vmem:[%s10666_s3 + $0xb0] sm:$0xff] }
 0x1b0   :  { %1971 = vmatpush1.msra.mxu1 %v1880_v44  ;;  %2082 = vmatprep.subr.mxu0 %v2068_v42  ;;  %v2059_v45 = vpop.permute.xlu1 %2058 }
 0x1b1   :  { %4897 = vrot.lane.b32.xlu0 %v9204_v37, %s8863_s27  ;;  %7654 = vmatmul.mubr.msk.f32.gmra.mrb[8].mxu0 %vm789_vm5, %v7652_v43  ;;  %v2252_v46 = vpop.permute.xlu0 %2251  ;;  %v2075_v47 = vsel %vm2066_vm11, %v2065_v41, %v2059_v45  ;;  %v2067_v49 = vsel %vm2066_vm11, %v2059_v45, %v2061_v40  ;;  %vm3767_vm11 = vcmask 695296  }
 0x1b2   :  { %1851 = vmatprep.mubr.f32.mxu1 %v8839_v7  ;;  %1957 = vmatprep.mubr.f32.mxu0 %v8839_v7 }
 0x1b3   :  { %7656 = vmatmul.mubr.msk.f32.gmra.mrb[12].mxu1 %vm789_vm5, %v7652_v43  ;;  %4895 = vrot.lane.b32.xlu1 %v9200_v22, %s8863_s27  ;;  %v7688_v43 = vld [vmem:[%s10666_s3 + $0xb8] sm:$0xff] }
 0x1b4   :  { %2159 = vmatprep.subr.mxu1 %v2075_v47  ;;  %2034 = vmatprep.mubr.f32.mxu1 %v8839_v7  ;;  %v2250_v50 = vpop.permute.xlu1 %2249 }
 0x1b5   :  { %4899 = vrot.lane.b32.xlu0 %v9206_v38, %s8863_s27  ;;  %7659 = vmatmul.mubr.msk.f32.vlgmr.msra.gmra.mrb[6].mxu0 %vm789_vm5, %v7657_v48  ;;  %v2254_v51 = vpop.permute.xlu0 %2253  ;;  %v2257_v52 = vsel %vm2255_vm12, %v2250_v50, %v2252_v46 }
 0x1b6   :  { %2083 = vmatpush1.msra.mxu0 %v2067_v49  ;;  %1963 = vmatprep.mubr.f32.mxu0 %v8839_v7  ;;  %v2258_v63 = vsel %vm2255_vm12, %v2252_v46, %v2254_v51 }
 0x1b7   :  { %7661 = vmatmul.mubr.msk.f32.vlgmr.msra.gmra.mrb[10].mxu1 %vm789_vm5, %v7657_v48  ;;  %4893 = vrot.lane.b32.xlu1 %v9198_v20, %s8863_s27  ;;  %v7693_v48 = vld [vmem:[%s10666_s3 + $0xc0] sm:$0xff] }
 0x1b8   :  { %2160 = vmatpush1.msra.mxu1 %v2069_v54  ;;  %2271 = vmatprep.subr.mxu0 %v2257_v52  ;;  %v2248_v55 = vpop.permute.xlu1 %2247 }
 0x1b9   :  { %5086 = vrot.lane.b32.xlu0 %v9204_v37, %s8864_s14  ;;  %7660 = vmatmul.mubr.msk.f32.gmra.mrb[8].mxu0 %vm789_vm5, %v7658_v53  ;;  %v2441_v56 = vpop.permute.xlu0 %2440  ;;  %v2264_v27 = vsel %vm2255_vm12, %v2254_v51, %v2248_v55  ;;  %v2256_v58 = vsel %vm2255_vm12, %v2248_v55, %v2250_v50  ;;  %vm3956_vm12 = vcmask 687104  }
 0x1ba   :  { %2040 = vmatprep.mubr.f32.mxu1 %v8839_v7  ;;  %2146 = vmatprep.mubr.f32.mxu0 %v8839_v7 }
 0x1bb   :  { %7662 = vmatmul.mubr.msk.f32.gmra.mrb[12].mxu1 %vm789_vm5, %v7658_v53  ;;  %5084 = vrot.lane.b32.xlu1 %v9200_v22, %s8864_s14  ;;  %v7694_v53 = vld [vmem:[%s10666_s3 + $0xc8] sm:$0xff] }
 0x1bc   :  { %2348 = vmatprep.subr.mxu1 %v2264_v27  ;;  %2223 = vmatprep.mubr.f32.mxu1 %v8839_v7  ;;  %v2439_v59 = vpop.permute.xlu1 %2438 }
 0x1bd   :  { %5088 = vrot.lane.b32.xlu0 %v9206_v38, %s8864_s14  ;;  %7665 = vmatmul.mubr.msk.f32.vlgmr.msra.gmra.mrb[6].mxu0 %vm789_vm5, %v7663_v57  ;;  %v2443_v60 = vpop.permute.xlu0 %2442  ;;  %v2446_v61 = vsel %vm2444_vm13, %v2439_v59, %v2441_v56 }
 0x1be   :  { %2272 = vmatpush1.msra.mxu0 %v2256_v58  ;;  %2152 = vmatprep.mubr.f32.mxu0 %v8839_v7  ;;  %v2447_v9 = vsel %vm2444_vm13, %v2441_v56, %v2443_v60 }
 0x1bf   :  { %7667 = vmatmul.mubr.msk.f32.vlgmr.msra.gmra.mrb[10].mxu1 %vm789_vm5, %v7663_v57  ;;  %5082 = vrot.lane.b32.xlu1 %v9198_v20, %s8864_s14  ;;  %v7699_v57 = vld [vmem:[%s10666_s3 + $0xd0] sm:$0xff] }
 0x1c0   :  { %2349 = vmatpush1.msra.mxu1 %v2258_v63  ;;  %2460 = vmatprep.subr.mxu0 %v2446_v61  ;;  %v2437_v0 = vpop.permute.xlu1 %2436 }
 0x1c1   :  { %5275 = vrot.lane.b32.xlu0 %v9204_v37, %s8865_s19  ;;  %7666 = vmatmul.mubr.msk.f32.gmra.mrb[8].mxu0 %vm789_vm5, %v7664_v62  ;;  %v2630_v1 = vpop.permute.xlu0 %2629  ;;  %v2453_v2 = vsel %vm2444_vm13, %v2443_v60, %v2437_v0  ;;  %v2445_v4 = vsel %vm2444_vm13, %v2437_v0, %v2439_v59  ;;  %vm4145_vm13 = vcmask 678912  }
 0x1c2   :  { %2229 = vmatprep.mubr.f32.mxu1 %v8839_v7  ;;  %2335 = vmatprep.mubr.f32.mxu0 %v8839_v7 }
 0x1c3   :  { %7668 = vmatmul.mubr.msk.f32.gmra.mrb[12].mxu1 %vm789_vm5, %v7664_v62  ;;  %5273 = vrot.lane.b32.xlu1 %v9200_v22, %s8865_s19  ;;  %v7670_v22 = vld [vmem:[%s10666_s3 + $0x88] sm:$0xff]  ;;  %v7700_v62 = vld [vmem:[%s10666_s3 + $0xd8] sm:$0xff] }
 0x1c4   :  { %2537 = vmatprep.subr.mxu1 %v2453_v2  ;;  %2412 = vmatprep.mubr.f32.mxu1 %v8839_v7  ;;  %v2628_v37 = vpop.permute.xlu1 %2627 }
 0x1c5   :  { %5277 = vrot.lane.b32.xlu0 %v9206_v38, %s8865_s19  ;;  %7671 = vmatmul.mubr.msk.f32.vlgmr.msra.gmra.mrb[6].mxu0 %vm789_vm5, %v7669_v3  ;;  %v2632_v5 = vpop.permute.xlu0 %2631  ;;  %v2635_v6 = vsel %vm2633_vm14, %v2628_v37, %v2630_v1 }
 0x1c6   :  { %2461 = vmatpush1.msra.mxu0 %v2445_v4  ;;  %2341 = vmatprep.mubr.f32.mxu0 %v8839_v7  ;;  %v2636_v19 = vsel %vm2633_vm14, %v2630_v1, %v2632_v5 }
 0x1c7   :  { %7673 = vmatmul.mubr.msk.f32.vlgmr.msra.gmra.mrb[10].mxu1 %vm789_vm5, %v7669_v3  ;;  %5271 = vrot.lane.b32.xlu1 %v9198_v20, %s8865_s19  ;;  %v7705_v3 = vld [vmem:[%s10666_s3 + $0xe0] sm:$0xff] }
 0x1c8   :  { %2538 = vmatpush1.msra.mxu1 %v2447_v9  ;;  %2649 = vmatprep.subr.mxu0 %v2635_v6  ;;  %v2626_v38 = vpop.permute.xlu1 %2625 }
 0x1c9   :  { %5466 = vperm.xlu0 %8773, %v5458_v8   ;;  %7672 = vmatmul.mubr.msk.f32.gmra.mrb[8].mxu0 %vm789_vm5, %v7670_v22  ;;  %v2819_v10 = vpop.permute.xlu0 %2818  ;;  %v2642_v11 = vsel %vm2633_vm14, %v2632_v5, %v2626_v38  ;;  %v2634_v20 = vsel %vm2633_vm14, %v2626_v38, %v2628_v37  ;;  %v7706_v8 = vld [vmem:[%s10666_s3 + $0xe8] sm:$0xff]  ;;  %vm4334_vm14 = vcmask 670720  }
 0x1ca   :  { %2418 = vmatprep.mubr.f32.mxu1 %v8839_v7  ;;  %2524 = vmatprep.mubr.f32.mxu0 %v8839_v7 }
 0x1cb   :  { %7674 = vmatmul.mubr.msk.f32.gmra.mrb[12].mxu1 %vm789_vm5, %v7670_v22  ;;  %2726 = vmatprep.subr.mxu1 %v2642_v11 }
 0x1cc   :  { %2601 = vmatprep.mubr.f32.mxu1 %v8839_v7  ;;  %v2817_v14 = vpop.permute.xlu1 %2816  ;;  %5461 = vperm.xlu1 %8774, %v5457_v13  }
 0x1cd   :  { %7677 = vmatmul.mubr.msk.f32.vlgmr.msra.gmra.mrb[6].mxu0 %vm789_vm5, %v7675_v12  ;;  %v2821_v15 = vpop.permute.xlu0 %2820  ;;  %v2824_v17 = vsel %vm2822_vm15, %v2817_v14, %v2819_v10 }
 0x1ce   :  { %2650 = vmatpush1.msra.mxu0 %v2634_v20  ;;  %2530 = vmatprep.mubr.f32.mxu0 %v8839_v7  ;;  %v2825_v32 = vsel %vm2822_vm15, %v2819_v10, %v2821_v15  ;;  %v7711_v10 = vld [vmem:[%s10666_s3 + $0xf0] sm:$0xff] }
 0x1cf   :  { %7679 = vmatmul.mubr.msk.f32.vlgmr.msra.gmra.mrb[10].mxu1 %vm789_vm5, %v7675_v12  ;;  %2838 = vmatprep.subr.mxu0 %v2824_v17 }
 0x1d0   :  { %2727 = vmatpush1.msra.mxu1 %v2636_v19  ;;  %2607 = vmatprep.mubr.f32.mxu1 %v8839_v7  ;;  %v2815_v21 = vpop.permute.xlu1 %2814 }
 0x1d1   :  { %7678 = vmatmul.mubr.msk.f32.gmra.mrb[8].mxu0 %vm789_vm5, %v7676_v18  ;;  %v3008_v23 = vpop.permute.xlu0 %3007  ;;  %v2831_v24 = vsel %vm2822_vm15, %v2821_v15, %v2815_v21  ;;  %v2823_v26 = vsel %vm2822_vm15, %v2815_v21, %v2817_v14  ;;  %v7712_v14 = vld [vmem:[%s10666_s3 + $0xf8] sm:$0xff]  ;;  %v7717_v21 = vld [vmem:[%s10666_s3 + $0x100] sm:$0xff]  ;;  %vm4523_vm15 = vcmask 588800  }
 0x1d2   :  { %2713 = vmatprep.mubr.f32.mxu0 %v8839_v7  ;;  %2915 = vmatprep.subr.mxu1 %v2831_v24 }
 0x1d3   :  { %7680 = vmatmul.mubr.msk.f32.gmra.mrb[12].mxu1 %vm789_vm5, %v7676_v18 }
 0x1d4   :  { %2790 = vmatprep.mubr.f32.mxu1 %v8839_v7  ;;  %v3006_v28 = vpop.permute.xlu1 %3005 }
 0x1d5   :  { %7683 = vmatmul.mubr.msk.f32.vlgmr.msra.gmra.mrb[6].mxu0 %vm789_vm5, %v7681_v25  ;;  %v3010_v29 = vpop.permute.xlu0 %3009  ;;  %v3013_v30 = vsel %vm3011_vm1, %v3006_v28, %v3008_v23 }
 0x1d6   :  { %2839 = vmatpush1.msra.mxu0 %v2823_v26  ;;  %2719 = vmatprep.mubr.f32.mxu0 %v8839_v7  ;;  %v3014_v44 = vsel %vm3011_vm1, %v3008_v23, %v3010_v29 }
 0x1d7   :  { %7685 = vmatmul.mubr.msk.f32.vlgmr.msra.gmra.mrb[10].mxu1 %vm789_vm5, %v7681_v25  ;;  %3027 = vmatprep.subr.mxu0 %v3013_v30 }
 0x1d8   :  { %2916 = vmatpush1.msra.mxu1 %v2825_v32  ;;  %2796 = vmatprep.mubr.f32.mxu1 %v8839_v7  ;;  %v3004_v33 = vpop.permute.xlu1 %3003 }
 0x1d9   :  { %7684 = vmatmul.mubr.msk.f32.gmra.mrb[8].mxu0 %vm789_vm5, %v7682_v31  ;;  %v3197_v34 = vpop.permute.xlu0 %3196  ;;  %v3020_v35 = vsel %vm3011_vm1, %v3010_v29, %v3004_v33  ;;  %v3012_v39 = vsel %vm3011_vm1, %v3004_v33, %v3006_v28  ;;  %v7718_v28 = vld [vmem:[%s10666_s3 + $0x108] sm:$0xff]  ;;  %v7723_v33 = vld [vmem:[%s10666_s3 + $0x110] sm:$0xff]  ;;  %vm4712_vm1 = vcmask 580608  }
 0x1da   :  { %2902 = vmatprep.mubr.f32.mxu0 %v8839_v7  ;;  %3104 = vmatprep.subr.mxu1 %v3020_v35 }
 0x1db   :  { %7686 = vmatmul.mubr.msk.f32.gmra.mrb[12].mxu1 %vm789_vm5, %v7682_v31 }
 0x1dc   :  { %2979 = vmatprep.mubr.f32.mxu1 %v8839_v7  ;;  %v3195_v40 = vpop.permute.xlu1 %3194 }
 0x1dd   :  { %7689 = vmatmul.mubr.msk.f32.vlgmr.msra.gmra.mrb[6].mxu0 %vm789_vm5, %v7687_v36  ;;  %v3199_v41 = vpop.permute.xlu0 %3198  ;;  %v3202_v42 = vsel %vm3200_vm6, %v3195_v40, %v3197_v34 }
 0x1de   :  { %3028 = vmatpush1.msra.mxu0 %v3012_v39  ;;  %2908 = vmatprep.mubr.f32.mxu0 %v8839_v7  ;;  %v3203_v54 = vsel %vm3200_vm6, %v3197_v34, %v3199_v41 }
 0x1df   :  { %7691 = vmatmul.mubr.msk.f32.vlgmr.msra.gmra.mrb[10].mxu1 %vm789_vm5, %v7687_v36  ;;  %3216 = vmatprep.subr.mxu0 %v3202_v42 }
 0x1e0   :  { %3105 = vmatpush1.msra.mxu1 %v3014_v44  ;;  %2985 = vmatprep.mubr.f32.mxu1 %v8839_v7  ;;  %v3193_v45 = vpop.permute.xlu1 %3192 }
 0x1e1   :  { %7690 = vmatmul.mubr.msk.f32.gmra.mrb[8].mxu0 %vm789_vm5, %v7688_v43  ;;  %v3386_v46 = vpop.permute.xlu0 %3385  ;;  %v3209_v47 = vsel %vm3200_vm6, %v3199_v41, %v3193_v45  ;;  %v3201_v49 = vsel %vm3200_vm6, %v3193_v45, %v3195_v40  ;;  %v7724_v40 = vld [vmem:[%s10666_s3 + $0x118] sm:$0xff]  ;;  %v7729_v45 = vld [vmem:[%s10666_s3 + $0x120] sm:$0xff]  ;;  %vm4901_vm6 = vcmask 572416  }
 0x1e2   :  { %3091 = vmatprep.mubr.f32.mxu0 %v8839_v7  ;;  %3293 = vmatprep.subr.mxu1 %v3209_v47 }
 0x1e3   :  { %7692 = vmatmul.mubr.msk.f32.gmra.mrb[12].mxu1 %vm789_vm5, %v7688_v43 }
 0x1e4   :  { %3168 = vmatprep.mubr.f32.mxu1 %v8839_v7  ;;  %v3384_v50 = vpop.permute.xlu1 %3383 }
 0x1e5   :  { %7695 = vmatmul.mubr.msk.f32.vlgmr.msra.gmra.mrb[6].mxu0 %vm789_vm5, %v7693_v48  ;;  %v3388_v51 = vpop.permute.xlu0 %3387  ;;  %v3391_v52 = vsel %vm3389_vm7, %v3384_v50, %v3386_v46 }
 0x1e6   :  { %3217 = vmatpush1.msra.mxu0 %v3201_v49  ;;  %3097 = vmatprep.mubr.f32.mxu0 %v8839_v7  ;;  %v3392_v63 = vsel %vm3389_vm7, %v3386_v46, %v3388_v51 }
 0x1e7   :  { %7697 = vmatmul.mubr.msk.f32.vlgmr.msra.gmra.mrb[10].mxu1 %vm789_vm5, %v7693_v48  ;;  %3405 = vmatprep.subr.mxu0 %v3391_v52 }
 0x1e8   :  { %3294 = vmatpush1.msra.mxu1 %v3203_v54  ;;  %3174 = vmatprep.mubr.f32.mxu1 %v8839_v7  ;;  %v3382_v55 = vpop.permute.xlu1 %3381 }
 0x1e9   :  { %7696 = vmatmul.mubr.msk.f32.gmra.mrb[8].mxu0 %vm789_vm5, %v7694_v53  ;;  %v3575_v56 = vpop.permute.xlu0 %3574  ;;  %v3398_v27 = vsel %vm3389_vm7, %v3388_v51, %v3382_v55  ;;  %v3390_v58 = vsel %vm3389_vm7, %v3382_v55, %v3384_v50  ;;  %v7730_v50 = vld [vmem:[%s10666_s3 + $0x128] sm:$0xff]  ;;  %v7735_v55 = vld [vmem:[%s10666_s3 + $0x130] sm:$0xff]  ;;  %vm5090_vm7 = vcmask 564224  }
 0x1ea   :  { %3280 = vmatprep.mubr.f32.mxu0 %v8839_v7  ;;  %3482 = vmatprep.subr.mxu1 %v3398_v27 }
 0x1eb   :  { %7698 = vmatmul.mubr.msk.f32.gmra.mrb[12].mxu1 %vm789_vm5, %v7694_v53 }
 0x1ec   :  { %3357 = vmatprep.mubr.f32.mxu1 %v8839_v7  ;;  %v3573_v59 = vpop.permute.xlu1 %3572 }
 0x1ed   :  { %7701 = vmatmul.mubr.msk.f32.vlgmr.msra.gmra.mrb[6].mxu0 %vm789_vm5, %v7699_v57  ;;  %v3577_v60 = vpop.permute.xlu0 %3576  ;;  %v3580_v61 = vsel %vm3578_vm8, %v3573_v59, %v3575_v56 }
 0x1ee   :  { %3406 = vmatpush1.msra.mxu0 %v3390_v58  ;;  %3286 = vmatprep.mubr.f32.mxu0 %v8839_v7  ;;  %v3581_v22 = vsel %vm3578_vm8, %v3575_v56, %v3577_v60 }
 0x1ef   :  { %7703 = vmatmul.mubr.msk.f32.vlgmr.msra.gmra.mrb[10].mxu1 %vm789_vm5, %v7699_v57  ;;  %3594 = vmatprep.subr.mxu0 %v3580_v61 }
 0x1f0   :  { %3483 = vmatpush1.msra.mxu1 %v3392_v63  ;;  %3363 = vmatprep.mubr.f32.mxu1 %v8839_v7  ;;  %v3571_v0 = vpop.permute.xlu1 %3570 }
 0x1f1   :  { %7702 = vmatmul.mubr.msk.f32.gmra.mrb[8].mxu0 %vm789_vm5, %v7700_v62  ;;  %v3764_v1 = vpop.permute.xlu0 %3763  ;;  %v3587_v2 = vsel %vm3578_vm8, %v3577_v60, %v3571_v0  ;;  %v3579_v4 = vsel %vm3578_vm8, %v3571_v0, %v3573_v59  ;;  %v7736_v59 = vld [vmem:[%s10666_s3 + $0x138] sm:$0xff]  ;;  %v7741_v0 = vld [vmem:[%s10666_s3 + $0x140] sm:$0xff]  ;;  %vm5279_vm8 = vcmask 556032  }
 0x1f2   :  { %3469 = vmatprep.mubr.f32.mxu0 %v8839_v7  ;;  %3671 = vmatprep.subr.mxu1 %v3587_v2 }
 0x1f3   :  { %7704 = vmatmul.mubr.msk.f32.gmra.mrb[12].mxu1 %vm789_vm5, %v7700_v62 }
 0x1f4   :  { %3546 = vmatprep.mubr.f32.mxu1 %v8839_v7  ;;  %v3762_v37 = vpop.permute.xlu1 %3761 }
 0x1f5   :  { %7707 = vmatmul.mubr.msk.f32.vlgmr.msra.gmra.mrb[6].mxu0 %vm789_vm5, %v7705_v3  ;;  %v3766_v5 = vpop.permute.xlu0 %3765  ;;  %v3769_v6 = vsel %vm3767_vm11, %v3762_v37, %v3764_v1 }
 0x1f6   :  { %3595 = vmatpush1.msra.mxu0 %v3579_v4  ;;  %3475 = vmatprep.mubr.f32.mxu0 %v8839_v7  ;;  %v3770_v15 = vsel %vm3767_vm11, %v3764_v1, %v3766_v5 }
 0x1f7   :  { %7709 = vmatmul.mubr.msk.f32.vlgmr.msra.gmra.mrb[10].mxu1 %vm789_vm5, %v7705_v3  ;;  %3783 = vmatprep.subr.mxu0 %v3769_v6 }
 0x1f8   :  { %3672 = vmatpush1.msra.mxu1 %v3581_v22  ;;  %3552 = vmatprep.mubr.f32.mxu1 %v8839_v7 }
 0x1f9   :  { %7708 = vmatmul.mubr.msk.f32.gmra.mrb[8].mxu0 %vm789_vm5, %v7706_v8  ;;  %v3760_v9 = vpop.permute.xlu1 %3759 }
 0x1fa   :  { %3658 = vmatprep.mubr.f32.mxu0 %v8839_v7  ;;  %v3776_v38 = vsel %vm3767_vm11, %v3766_v5, %v3760_v9  ;;  %v3768_v11 = vsel %vm3767_vm11, %v3760_v9, %v3762_v37  ;;  %v7742_v37 = vld [vmem:[%s10666_s3 + $0x148] sm:$0xff]  ;;  %v7747_v9 = vld [vmem:[%s10666_s3 + $0x150] sm:$0xff]  ;;  %vm6271_vm11 = vcmask 1043456  }
 0x1fb   :  { %7710 = vmatmul.mubr.msk.f32.gmra.mrb[12].mxu1 %vm789_vm5, %v7706_v8  ;;  %v3953_v12 = vpop.permute.xlu0 %3952  ;;  %3860 = vmatprep.subr.mxu1 %v3776_v38 }
 0x1fc   :  { %3735 = vmatprep.mubr.f32.mxu1 %v8839_v7 }
 0x1fd   :  { %7713 = vmatmul.mubr.msk.f32.vlgmr.msra.gmra.mrb[6].mxu0 %vm789_vm5, %v7711_v10  ;;  %v3951_v20 = vpop.permute.xlu1 %3950 }
 0x1fe   :  { %3784 = vmatpush1.msra.mxu0 %v3768_v11  ;;  %3664 = vmatprep.mubr.f32.mxu0 %v8839_v7  ;;  %v3958_v13 = vsel %vm3956_vm12, %v3951_v20, %v3953_v12 }
 0x1ff   :  { %7715 = vmatmul.mubr.msk.f32.vlgmr.msra.gmra.mrb[10].mxu1 %vm789_vm5, %v7711_v10  ;;  %v3955_v17 = vpop.permute.xlu0 %3954  ;;  %3972 = vmatprep.subr.mxu0 %v3958_v13 }
 0x200   :  { %3861 = vmatpush1.msra.mxu1 %v3770_v15  ;;  %3741 = vmatprep.mubr.f32.mxu1 %v8839_v7  ;;  %v3959_v29 = vsel %vm3956_vm12, %v3953_v12, %v3955_v17 }
 0x201   :  { %7714 = vmatmul.mubr.msk.f32.gmra.mrb[8].mxu0 %vm789_vm5, %v7712_v14  ;;  %v3949_v18 = vpop.permute.xlu1 %3948 }
 0x202   :  { %3847 = vmatprep.mubr.f32.mxu0 %v8839_v7  ;;  %v3965_v19 = vsel %vm3956_vm12, %v3955_v17, %v3949_v18  ;;  %v3957_v23 = vsel %vm3956_vm12, %v3949_v18, %v3951_v20  ;;  %v7748_v20 = vld [vmem:[%s10666_s3 + $0x158] sm:$0xff]  ;;  %v7753_v18 = vld [vmem:[%s10666_s3 + $0x160] sm:$0xff] }
 0x203   :  { %7716 = vmatmul.mubr.msk.f32.gmra.mrb[12].mxu1 %vm789_vm5, %v7712_v14  ;;  %v4142_v24 = vpop.permute.xlu0 %4141  ;;  %4049 = vmatprep.subr.mxu1 %v3965_v19 }
 0x204   :  { %3924 = vmatprep.mubr.f32.mxu1 %v8839_v7 }
 0x205   :  { %7719 = vmatmul.mubr.msk.f32.vlgmr.msra.gmra.mrb[6].mxu0 %vm789_vm5, %v7717_v21  ;;  %v4140_v25 = vpop.permute.xlu1 %4139 }
 0x206   :  { %3973 = vmatpush1.msra.mxu0 %v3957_v23  ;;  %3853 = vmatprep.mubr.f32.mxu0 %v8839_v7  ;;  %v4147_v26 = vsel %vm4145_vm13, %v4140_v25, %v4142_v24 }
 0x207   :  { %7721 = vmatmul.mubr.msk.f32.vlgmr.msra.gmra.mrb[10].mxu1 %vm789_vm5, %v7717_v21  ;;  %v4144_v30 = vpop.permute.xlu0 %4143  ;;  %4161 = vmatprep.subr.mxu0 %v4147_v26 }
 0x208   :  { %4050 = vmatpush1.msra.mxu1 %v3959_v29  ;;  %3930 = vmatprep.mubr.f32.mxu1 %v8839_v7  ;;  %v4148_v41 = vsel %vm4145_vm13, %v4142_v24, %v4144_v30 }
 0x209   :  { %7720 = vmatmul.mubr.msk.f32.gmra.mrb[8].mxu0 %vm789_vm5, %v7718_v28  ;;  %v4138_v31 = vpop.permute.xlu1 %4137 }
 0x20a   :  { %4036 = vmatprep.mubr.f32.mxu0 %v8839_v7  ;;  %v4154_v32 = vsel %vm4145_vm13, %v4144_v30, %v4138_v31  ;;  %v4146_v34 = vsel %vm4145_vm13, %v4138_v31, %v4140_v25  ;;  %v7754_v25 = vld [vmem:[%s10666_s3 + $0x168] sm:$0xff]  ;;  %v7759_v31 = vld [vmem:[%s10666_s3 + $0x170] sm:$0xff]  ;;  %vm6367_vm13 = vcmask 1042432  }
 0x20b   :  { %7722 = vmatmul.mubr.msk.f32.gmra.mrb[12].mxu1 %vm789_vm5, %v7718_v28  ;;  %v4331_v35 = vpop.permute.xlu0 %4330  ;;  %4238 = vmatprep.subr.mxu1 %v4154_v32 }
 0x20c   :  { %4113 = vmatprep.mubr.f32.mxu1 %v8839_v7 }
 0x20d   :  { %7725 = vmatmul.mubr.msk.f32.vlgmr.msra.gmra.mrb[6].mxu0 %vm789_vm5, %v7723_v33  ;;  %v4329_v36 = vpop.permute.xlu1 %4328 }
 0x20e   :  { %4162 = vmatpush1.msra.mxu0 %v4146_v34  ;;  %4042 = vmatprep.mubr.f32.mxu0 %v8839_v7  ;;  %v4336_v39 = vsel %vm4334_vm14, %v4329_v36, %v4331_v35 }
 0x20f   :  { %7727 = vmatmul.mubr.msk.f32.vlgmr.msra.gmra.mrb[10].mxu1 %vm789_vm5, %v7723_v33  ;;  %v4333_v42 = vpop.permute.xlu0 %4332  ;;  %4350 = vmatprep.subr.mxu0 %v4336_v39  ;;  %v7760_v33 = vld [vmem:[%s10666_s3 + $0x178] sm:$0xff]  ;;  %v5635_v39 = vld [vmem:[%s10668_s5 + $0x80] sm:$0xff] }
 0x210   :  { %4239 = vmatpush1.msra.mxu1 %v4148_v41  ;;  %4119 = vmatprep.mubr.f32.mxu1 %v8839_v7  ;;  %v4337_v51 = vsel %vm4334_vm14, %v4331_v35, %v4333_v42  ;;  %v7765_v35 = vld [vmem:[%s10666_s3 + $0x180] sm:$0xff] }
 0x211   :  { %7726 = vmatmul.mubr.msk.f32.gmra.mrb[8].mxu0 %vm789_vm5, %v7724_v40  ;;  %v4327_v43 = vpop.permute.xlu1 %4326  ;;  %v5619_v41 = vld [vmem:[%s10668_s5] sm:$0xff] }
 0x212   :  { %4225 = vmatprep.mubr.f32.mxu0 %v8839_v7  ;;  %v4343_v44 = vsel %vm4334_vm14, %v4333_v42, %v4327_v43  ;;  %v4335_v46 = vsel %vm4334_vm14, %v4327_v43, %v4329_v36  ;;  %v7766_v36 = vld [vmem:[%s10666_s3 + $0x188] sm:$0xff]  ;;  %s8868_s3 = smov 103   ;;  %vm6463_vm14 = vcmask 1041408  }
 0x213   :  { %7728 = vmatmul.mubr.msk.f32.gmra.mrb[12].mxu1 %vm789_vm5, %v7724_v40  ;;  %v4520_v47 = vpop.permute.xlu0 %4519  ;;  %4427 = vmatprep.subr.mxu1 %v4343_v44  ;;  %v5636_v40 = vld [vmem:[%s10668_s5 + $0x88] sm:$0xff]  ;;  %v5637_v44 = vld [vmem:[%s10668_s5 + $0x90] sm:$0xff] }
 0x214   :  { %4302 = vmatprep.mubr.f32.mxu1 %v8839_v7  ;;  %v8307_v42 = vpack.c.bf16 %v5636_v40, %v5635_v39  ;;  %v5620_v43 = vld [vmem:[%s10668_s5 + $0x8] sm:$0xff]  ;;  %v5667_v40 = vld [vmem:[%s10668_s5 + $0x180] sm:$0xff] }
 0x215   :  { %7731 = vmatmul.mubr.msk.f32.vlgmr.msra.gmra.mrb[6].mxu0 %vm789_vm5, %v7729_v45  ;;  %v4518_v48 = vpop.permute.xlu1 %4517 }
 0x216   :  { %4351 = vmatpush1.msra.mxu0 %v4335_v46  ;;  %4231 = vmatprep.mubr.f32.mxu0 %v8839_v7  ;;  %v4525_v49 = vsel %vm4523_vm15, %v4518_v48, %v4520_v47  ;;  %v8309_v46 = vpack.c.bf16 %v5620_v43, %v5619_v41  ;;  %v5668_v41 = vld [vmem:[%s10668_s5 + $0x188] sm:$0xff] }
 0x217   :  { %7733 = vmatmul.mubr.msk.f32.vlgmr.msra.gmra.mrb[10].mxu1 %vm789_vm5, %v7729_v45  ;;  %v4522_v52 = vpop.permute.xlu0 %4521  ;;  %4539 = vmatprep.subr.mxu0 %v4525_v49  ;;  %v5638_v45 = vld [vmem:[%s10668_s5 + $0x98] sm:$0xff] }
 0x218   :  { %4428 = vmatpush1.msra.mxu1 %v4337_v51  ;;  %4308 = vmatprep.mubr.f32.mxu1 %v8839_v7  ;;  %v4526_v60 = vsel %vm4523_vm15, %v4520_v47, %v4522_v52  ;;  %v8311_v47 = vpack.c.bf16 %v5638_v45, %v5637_v44  ;;  %v5622_v49 = vld [vmem:[%s10668_s5 + $0x18] sm:$0xff]  ;;  %v5640_v51 = vld [vmem:[%s10668_s5 + $0xa8] sm:$0xff]  ;;  %v8339_v45 = vpack.c.bf16 %v5668_v41, %v5667_v40  ;;  %v5673_v41 = vld [vmem:[%s10668_s5 + $0x1b0] sm:$0xff] }
 0x219   :  { %7732 = vmatmul.mubr.msk.f32.gmra.mrb[8].mxu0 %vm789_vm5, %v7730_v50  ;;  %v4516_v53 = vpop.permute.xlu1 %4515 }
 0x21a   :  { %4414 = vmatprep.mubr.f32.mxu0 %v8839_v7  ;;  %v4532_v54 = vsel %vm4523_vm15, %v4522_v52, %v4516_v53  ;;  %v4524_v56 = vsel %vm4523_vm15, %v4516_v53, %v4518_v48  ;;  %v5621_v48 = vld [vmem:[%s10668_s5 + $0x10] sm:$0xff] }
 0x21b   :  { %7734 = vmatmul.mubr.msk.f32.gmra.mrb[12].mxu1 %vm789_vm5, %v7730_v50  ;;  %v4709_v27 = vpop.permute.xlu0 %4708  ;;  %4616 = vmatprep.subr.mxu1 %v4532_v54  ;;  %v5639_v50 = vld [vmem:[%s10668_s5 + $0xa0] sm:$0xff]  ;;  %v8313_v52 = vpack.c.bf16 %v5622_v49, %v5621_v48 }
 0x21c   :  { %4491 = vmatprep.mubr.f32.mxu1 %v8839_v7  ;;  %v8315_v53 = vpack.c.bf16 %v5640_v51, %v5639_v50  ;;  %v5623_v54 = vld [vmem:[%s10668_s5 + $0x20] sm:$0xff] }
 0x21d   :  { %7737 = vmatmul.mubr.msk.f32.vlgmr.msra.gmra.mrb[6].mxu0 %vm789_vm5, %v7735_v55  ;;  %v4707_v57 = vpop.permute.xlu1 %4706 }
 0x21e   :  { %4540 = vmatpush1.msra.mxu0 %v4524_v56  ;;  %4420 = vmatprep.mubr.f32.mxu0 %v8839_v7  ;;  %v4714_v58 = vsel %vm4712_vm1, %v4707_v57, %v4709_v27  ;;  %v5641_v56 = vld [vmem:[%s10668_s5 + $0xb0] sm:$0xff] }
 0x21f   :  { %7739 = vmatmul.mubr.msk.f32.vlgmr.msra.gmra.mrb[10].mxu1 %vm789_vm5, %v7735_v55  ;;  %v4711_v61 = vpop.permute.xlu0 %4710  ;;  %4728 = vmatprep.subr.mxu0 %v4714_v58  ;;  %v5624_v55 = vld [vmem:[%s10668_s5 + $0x28] sm:$0xff] }
 0x220   :  { %4617 = vmatpush1.msra.mxu1 %v4526_v60  ;;  %4497 = vmatprep.mubr.f32.mxu1 %v8839_v7  ;;  %v4715_v5 = vsel %vm4712_vm1, %v4709_v27, %v4711_v61  ;;  %v5642_v27 = vld [vmem:[%s10668_s5 + $0xb8] sm:$0xff] }
 0x221   :  { %7738 = vmatmul.mubr.msk.f32.gmra.mrb[8].mxu0 %vm789_vm5, %v7736_v59  ;;  %v4705_v62 = vpop.permute.xlu1 %4704  ;;  %v8319_v58 = vpack.c.bf16 %v5642_v27, %v5641_v56  ;;  %v5626_v60 = vld [vmem:[%s10668_s5 + $0x38] sm:$0xff] }
 0x222   :  { %4603 = vmatprep.mubr.f32.mxu0 %v8839_v7  ;;  %v4721_v63 = vsel %vm4712_vm1, %v4711_v61, %v4705_v62  ;;  %v4713_v1 = vsel %vm4712_vm1, %v4705_v62, %v4707_v57  ;;  %v8317_v57 = vpack.c.bf16 %v5624_v55, %v5623_v54  ;;  %v5643_v61 = vld [vmem:[%s10668_s5 + $0xc0] sm:$0xff]  ;;  %v5644_v62 = vld [vmem:[%s10668_s5 + $0xc8] sm:$0xff] }
 0x223   :  { %7740 = vmatmul.mubr.msk.f32.gmra.mrb[12].mxu1 %vm789_vm5, %v7736_v59  ;;  %v4898_v2 = vpop.permute.xlu0 %4897  ;;  %4805 = vmatprep.subr.mxu1 %v4721_v63  ;;  %v5625_v59 = vld [vmem:[%s10668_s5 + $0x30] sm:$0xff] }
 0x224   :  { %4680 = vmatprep.mubr.f32.mxu1 %v8839_v7  ;;  %v8321_v63 = vpack.c.bf16 %v5626_v60, %v5625_v59 }
 0x225   :  { %7743 = vmatmul.mubr.msk.f32.vlgmr.msra.gmra.mrb[6].mxu0 %vm789_vm5, %v7741_v0  ;;  %v4896_v3 = vpop.permute.xlu1 %4895 }
 0x226   :  { %4729 = vmatpush1.msra.mxu0 %v4713_v1  ;;  %4609 = vmatprep.mubr.f32.mxu0 %v8839_v7  ;;  %v4903_v4 = vsel %vm4901_vm6, %v4896_v3, %v4898_v2  ;;  %v5627_v1 = vld [vmem:[%s10668_s5 + $0x40] sm:$0xff] }
 0x227   :  { %7745 = vmatmul.mubr.msk.f32.vlgmr.msra.gmra.mrb[10].mxu1 %vm789_vm5, %v7741_v0  ;;  %v4900_v6 = vpop.permute.xlu0 %4899  ;;  %4917 = vmatprep.subr.mxu0 %v4903_v4  ;;  %v8323_v0 = vpack.c.bf16 %v5644_v62, %v5643_v61  ;;  %v5645_v4 = vld [vmem:[%s10668_s5 + $0xd0] sm:$0xff] }
 0x228   :  { %4806 = vmatpush1.msra.mxu1 %v4715_v5  ;;  %4686 = vmatprep.mubr.f32.mxu1 %v8839_v7  ;;  %v4904_v13 = vsel %vm4901_vm6, %v4898_v2, %v4900_v6  ;;  %v5628_v2 = vld [vmem:[%s10668_s5 + $0x48] sm:$0xff] }
 0x229   :  { %7744 = vmatmul.mubr.msk.f32.gmra.mrb[8].mxu0 %vm789_vm5, %v7742_v37  ;;  %v4894_v8 = vpop.permute.xlu1 %4893 }
 0x22a   :  { %4792 = vmatprep.mubr.f32.mxu0 %v8839_v7  ;;  %v4910_v22 = vsel %vm4901_vm6, %v4900_v6, %v4894_v8  ;;  %v4902_v38 = vsel %vm4901_vm6, %v4894_v8, %v4896_v3  ;;  %v8325_v3 = vpack.c.bf16 %v5628_v2, %v5627_v1  ;;  %v5629_v6 = vld [vmem:[%s10668_s5 + $0x50] sm:$0xff]  ;;  %v5630_v8 = vld [vmem:[%s10668_s5 + $0x58] sm:$0xff] }
 0x22b   :  { %7746 = vmatmul.mubr.msk.f32.gmra.mrb[12].mxu1 %vm789_vm5, %v7742_v37  ;;  %v5087_v10 = vpop.permute.xlu0 %5086  ;;  %4994 = vmatprep.subr.mxu1 %v4910_v22  ;;  %v5646_v37 = vld [vmem:[%s10668_s5 + $0xd8] sm:$0xff]  ;;  %v8329_v22 = vpack.c.bf16 %v5630_v8, %v5629_v6 }
 0x22c   :  { %4869 = vmatprep.mubr.f32.mxu1 %v8839_v7  ;;  %v8327_v5 = vpack.c.bf16 %v5646_v37, %v5645_v4 }
 0x22d   :  { %7749 = vmatmul.mubr.msk.f32.vlgmr.msra.gmra.mrb[6].mxu0 %vm789_vm5, %v7747_v9  ;;  %v5085_v11 = vpop.permute.xlu1 %5084 }
 0x22e   :  { %4918 = vmatpush1.msra.mxu0 %v4902_v38  ;;  %4798 = vmatprep.mubr.f32.mxu0 %v8839_v7  ;;  %v5092_v12 = vsel %vm5090_vm7, %v5085_v11, %v5087_v10  ;;  %v5647_v38 = vld [vmem:[%s10668_s5 + $0xe0] sm:$0xff] }
 0x22f   :  { %7751 = vmatmul.mubr.msk.f32.vlgmr.msra.gmra.mrb[10].mxu1 %vm789_vm5, %v7747_v9  ;;  %v5089_v14 = vpop.permute.xlu0 %5088  ;;  %5106 = vmatprep.subr.mxu0 %v5092_v12  ;;  %v5631_v12 = vld [vmem:[%s10668_s5 + $0x60] sm:$0xff] }
 0x230   :  { %4995 = vmatpush1.msra.mxu1 %v4904_v13  ;;  %4875 = vmatprep.mubr.f32.mxu1 %v8839_v7  ;;  %v5093_v26 = vsel %vm5090_vm7, %v5087_v10, %v5089_v14  ;;  %v5648_v10 = vld [vmem:[%s10668_s5 + $0xe8] sm:$0xff] }
 0x231   :  { %7750 = vmatmul.mubr.msk.f32.gmra.mrb[8].mxu0 %vm789_vm5, %v7748_v20  ;;  %v5083_v15 = vpop.permute.xlu1 %5082 }
 0x232   :  { %4981 = vmatprep.mubr.f32.mxu0 %v8839_v7  ;;  %v5099_v17 = vsel %vm5090_vm7, %v5089_v14, %v5083_v15  ;;  %v5091_v19 = vsel %vm5090_vm7, %v5083_v15, %v5085_v11  ;;  %v8331_v11 = vpack.c.bf16 %v5648_v10, %v5647_v38  ;;  %v5652_v38 = vld [vmem:[%s10668_s5 + $0x108] sm:$0xff] }
 0x233   :  { %7752 = vmatmul.mubr.msk.f32.gmra.mrb[12].mxu1 %vm789_vm5, %v7748_v20  ;;  %v5276_v21 = vpop.permute.xlu0 %5275  ;;  %5183 = vmatprep.subr.mxu1 %v5099_v17  ;;  %v5632_v20 = vld [vmem:[%s10668_s5 + $0x68] sm:$0xff] }
 0x234   :  { %5058 = vmatprep.mubr.f32.mxu1 %v8839_v7  ;;  %v8333_v14 = vpack.c.bf16 %v5632_v20, %v5631_v12  ;;  %v5669_v12 = vld [vmem:[%s10668_s5 + $0x190] sm:$0xff]  ;;  %v5670_v20 = vld [vmem:[%s10668_s5 + $0x198] sm:$0xff] }
 0x235   :  { %7755 = vmatmul.mubr.msk.f32.vlgmr.msra.gmra.mrb[6].mxu0 %vm789_vm5, %v7753_v18  ;;  %v5274_v23 = vpop.permute.xlu1 %5273 }
 0x236   :  { %5107 = vmatpush1.msra.mxu0 %v5091_v19  ;;  %4987 = vmatprep.mubr.f32.mxu0 %v8839_v7  ;;  %v5281_v24 = vsel %vm5279_vm8, %v5274_v23, %v5276_v21 }
 0x237   :  { %7757 = vmatmul.mubr.msk.f32.vlgmr.msra.gmra.mrb[10].mxu1 %vm789_vm5, %v7753_v18  ;;  %5295 = vmatprep.subr.mxu0 %v5281_v24  ;;  %v5278_v28 = vpop.permute.xlu0 %5277 }
 0x238   :  { %5184 = vmatpush1.msra.mxu1 %v5093_v26  ;;  %5064 = vmatprep.mubr.f32.mxu1 %v8839_v7  ;;  %v5282_v34 = vsel %vm5279_vm8, %v5276_v21, %v5278_v28  ;;  %v5649_v21 = vld [vmem:[%s10668_s5 + $0xf0] sm:$0xff] }
 0x239   :  { %7756 = vmatmul.mubr.msk.f32.gmra.mrb[8].mxu0 %vm789_vm5, %v7754_v25  ;;  %v5272_v29 = vpop.permute.xlu1 %5271 }
 0x23a   :  { %5170 = vmatprep.mubr.f32.mxu0 %v8839_v7  ;;  %v5288_v30 = vsel %vm5279_vm8, %v5278_v28, %v5272_v29  ;;  %v5280_v32 = vsel %vm5279_vm8, %v5272_v29, %v5274_v23  ;;  %v5650_v23 = vld [vmem:[%s10668_s5 + $0xf8] sm:$0xff]  ;;  %v5633_v29 = vld [vmem:[%s10668_s5 + $0x70] sm:$0xff] }
 0x23b   :  { %7758 = vmatmul.mubr.msk.f32.gmra.mrb[12].mxu1 %vm789_vm5, %v7754_v25  ;;  %5372 = vmatprep.subr.mxu1 %v5288_v30  ;;  %v8335_v28 = vpack.c.bf16 %v5650_v23, %v5649_v21  ;;  %v5634_v30 = vld [vmem:[%s10668_s5 + $0x78] sm:$0xff]  ;;  %v8343_v23 = vpack.c.bf16 %v5670_v20, %v5669_v12 }
 0x23c   :  { %5247 = vmatprep.mubr.f32.mxu1 %v8839_v7 }
 0x23d   :  { %7761 = vmatmul.mubr.msk.f32.vlgmr.msra.gmra.mrb[6].mxu0 %vm789_vm5, %v7759_v31 }
 0x23e   :  { %5296 = vmatpush1.msra.mxu0 %v5280_v32  ;;  %5176 = vmatprep.mubr.f32.mxu0 %v8839_v7 }
 0x23f   :  { %7763 = vmatmul.mubr.msk.f32.vlgmr.msra.gmra.mrb[10].mxu1 %vm789_vm5, %v7759_v31 }
 0x240   :  { %5373 = vmatpush1.msra.mxu1 %v5282_v34  ;;  %5253 = vmatprep.mubr.f32.mxu1 %v8839_v7 }
 0x241   :  { %7762 = vmatmul.mubr.msk.f32.gmra.mrb[8].mxu0 %vm789_vm5, %v7760_v33  ;;  %8308 = vmatprep.subr.bf16.mxu1 %v8307_v42 }
 0x242   :  { %5359 = vmatprep.mubr.f32.mxu0 %v8839_v7 }
 0x243   :  { %7764 = vmatmul.mubr.msk.f32.gmra.mrb[12].mxu1 %vm789_vm5, %v7760_v33  ;;  %v8337_v33 = vpack.c.bf16 %v5634_v30, %v5633_v29  ;;  %v5672_v29 = vld [vmem:[%s10668_s5 + $0x1a8] sm:$0xff] }
 0x244   :  { %5436 = vmatprep.mubr.f32.mxu1 %v8839_v7 }
 0x245   :  { %7767 = vmatmul.mubr.msk.f32.vlgmr.msra.gmra.mrb[6].mxu0 %vm789_vm5, %v7765_v35 }
 0x246   :  { %5365 = vmatprep.mubr.f32.mxu0 %v8839_v7 }
 0x247   :  { %7769 = vmatmul.mubr.msk.f32.vlgmr.msra.gmra.mrb[10].mxu1 %vm789_vm5, %v7765_v35 }
 0x248   :  { %5442 = vmatprep.mubr.f32.mxu1 %v8839_v7  ;;  %8310 = vmatpush3.bf16.msra.mxu1 %v8309_v46 }
 0x249   :  { %7768 = vmatmul.mubr.msk.f32.gmra.mrb[8].mxu0 %vm789_vm5, %v7766_v36  ;;  %8312 = vmatprep.subr.bf16.mxu1 %v8311_v47 }
 0x24b   :  { %7770 = vmatmul.mubr.msk.f32.gmra.mrb[12].mxu1 %vm789_vm5, %v7766_v36  ;;  %v5462_v9 = vpop.permute.xlu1 %5461  ;;  %v5467_v36 = vpop.permute.xlu0 %5466  ;;  %vm5983_vm5 = vcmask 1046528  }
 0x24c   :  { %8314 = vmatpush3.bf16.msra.mxu1 %v8313_v52 }
 0x24d   :  { %8316 = vmatprep.subr.bf16.mxu1 %v8315_v53 }
 0x250   :  { %8318 = vmatpush3.bf16.msra.mxu1 %v8317_v57 }
 0x251   :  { %8320 = vmatprep.subr.bf16.mxu1 %v8319_v58 }
 0x254   :  { %8322 = vmatpush3.bf16.msra.mxu1 %v8321_v63 }
 0x255   :  { %8324 = vmatprep.subr.bf16.mxu1 %v8323_v0 }
 0x258   :  { %8326 = vmatpush3.bf16.msra.mxu1 %v8325_v3 }
 0x259   :  { %8328 = vmatprep.subr.bf16.mxu1 %v8327_v5 }
 0x25c   :  { %8330 = vmatpush3.bf16.msra.mxu1 %v8329_v22 }
 0x25d   :  { %8332 = vmatprep.subr.bf16.mxu1 %v8331_v11 }
 0x260   :  { %8334 = vmatpush3.bf16.msra.mxu1 %v8333_v14 }
 0x261   :  { %8336 = vmatprep.subr.bf16.mxu1 %v8335_v28  ;;  %v5654_v28 = vld [vmem:[%s10668_s5 + $0x118] sm:$0xff] }
 0x264   :  { %8338 = vmatpush3.bf16.msra.mxu1 %v8337_v33 }
 0x265   :  { %8340 = vmatprep.subr.bf16.mxu1 %v8339_v45  ;;  %v5657_v45 = vld [vmem:[%s10668_s5 + $0x130] sm:$0xff] }
 0x318   :  { %v5361_v13 = vpop.f32.mrb[6].mxu0 }
 0x319   :  { %v5469_v15 = vadd.f32 %v5462_v9, %v5361_v13  ;;  %v5363_v17 = vpop.f32.mrb[7].mxu0 }
 0x31a   :  { %v9852_v18 = vadd.f32 %v5462_v9, %v5363_v17  ;;  %v5438_v19 = vpop.f32.mrb[10].mxu1 }
 0x31b   :  { %v9860_v24 = vmax.f32 %v5469_v15, 0.0  ;;  %v9862_v25 = vadd.f32 %v5462_v9, %v5438_v19  ;;  %v5440_v26 = vpop.f32.mrb[11].mxu1 }
 0x31c   :  { %v5478_v31 = vmax.f32 %v9852_v18, 0.0  ;;  %v5367_v32 = vpop.f32.mrb[8].mxu0  ;;  %v5472_v46 = vadd.f32 %v5462_v9, %v5440_v26  ;;  %v5651_v9 = vld [vmem:[%s10668_s5 + $0x100] sm:$0xff]  ;;  %v5653_v26 = vld [vmem:[%s10668_s5 + $0x110] sm:$0xff] }
 0x31d   :  { %v5479_v34 = vmax.f32 %v9862_v25, 0.0  ;;  %v5369_v35 = vpop.f32.mrb[9].mxu0  ;;  %5493 = vrot.lane.b32.xlu0 %v9860_v24, %s8842_s0  ;;  %v5473_v42 = vadd.f32 %v5467_v36, %v5367_v32  ;;  %v8341_v18 = vpack.c.bf16 %v5652_v38, %v5651_v9  ;;  %v8345_v30 = vpack.c.bf16 %v5654_v28, %v5653_v26  ;;  %v5656_v32 = vld [vmem:[%s10668_s5 + $0x128] sm:$0xff]  ;;  %v5659_v28 = vld [vmem:[%s10668_s5 + $0x140] sm:$0xff] }
 0x31e   :  { %v5444_v39 = vpop.f32.mrb[12].mxu1  ;;  %v9886_v48 = vadd.f32 %v5467_v36, %v5369_v35  ;;  %v9890_v50 = vmax.f32 %v5472_v46, 0.0 }
 0x31f   :  { %v5446_v43 = vpop.f32.mrb[13].mxu1  ;;  %v8775_v44 = vpack.i.bf16 %v5479_v34, %v5478_v31  ;;  %v9884_v47 = vmax.f32 %v5473_v42, 0.0  ;;  %v9888_v49 = vadd.f32 %v5467_v36, %v5444_v39  ;;  %v5674_v42 = vld [vmem:[%s10668_s5 + $0x1b8] sm:$0xff] }
 0x320   :  { %v5482_v51 = vmax.f32 %v9886_v48, 0.0  ;;  %v5476_v55 = vadd.f32 %v5467_v36, %v5446_v43 }
 0x321   :  { %8776 = vrot.lane.b32.xlu1 %v8775_v44, %s8842_s0  ;;  %8781 = vrot.lane.b32.xlu0 %v8775_v44, %s8846_s24  ;;  %v5483_v52 = vmax.f32 %v9888_v49, 0.0  ;;  %v8790_v53 = vpack.i.bf16 %v9890_v50, %v9884_v47 }
 0x322   :  { %v9911_v56 = vmax.f32 %v5476_v55, 0.0 }
 0x323   :  { %v8805_v54 = vpack.i.bf16 %v5483_v52, %v5482_v51 }
 0x325   :  { %8786 = vrot.lane.b32.xlu1 %v8775_v44, %s8847_s2  ;;  %5569 = vrot.lane.b32.xlu0 %v9860_v24, %s8847_s2 }
 0x329   :  { %5535 = vrot.lane.b32.xlu1 %v9860_v24, %s8846_s24  ;;  %8791 = vrot.lane.b32.xlu0 %v8790_v53, %s8842_s0 }
 0x32d   :  { %8796 = vrot.lane.b32.xlu1 %v8790_v53, %s8846_s24  ;;  %8806 = vrot.lane.b32.xlu0 %v8805_v54, %s8846_s24 }
 0x331   :  { %8801 = vrot.lane.b32.xlu1 %v8805_v54, %s8842_s0  ;;  %5577 = vrot.lane.b32.xlu0 %v9884_v47, %s8847_s2 }
 0x335   :  { %8811 = vrot.lane.b32.xlu1 %v8805_v54, %s8847_s2  ;;  %5507 = vrot.lane.b32.xlu0 %v9911_v56, %s8842_s0 }
 0x339   :  { %5575 = vrot.lane.b32.xlu1 %v9890_v50, %s8847_s2  ;;  %5583 = vrot.lane.b32.xlu0 %v9911_v56, %s8847_s2 }
 0x33d   :  { %5549 = vrot.lane.b32.xlu1 %v9911_v56, %s8846_s24  ;;  %s8869_s24 = smov [#allocation2]  }
 0x33e   :  { %s7591_s2 = sshll.u32 %s8869_s24, 4  ;;  %s7592_s2 = int_to_ptr.vmem [resolvable:$true] %s7591_s2 }
 0x33f   :  { %p8820_p1 = scmp.lt.s32.totalorder %s7592_s2, %s7592_s2 }
 0x38f   :  { %v9922_v27 = vpop.permute.xlu0 %5493 }
 0x393   :  { %v9924_v57 = vpop.permute.xlu1 %8776  ;;  %v9926_v58 = vpop.permute.xlu0 %8781 }
 0x394   :  { %v8779_v59 = vunpack.i.h.bf16 %v9924_v57  ;;  %v8778_v60 = vunpack.i.l.bf16 %v9924_v57  ;;  %v8784_v61 = vunpack.i.h.bf16 %v9926_v58  ;;  %v8783_v62 = vunpack.i.l.bf16 %v9926_v58 }
 0x396   :  { %v5510_v1 = vsel %vm779_vm4, %v8778_v60, %v8779_v59  ;;  %v5509_v4 = vsel %vm779_vm4, %v9922_v27, %v8778_v60  ;;  %v5552_v37 = vsel %vm1688_vm9, %v8783_v62, %v8784_v61  ;;  %v5658_v60 = vld [vmem:[%s10668_s5 + $0x138] sm:$0xff] }
 0x397   :  { %v9932_v63 = vpop.permute.xlu1 %8786  ;;  %v9934_v0 = vpop.permute.xlu0 %5569  ;;  %v5528_v8 = vmax.f32 %v5478_v31, %v5510_v1  ;;  %v5527_v13 = vmax.f32 %v9860_v24, %v5509_v4  ;;  %v5671_v24 = vld [vmem:[%s10668_s5 + $0x1a0] sm:$0xff]  ;;  %v5676_v1 = vld [vmem:[%s10668_s5 + $0x1c8] sm:$0xff] }
 0x398   :  { %v8789_v2 = vunpack.i.h.bf16 %v9932_v63  ;;  %v8788_v3 = vunpack.i.l.bf16 %v9932_v63  ;;  %v5655_v31 = vld [vmem:[%s10668_s5 + $0x120] sm:$0xff]  ;;  %v8347_v36 = vpack.c.bf16 %v5672_v29, %v5671_v24  ;;  %v5660_v24 = vld [vmem:[%s10668_s5 + $0x148] sm:$0xff] }
 0x399   :  { %v8349_v44 = vpack.c.bf16 %v5656_v32, %v5655_v31 }
 0x39a   :  { %v5586_v5 = vsel %vm1877_vm10, %v8788_v3, %v8789_v2  ;;  %v5585_v10 = vsel %vm1877_vm10, %v9934_v0, %v8788_v3 }
 0x39b   :  { %v9949_v6 = vpop.permute.xlu1 %5535  ;;  %v5604_v22 = vmax.f32 %v5552_v37, %v5586_v5  ;;  %v9968_v15 = vpop.permute.xlu0 %8791  ;;  %v8351_v37 = vpack.c.bf16 %v5674_v42, %v5673_v41  ;;  %v5662_v42 = vld [vmem:[%s10668_s5 + $0x158] sm:$0xff] }
 0x39c   :  { %v5551_v11 = vsel %vm1688_vm9, %v9949_v6, %v8783_v62  ;;  %v8794_v43 = vunpack.i.h.bf16 %v9968_v15  ;;  %v8793_v46 = vunpack.i.l.bf16 %v9968_v15  ;;  %v5675_v62 = vld [vmem:[%s10668_s5 + $0x1c0] sm:$0xff] }
 0x39d   :  { %v5603_v14 = vmax.f32 %v5551_v11, %v5585_v10  ;;  %v5612_v17 = vmax.f32 %v5528_v8, %v5604_v22  ;;  %v8353_v11 = vpack.c.bf16 %v5658_v60, %v5657_v45  ;;  %v8355_v12 = vpack.c.bf16 %v5676_v1, %v5675_v62  ;;  %v5663_v62 = vld [vmem:[%s10668_s5 + $0x160] sm:$0xff]  ;;  %v5664_v1 = vld [vmem:[%s10668_s5 + $0x168] sm:$0xff] }
 0x39e   :  { %v5525_v38 = vsel %vm779_vm4, %v8794_v43, %v9922_v27 }
 0x39f   :  { %v5611_v19 = vmax.f32 %v5527_v13, %v5603_v14  ;;  %v9970_v21 = vpop.permute.xlu1 %8796  ;;  %5747 = vmatprep.mubr.f32.mxu1 %v5612_v17  ;;  %v9990_v33 = vpop.permute.xlu0 %8806 }
 0x3a0   :  { %v8798_v53 = vunpack.i.l.bf16 %v9970_v21  ;;  %v8809_v54 = vunpack.i.h.bf16 %v9990_v33  ;;  %v8808_v55 = vunpack.i.l.bf16 %v9990_v33  ;;  %v8799_v3 = vunpack.i.h.bf16 %v9970_v21 }
 0x3a1   :  { %5748 = vmatmul.mubr.f32.vlgmr.msra.gmra.mrb[14].mxu1 %v5611_v19 }
 0x3a2   :  { %8342 = vmatpush3.bf16.msra.mxu1 %v8341_v18  ;;  %v5554_v20 = vsel %vm1688_vm9, %v8798_v53, %v8808_v55  ;;  %v5555_v13 = vsel %vm1688_vm9, %v8808_v55, %v8809_v54  ;;  %v5567_v29 = vsel %vm1688_vm9, %v8799_v3, %v9949_v6 }
 0x3a3   :  { %v9992_v35 = vpop.permute.xlu1 %8801  ;;  %8344 = vmatprep.subr.bf16.mxu1 %v8343_v23  ;;  %v5578_v10 = vpop.permute.xlu0 %5577 }
 0x3a4   :  { %v8804_v39 = vunpack.i.h.bf16 %v9992_v35  ;;  %v8803_v40 = vunpack.i.l.bf16 %v9992_v35  ;;  %v8866_v35 = vmov 0.0|0.0  }
 0x3a5   :  { %8371 = vmatprep.subr.bf16.mxu0 %v8866_v35 }
 0x3a6   :  { %8346 = vmatpush3.bf16.msra.mxu1 %v8345_v30  ;;  %v5512_v5 = vsel %vm779_vm4, %v8793_v46, %v8803_v40  ;;  %v5513_v8 = vsel %vm779_vm4, %v8803_v40, %v8804_v39  ;;  %v8357_v40 = vpack.c.bf16 %v5660_v24, %v5659_v28 }
 0x3a7   :  { %v10020_v4 = vpop.permute.xlu1 %8811  ;;  %8348 = vmatprep.subr.bf16.mxu1 %v8347_v36  ;;  %v5532_v27 = vmax.f32 %v5482_v51, %v5513_v8  ;;  %v5531_v23 = vmax.f32 %v9884_v47, %v5512_v5  ;;  %v5677_v47 = vld [vmem:[%s10668_s5 + $0x1d0] sm:$0xff]  ;;  %v5678_v51 = vld [vmem:[%s10668_s5 + $0x1d8] sm:$0xff]  ;;  %v5530_v36 = vmax.f32 %v9890_v50, %v5525_v38  ;;  %v5680_v50 = vld [vmem:[%s10668_s5 + $0x1e8] sm:$0xff]  ;;  %v5508_v45 = vpop.permute.xlu0 %5507 }
 0x3a8   :  { %v8814_v22 = vunpack.i.h.bf16 %v10020_v4  ;;  %v8813_v9 = vunpack.i.l.bf16 %v10020_v4  ;;  %v8359_v41 = vpack.c.bf16 %v5678_v51, %v5677_v47  ;;  %v5682_v5 = vld [vmem:[%s10668_s5 + $0x1f8] sm:$0xff] }
 0x3aa   :  { %v5588_v14 = vsel %vm1877_vm10, %v5578_v10, %v8813_v9  ;;  %v5589_v17 = vsel %vm1877_vm10, %v8813_v9, %v8814_v22  ;;  %8350 = vmatpush3.bf16.msra.mxu1 %v8349_v44  ;;  %v5679_v44 = vld [vmem:[%s10668_s5 + $0x1e0] sm:$0xff]  ;;  %v8365_v9 = vpack.c.bf16 %v5664_v1, %v5663_v62 }
 0x3ab   :  { %v5576_v18 = vpop.permute.xlu1 %5575  ;;  %8352 = vmatprep.subr.bf16.mxu1 %v8351_v37  ;;  %v5608_v19 = vmax.f32 %v5555_v13, %v5589_v17  ;;  %v5607_v26 = vmax.f32 %v5554_v20, %v5588_v14  ;;  %v8363_v60 = vpack.c.bf16 %v5680_v50, %v5679_v44  ;;  %v5681_v37 = vld [vmem:[%s10668_s5 + $0x1f0] sm:$0xff]  ;;  %v5584_v13 = vpop.permute.xlu0 %5583  ;;  %v5511_v17 = vsel %vm779_vm4, %v8779_v59, %v8794_v43 }
 0x3ac   :  { %v5601_v48 = vsel %vm1877_vm10, %v5576_v18, %v9934_v0  ;;  %v5661_v0 = vld [vmem:[%s10668_s5 + $0x150] sm:$0xff]  ;;  %v8367_v38 = vpack.c.bf16 %v5682_v5, %v5681_v37  ;;  %v5587_v20 = vsel %vm1877_vm10, %v8789_v2, %v5576_v18  ;;  %v5526_v2 = vsel %vm779_vm4, %v5508_v45, %v8793_v46  ;;  %v5837_v37 = vld [vmem:[%s10669_s6 + $0x20] sm:$0xff]  ;;  %v5838_v5 = vld [vmem:[%s10669_s6 + $0x28] sm:$0xff] }
 0x3ad   :  { %v5606_v30 = vmax.f32 %v5567_v29, %v5601_v48  ;;  %v5616_v31 = vmax.f32 %v5532_v27, %v5608_v19  ;;  %v5615_v32 = vmax.f32 %v5531_v23, %v5607_v26  ;;  %v8361_v55 = vpack.c.bf16 %v5662_v42, %v5661_v0  ;;  %v5835_v19 = vld [vmem:[%s10669_s6 + $0x10] sm:$0xff]  ;;  %v5836_v23 = vld [vmem:[%s10669_s6 + $0x18] sm:$0xff] }
 0x3ae   :  { %8354 = vmatpush3.bf16.msra.mxu1 %v8353_v11  ;;  %v5665_v11 = vld [vmem:[%s10668_s5 + $0x170] sm:$0xff]  ;;  %v5553_v27 = vsel %vm1688_vm9, %v8784_v61, %v8799_v3  ;;  %v5529_v58 = vmax.f32 %v5479_v34, %v5511_v17  ;;  %v5514_v61 = vsel %vm779_vm4, %v8804_v39, %v5508_v45  ;;  %v5534_v15 = vmax.f32 %v9911_v56, %v5526_v2  ;;  %v5833_v34 = vld [vmem:[%s10669_s6] sm:$0xff]  ;;  %v5834_v56 = vld [vmem:[%s10669_s6 + $0x8] sm:$0xff] }
 0x3af   :  { %5752 = vmatprep.mubr.f32.mxu1 %v5616_v31  ;;  %8356 = vmatprep.subr.bf16.mxu1 %v8355_v12  ;;  %v5614_v6 = vmax.f32 %v5530_v36, %v5606_v30  ;;  %v5550_v8 = vpop.permute.xlu1 %5549  ;;  %v5666_v12 = vld [vmem:[%s10668_s5 + $0x178] sm:$0xff]  ;;  %v5605_v18 = vmax.f32 %v5553_v27, %v5587_v20  ;;  %v5590_v21 = vsel %vm1877_vm10, %v8814_v22, %v5584_v13  ;;  %vm8867_vm4 = vmmov 0   ;;  %v7393_v20 = vld [vmem:[%s10671_s8 + $0x8] sm:$0xff] }
 0x3b0   :  { %5753 = vmatmul.mubr.f32.gmra.mrb[16].mxu1 %v5615_v32  ;;  %v5568_v14 = vsel %vm1688_vm9, %v5550_v8, %v8798_v53  ;;  %v8369_v63 = vpack.c.bf16 %v5666_v12, %v5665_v11  ;;  %v5602_v53 = vsel %vm1877_vm10, %v5584_v13, %v5578_v10  ;;  %v5556_v57 = vsel %vm1688_vm9, %v8809_v54, %v5550_v8  ;;  %v5839_v11 = vld [vmem:[%s10669_s6 + $0x30] sm:$0xff]  ;;  %v7392_v12 = vld [vmem:[%s10671_s8] sm:$0xff]  ;;  %v7395_v17 = vld [vmem:[%s10671_s8 + $0x18] sm:$0xff] }
 0x3b1   :  { %5822 = vmatprep.mubr.f32.mxu1 %v5614_v6  ;;  %v5610_v59 = vmax.f32 %v5568_v14, %v5602_v53  ;;  %v5613_v43 = vmax.f32 %v5529_v58, %v5605_v18  ;;  %v5609_v46 = vmax.f32 %v5556_v57, %v5590_v21  ;;  %v5533_v54 = vmax.f32 %v5483_v52, %v5514_v61  ;;  %v7394_v13 = vld [vmem:[%s10671_s8 + $0x10] sm:$0xff]  ;;  %v5840_v18 = vld [vmem:[%s10669_s6 + $0x38] sm:$0xff]  ;;  %v5841_v53 = vld [vmem:[%s10669_s6 + $0x40] sm:$0xff] }
 0x3b2   :  { %8358 = vmatpush3.bf16.msra.mxu1 %v8357_v40  ;;  %v8372_v39 = vpack.c.bf16 %v5834_v56, %v5833_v34  ;;  %v8375_v26 = vpack.c.bf16 %v5836_v23, %v5835_v19  ;;  %8001 = vmatprep.mubr.msk.f32.mxu0 %vm8867_vm4, %v8839_v7  ;;  %v5984_v8 = vrot.slane %v5836_v23, 1  ;;  %v8484_v14 = vpack.c.bf16 %v7393_v20, %v7392_v12  ;;  %v7397_v58 = vld [vmem:[%s10671_s8 + $0x28] sm:$0xff]  ;;  %v7398_v56 = vld [vmem:[%s10671_s8 + $0x30] sm:$0xff] }
 0x3b3   :  { %8360 = vmatprep.subr.bf16.mxu1 %v8359_v41  ;;  %v5618_v33 = vmax.f32 %v5534_v15, %v5610_v59  ;;  %v5617_v25 = vmax.f32 %v5533_v54, %v5609_v46  ;;  %v5989_v2 = vrot.slane %v5839_v11, 1  ;;  %v8487_v57 = vpack.c.bf16 %v7395_v17, %v7394_v13  ;;  %v7396_v59 = vld [vmem:[%s10671_s8 + $0x20] sm:$0xff]  ;;  %v5846_v13 = vld [vmem:[%s10669_s6 + $0x68] sm:$0xff] }
 0x3b4   :  { %8373 = vmatpush3.bf16.msra.mxu0 %v8372_v39  ;;  %v6081_v46 = vrot.slane %v5840_v18, 2  ;;  %vm6079_vm9 = vcmask 1045504   ;;  %v8490_v34 = vpack.c.bf16 %v7397_v58, %v7396_v59  ;;  %v7399_v39 = vld [vmem:[%s10671_s8 + $0x38] sm:$0xff]  ;;  %vm6175_vm10 = vcmask 1044480  }
 0x3b5   :  { %8374 = vmatprep.subr.bf16.mxu0 %v8866_v35  ;;  %v8493_v19 = vpack.c.bf16 %v7399_v39, %v7398_v56  ;;  %v5848_v58 = vld [vmem:[%s10669_s6 + $0x78] sm:$0xff] }
 0x3b6   :  { %8362 = vmatpush3.bf16.msra.mxu1 %v8361_v55 }
 0x3b7   :  { %8364 = vmatprep.subr.bf16.mxu1 %v8363_v60 }
 0x3b8   :  { %8377 = vmatpush3.bf16.msk.msra.mxu0 %vm8968_vm2, %v8375_v26  ;;  %v7400_v26 = vld [vmem:[%s10671_s8 + $0x40] sm:$0xff] }
 0x3b9   :  { %8378 = vmatprep.subr.bf16.mxu0 %v8866_v35 }
 0x3ba   :  { %8366 = vmatpush3.bf16.msra.mxu1 %v8365_v9  ;;  %v5985_v9 = vrot.slane %v5837_v37, 1 }
 0x3bb   :  { %8368 = vmatprep.subr.bf16.mxu1 %v8367_v38  ;;  %v5987_v38 = vrot.slane %v5838_v5, 1  ;;  %v5845_v5 = vld [vmem:[%s10669_s6 + $0x60] sm:$0xff] }
 0x3bc   :  { %v5986_v27 = vsel %vm5983_vm5, %v5984_v8, %v5985_v9  ;;  %v6181_v20 = vrot.slane %v5845_v5, 3  ;;  %v6272_v18 = vrot.slane %v5845_v5, 4 }
 0x3bd   :  { %v5990_v21 = vsel %vm5983_vm5, %v5987_v38, %v5989_v2 }
 0x3be   :  { %8370 = vmatpush3.bf16.msra.mxu1 %v8369_v63  ;;  %v5988_v63 = vsel %vm5983_vm5, %v5985_v9, %v5987_v38  ;;  %v7402_v9 = vld [vmem:[%s10671_s8 + $0x50] sm:$0xff]  ;;  %v7403_v38 = vld [vmem:[%s10671_s8 + $0x58] sm:$0xff] }
 0x3bf   :  { %8483 = vmatprep.subr.bf16.mxu1 %v8866_v35  ;;  %v8379_v61 = vpack.c.bf16 %v5988_v63, %v5986_v27  ;;  %v8499_v17 = vpack.c.bf16 %v7403_v38, %v7402_v9  ;;  %v5856_v38 = vld [vmem:[%s10669_s6 + $0xb8] sm:$0xff] }
 0x3c1   :  { %5823 = vmatmul.mubr.f32.vlgmr.msra.gmra.mrb[18].mxu1 %v5613_v43  ;;  %v6080_v43 = vrot.slane %v5839_v11, 2 }
 0x3c2   :  { %5827 = vmatprep.mubr.f32.mxu1 %v5618_v33  ;;  %8485 = vmatpush3.bf16.msra.mxu1 %v8484_v14  ;;  %v6083_v33 = vrot.slane %v5841_v53, 2  ;;  %v5847_v14 = vld [vmem:[%s10669_s6 + $0x70] sm:$0xff]  ;;  %v6273_v53 = vrot.slane %v5846_v13, 4 }
 0x3c3   :  { %8486 = vmatprep.subr.bf16.mxu1 %v8866_v35 }
 0x3c5   :  { %5828 = vmatmul.mubr.f32.gmra.mrb[20].mxu1 %v5617_v25  ;;  %v5842_v25 = vld [vmem:[%s10669_s6 + $0x48] sm:$0xff] }
 0x3c6   :  { %8199 = vmatprep.mubr.msk.f32.mxu1 %vm8867_vm4, %v8839_v7  ;;  %8488 = vmatpush3.bf16.msra.mxu1 %v8487_v57  ;;  %v6275_v57 = vrot.slane %v5847_v14, 4  ;;  %v6561_v14 = vrot.slane %v5856_v38, 7 }
 0x3c7   :  { %8489 = vmatprep.subr.bf16.mxu1 %v8866_v35 }
 0x3ca   :  { %8491 = vmatpush3.bf16.msra.mxu1 %v8490_v34  ;;  %v6368_v34 = vrot.slane %v5848_v58, 5 }
 0x3cb   :  { %8492 = vmatprep.subr.bf16.mxu1 %v8866_v35 }
 0x3ce   :  { %8494 = vmatpush3.bf16.msra.mxu1 %v8493_v19  ;;  %v5853_v19 = vld [vmem:[%s10669_s6 + $0xa0] sm:$0xff] }
 0x3cf   :  { %8495 = vmatprep.subr.bf16.mxu1 %v8866_v35 }
 0x474   :  { %v7841_v49 = vpop.f32.mrb[14].mxu1 }
 0x475   :  { %v7842_v52 = vpop.f32.mrb[15].mxu1 }
 0x476   :  { %v7843_v3 = vadd.f32 %v7842_v52, %v7841_v49  ;;  %v8382_v49 = vpack.c.bf16 %v5989_v2, %v5990_v21  ;;  %v6082_v52 = vsel %vm6079_vm9, %v6080_v43, %v6081_v46  ;;  %v6277_v21 = vrot.slane %v5848_v58, 4  ;;  %v5849_v43 = vld [vmem:[%s10669_s6 + $0x80] sm:$0xff] }
 0x477   :  { %v6369_v56 = vrot.slane %v5849_v43, 5  ;;  %v5863_v43 = vld [vmem:[%s10669_s6 + $0xf0] sm:$0xff] }
 0x483   :  { %v7844_v4 = vpop.f32.mrb[16].mxu1 }
 0x484   :  { %v7845_v22 = vpop.f32.mrb[17].mxu1 }
 0x485   :  { %v7846_v10 = vadd.f32 %v7845_v22, %v7844_v4  ;;  %v6085_v4 = vrot.slane %v5842_v25, 2  ;;  %v5843_v22 = vld [vmem:[%s10669_s6 + $0x50] sm:$0xff] }
 0x494   :  { %v7879_v28 = vpop.f32.mrb[18].mxu1 }
 0x495   :  { %v7880_v24 = vpop.f32.mrb[19].mxu1 }
 0x496   :  { %v7881_v29 = vadd.f32 %v7880_v24, %v7879_v28  ;;  %v7401_v28 = vld [vmem:[%s10671_s8 + $0x48] sm:$0xff] }
 0x497   :  { %v8496_v8 = vpack.c.bf16 %v7401_v28, %v7400_v26 }
 0x498   :  { %v10152_v48 = vadd.f32 %v7881_v29, %v7843_v3  ;;  %v7882_v47 = vpop.f32.mrb[20].mxu1  ;;  %v6084_v3 = vsel %vm6079_vm9, %v6081_v46, %v6083_v33  ;;  %v6086_v29 = vsel %vm6079_vm9, %v6083_v33, %v6085_v4  ;;  %v5850_v46 = vld [vmem:[%s10669_s6 + $0x88] sm:$0xff] }
 0x499   :  { %v7883_v51 = vpop.f32.mrb[21].mxu1  ;;  %v8386_v24 = vpack.c.bf16 %v6084_v3, %v6082_v52  ;;  %8497 = vmatpush3.bf16.msra.mxu1 %v8496_v8  ;;  %v6371_v39 = vrot.slane %v5850_v46, 5  ;;  %v5851_v52 = vld [vmem:[%s10669_s6 + $0x90] sm:$0xff] }
 0x49a   :  { %v7884_v30 = vadd.f32 %v7883_v51, %v7882_v47  ;;  %5976 = vrot.lane.b32.xlu0 %v10152_v48, %s8868_s3  ;;  %v5892_v31 = vrot.slane %v10152_v48, 7  ;;  %v6070_v36 = vrot.slane %v10152_v48, 2  ;;  %v5974_v40 = vrot.slane %v10152_v48, 1  ;;  %8498 = vmatprep.subr.bf16.mxu1 %v8866_v35 }
 0x49b   :  { %v6262_v6 = vrot.slane %v10152_v48, 4  ;;  %v6166_v41 = vrot.slane %v10152_v48, 3  ;;  %v6454_v0 = vrot.slane %v10152_v48, 6  ;;  %v6358_v42 = vrot.slane %v10152_v48, 5 }
 0x49c   :  { %v10157_v32 = vadd.f32 %v7884_v30, %v7846_v10  ;;  %5893 = vrot.lane.b32.xlu1 %v5892_v31, %s8868_s3  ;;  %v5844_v10 = vld [vmem:[%s10669_s6 + $0x58] sm:$0xff]  ;;  %v6176_v47 = vrot.slane %v5842_v25, 3  ;;  %v6177_v51 = vrot.slane %v5843_v22, 3  ;;  %v6278_v25 = vsel %vm6271_vm11, %v6275_v57, %v6277_v21 }
 0x49d   :  { %v6179_v30 = vrot.slane %v5844_v10, 3  ;;  %8500 = vmatpush3.bf16.msra.mxu1 %v8499_v17  ;;  %v8403_v3 = vpack.c.bf16 %v6277_v21, %v6278_v25  ;;  %v6372_v22 = vsel %vm6367_vm13, %v6369_v56, %v6371_v39  ;;  %v6373_v10 = vrot.slane %v5851_v52, 5  ;;  %v5862_v21 = vld [vmem:[%s10669_s6 + $0xe8] sm:$0xff] }
 0x49e   :  { %6168 = vrot.lane.b32.xlu0 %v6070_v36, %s8868_s3  ;;  %v6645_v44 = vrot.slane %v10157_v32, 7  ;;  %v6822_v50 = vrot.slane %v10157_v32, 2  ;;  %v6727_v45 = vrot.slane %v10157_v32, 1  ;;  %v7012_v55 = vrot.slane %v10157_v32, 4  ;;  %8501 = vmatprep.subr.bf16.mxu1 %v8866_v35 }
 0x49f   :  { %v6917_v60 = vrot.slane %v10157_v32, 3  ;;  %v7202_v62 = vrot.slane %v10157_v32, 6  ;;  %v7107_v1 = vrot.slane %v10157_v32, 5  ;;  %v6178_v11 = vsel %vm6175_vm10, %v6176_v47, %v6177_v51 }
 0x4a0   :  { %6072 = vrot.lane.b32.xlu1 %v5974_v40, %s8868_s3  ;;  %v6180_v12 = vsel %vm6175_vm10, %v6177_v51, %v6179_v30  ;;  %v6182_v2 = vsel %vm6175_vm10, %v6179_v30, %v6181_v20  ;;  %v6374_v28 = vsel %vm6367_vm13, %v6371_v39, %v6373_v10  ;;  %v6467_v47 = vrot.slane %v5853_v19, 6  ;;  %v5854_v30 = vld [vmem:[%s10669_s6 + $0xa8] sm:$0xff] }
 0x4a1   :  { %v8393_v63 = vpack.c.bf16 %v6180_v12, %v6178_v11  ;;  %v6469_v9 = vrot.slane %v5854_v30, 6 }
 0x4a2   :  { %6360 = vrot.lane.b32.xlu0 %v6262_v6, %s8868_s3 }
 0x4a3   :  { %v6470_v12 = vsel %vm6463_vm14, %v6467_v47, %v6469_v9 }
 0x4a4   :  { %6264 = vrot.lane.b32.xlu1 %v6166_v41, %s8868_s3 }
 0x4a6   :  { %6551 = vrot.lane.b32.xlu0 %v6454_v0, %s8868_s3 }
 0x4a8   :  { %6456 = vrot.lane.b32.xlu1 %v6358_v42, %s8868_s3 }
 0x4aa   :  { %6729 = vrot.lane.b32.xlu0 %v10157_v32, %s8868_s3 }
 0x4ac   :  { %6646 = vrot.lane.b32.xlu1 %v6645_v44, %s8868_s3 }
 0x4ae   :  { %6919 = vrot.lane.b32.xlu0 %v6822_v50, %s8868_s3 }
 0x4b0   :  { %6824 = vrot.lane.b32.xlu1 %v6727_v45, %s8868_s3 }
 0x4b2   :  { %7109 = vrot.lane.b32.xlu0 %v7012_v55, %s8868_s3 }
 0x4b4   :  { %7014 = vrot.lane.b32.xlu1 %v6917_v60, %s8868_s3 }
 0x4b6   :  { %7298 = vrot.lane.b32.xlu0 %v7202_v62, %s8868_s3 }
 0x4b8   :  { %7204 = vrot.lane.b32.xlu1 %v7107_v1, %s8868_s3 }
 0x50c   :  { %v5977_v23 = vpop.permute.xlu0 %5976 }
 0x50d   :  { %v5979_v37 = vsel %vm117_vm0, %v5974_v40, %v5977_v23  ;;  %v8389_v40 = vpack.c.bf16 %v6085_v4, %v6086_v29  ;;  %v6370_v4 = vsel %vm6367_vm13, %v6368_v34, %v6369_v56  ;;  %v6737_v34 = vrot.slane %v5862_v21, 1 }
 0x50e   :  { %v5894_v15 = vpop.permute.xlu1 %5893  ;;  %v8407_v26 = vpack.c.bf16 %v6372_v22, %v6370_v4  ;;  %v6739_v56 = vrot.slane %v5863_v43, 1  ;;  %v5866_v22 = vld [vmem:[%s10669_s6 + $0x108] sm:$0xff] }
 0x50f   :  { %v5896_v54 = vsel %vm117_vm0, %v10152_v48, %v5894_v15  ;;  %v6274_v15 = vsel %vm6271_vm11, %v6272_v18, %v6273_v53 }
 0x510   :  { %8002 = vmatmul.mubr.msk.f32.vlgmr.msra.gmra.mrb[10].mxu0 %vm113_vm3, %v5896_v54  ;;  %v6169_v33 = vpop.permute.xlu0 %6168  ;;  %v6740_v4 = vsel %vm5983_vm5, %v6737_v34, %v6739_v56 }
 0x511   :  { %8380 = vmatpush3.bf16.msra.mxu0 %v8379_v61  ;;  %8012 = vmatprep.mubr.msk.f32.mxu0 %vm8867_vm4, %v8839_v7  ;;  %v8396_v61 = vpack.c.bf16 %v6181_v20, %v6182_v2  ;;  %v6558_v20 = vrot.slane %v5854_v30, 7 }
 0x512   :  { %8381 = vmatprep.subr.bf16.mxu0 %v8866_v35  ;;  %v6073_v27 = vpop.permute.xlu1 %6072 }
 0x513   :  { %v6075_v59 = vsel %vm117_vm0, %v6070_v36, %v6073_v27  ;;  %v6276_v36 = vsel %vm6271_vm11, %v6273_v53, %v6275_v57  ;;  %v5857_v27 = vld [vmem:[%s10669_s6 + $0xc0] sm:$0xff] }
 0x514   :  { %v8400_v54 = vpack.c.bf16 %v6276_v36, %v6274_v15  ;;  %v6563_v53 = vrot.slane %v5857_v27, 7  ;;  %v5858_v15 = vld [vmem:[%s10669_s6 + $0xc8] sm:$0xff]  ;;  %v5859_v36 = vld [vmem:[%s10669_s6 + $0xd0] sm:$0xff] }
 0x515   :  { %8384 = vmatpush3.bf16.msk.msra.mxu0 %vm8968_vm2, %v8382_v49  ;;  %v6171_v49 = vsel %vm117_vm0, %v6166_v41, %v6169_v33  ;;  %v5852_v41 = vld [vmem:[%s10669_s6 + $0x98] sm:$0xff]  ;;  %v8428_v33 = vpack.c.bf16 %v5859_v36, %v5858_v15  ;;  %v5873_v15 = vld [vmem:[%s10669_s6 + $0x140] sm:$0xff] }
 0x516   :  { %8385 = vmatprep.subr.bf16.mxu0 %v8866_v35  ;;  %v6265_v23 = vpop.permute.xlu1 %6264  ;;  %v6465_v29 = vrot.slane %v5852_v41, 6  ;;  %v7026_v43 = vrot.slane %v5873_v15, 4 }
 0x517   :  { %v6267_v51 = vsel %vm117_vm0, %v6262_v6, %v6265_v23  ;;  %v5855_v6 = vld [vmem:[%s10669_s6 + $0xb0] sm:$0xff] }
 0x518   :  { %8013 = vmatmul.mubr.msk.f32.vlgmr.msra.gmra.mrb[10].mxu0 %vm113_vm3, %v5979_v37  ;;  %v8410_v37 = vpack.c.bf16 %v6373_v10, %v6374_v28  ;;  %v6468_v8 = vsel %vm6463_vm14, %v6465_v29, %v6467_v47  ;;  %v6559_v13 = vrot.slane %v5855_v6, 7  ;;  %v6834_v28 = vrot.slane %v5866_v22, 2  ;;  %v5878_v22 = vld [vmem:[%s10669_s6 + $0x168] sm:$0xff] }
 0x519   :  { %8387 = vmatpush3.bf16.msra.mxu0 %v8386_v24  ;;  %8023 = vmatprep.mubr.msk.f32.mxu0 %vm8867_vm4, %v8839_v7  ;;  %v6464_v24 = vrot.slane %v5851_v52, 6 }
 0x51a   :  { %8388 = vmatprep.subr.bf16.mxu0 %v8866_v35  ;;  %v6560_v2 = vsel %vm117_vm0, %v6558_v20, %v6559_v13  ;;  %v6562_v18 = vsel %vm117_vm0, %v6559_v13, %v6561_v14  ;;  %v6457_v57 = vpop.permute.xlu1 %6456  ;;  %v5870_v13 = vld [vmem:[%s10669_s6 + $0x128] sm:$0xff] }
 0x51b   :  { %v6466_v5 = vsel %vm6463_vm14, %v6464_v24, %v6465_v29  ;;  %v6459_v58 = vsel %vm117_vm0, %v6454_v0, %v6457_v57  ;;  %v5861_v0 = vld [vmem:[%s10669_s6 + $0xe0] sm:$0xff]  ;;  %v5867_v29 = vld [vmem:[%s10669_s6 + $0x110] sm:$0xff] }
 0x51c   :  { %v8414_v11 = vpack.c.bf16 %v6468_v8, %v6466_v5  ;;  %v6736_v25 = vrot.slane %v5861_v0, 1  ;;  %v5868_v5 = vld [vmem:[%s10669_s6 + $0x118] sm:$0xff]  ;;  %v5869_v8 = vld [vmem:[%s10669_s6 + $0x120] sm:$0xff] }
 0x51d   :  { %8391 = vmatpush3.bf16.msk.msra.mxu0 %vm8968_vm2, %v8389_v40  ;;  %v6361_v40 = vpop.permute.xlu0 %6360 }
 0x51e   :  { %8392 = vmatprep.subr.bf16.mxu0 %v8866_v35  ;;  %v6363_v17 = vsel %vm117_vm0, %v6358_v42, %v6361_v40  ;;  %v8421_v42 = vpack.c.bf16 %v6562_v18, %v6560_v2  ;;  %v6647_v10 = vpop.permute.xlu1 %6646  ;;  %v6926_v40 = vrot.slane %v5867_v29, 3  ;;  %v5872_v2 = vld [vmem:[%s10669_s6 + $0x138] sm:$0xff] }
 0x51f   :  { %v6649_v24 = vsel %vm117_vm0, %v10157_v32, %v6647_v10  ;;  %v7771_v32 = vld [vmem:[%s10670_s7] ss:$0 sm:$0xff] }
 0x520   :  { %8024 = vmatmul.mubr.msk.f32.vlgmr.msra.gmra.mrb[10].mxu0 %vm113_vm3, %v6075_v59  ;;  %v6564_v59 = vsel %vm117_vm0, %v6561_v14, %v6563_v53 }
 0x521   :  { %8394 = vmatpush3.bf16.msra.mxu0 %v8393_v63  ;;  %8034 = vmatprep.mubr.msk.f32.mxu0 %vm8867_vm4, %v8839_v7  ;;  %v8417_v63 = vpack.c.bf16 %v6469_v9, %v6470_v12  ;;  %v6552_v46 = vpop.permute.xlu0 %6551  ;;  %v6929_v12 = vrot.slane %v5869_v8, 3 }
 0x522   :  { %8395 = vmatprep.subr.bf16.mxu0 %v8866_v35  ;;  %v6554_v39 = vsel %vm117_vm0, %v5892_v31, %v6552_v46  ;;  %v5865_v31 = vld [vmem:[%s10669_s6 + $0x100] sm:$0xff]  ;;  %v6825_v18 = vpop.permute.xlu1 %6824  ;;  %v5875_v46 = vld [vmem:[%s10669_s6 + $0x150] sm:$0xff] }
 0x525   :  { %8398 = vmatpush3.bf16.msk.msra.mxu0 %vm8968_vm2, %v8396_v61  ;;  %v8424_v61 = vpack.c.bf16 %v6563_v53, %v6564_v59  ;;  %v6730_v9 = vpop.permute.xlu0 %6729 }
 0x526   :  { %8399 = vmatprep.subr.bf16.mxu0 %v8866_v35  ;;  %v6732_v20 = vsel %vm117_vm0, %v6727_v45, %v6730_v9  ;;  %v5871_v45 = vld [vmem:[%s10669_s6 + $0x130] sm:$0xff]  ;;  %v7015_v10 = vpop.permute.xlu1 %7014 }
 0x527   :  { %v7022_v59 = vrot.slane %v5871_v45, 4 }
 0x528   :  { %8035 = vmatmul.mubr.msk.f32.vlgmr.msra.gmra.mrb[10].mxu0 %vm113_vm3, %v6171_v49  ;;  %v5864_v49 = vld [vmem:[%s10669_s6 + $0xf8] sm:$0xff] }
 0x529   :  { %8401 = vmatpush3.bf16.msra.mxu0 %v8400_v54  ;;  %8045 = vmatprep.mubr.msk.f32.mxu0 %vm8867_vm4, %v8839_v7  ;;  %v5860_v54 = vld [vmem:[%s10669_s6 + $0xd8] sm:$0xff]  ;;  %v6741_v48 = vrot.slane %v5864_v49, 1  ;;  %v6831_v23 = vrot.slane %v5864_v49, 2 }
 0x52a   :  { %8402 = vmatprep.subr.bf16.mxu0 %v8866_v35  ;;  %v8431_v52 = vpack.c.bf16 %v5861_v0, %v5860_v54 }
 0x52b   :  { %v6742_v19 = vsel %vm5983_vm5, %v6739_v56, %v6741_v48 }
 0x52c   :  { %v8438_v47 = vpack.c.bf16 %v6741_v48, %v6742_v19 }
 0x52d   :  { %8405 = vmatpush3.bf16.msk.msra.mxu0 %vm8968_vm2, %v8403_v3  ;;  %v6738_v3 = vsel %vm5983_vm5, %v6736_v25, %v6737_v34  ;;  %v7116_v34 = vrot.slane %v5873_v15, 5 }
 0x52e   :  { %8406 = vmatprep.subr.bf16.mxu0 %v8866_v35  ;;  %v8435_v41 = vpack.c.bf16 %v6740_v4, %v6738_v3 }
 0x530   :  { %8046 = vmatmul.mubr.msk.f32.vlgmr.msra.gmra.mrb[10].mxu0 %vm113_vm3, %v6267_v51 }
 0x531   :  { %8408 = vmatpush3.bf16.msra.mxu0 %v8407_v26  ;;  %8056 = vmatprep.mubr.msk.f32.mxu0 %vm8867_vm4, %v8839_v7  ;;  %v6832_v26 = vrot.slane %v5865_v31, 2 }
 0x532   :  { %8409 = vmatprep.subr.bf16.mxu0 %v8866_v35 }
 0x533   :  { %v6833_v51 = vsel %vm6079_vm9, %v6831_v23, %v6832_v26  ;;  %v6835_v30 = vsel %vm6079_vm9, %v6832_v26, %v6834_v28 }
 0x534   :  { %v8442_v6 = vpack.c.bf16 %v6835_v30, %v6833_v51 }
 0x535   :  { %8412 = vmatpush3.bf16.msk.msra.mxu0 %vm8968_vm2, %v8410_v37  ;;  %v6836_v37 = vrot.slane %v5867_v29, 2  ;;  %v5879_v29 = vld [vmem:[%s10669_s6 + $0x170] sm:$0xff] }
 0x536   :  { %8413 = vmatprep.subr.bf16.mxu0 %v8866_v35 }
 0x537   :  { %v6837_v38 = vsel %vm6079_vm9, %v6834_v28, %v6836_v37  ;;  %v7214_v28 = vrot.slane %v5878_v22, 6 }
 0x538   :  { %8057 = vmatmul.mubr.msk.f32.vlgmr.msra.gmra.mrb[10].mxu0 %vm113_vm3, %v6363_v17  ;;  %v8445_v14 = vpack.c.bf16 %v6836_v37, %v6837_v38  ;;  %v7216_v37 = vrot.slane %v5879_v29, 6  ;;  %v7305_v38 = vrot.slane %v5879_v29, 7 }
 0x539   :  { %8415 = vmatpush3.bf16.msra.mxu0 %v8414_v11  ;;  %8067 = vmatprep.mubr.msk.f32.mxu0 %vm8867_vm4, %v8839_v7  ;;  %v6927_v11 = vrot.slane %v5868_v5, 3  ;;  %v5881_v5 = vld [vmem:[%s10669_s6 + $0x180] sm:$0xff] }
 0x53a   :  { %8416 = vmatprep.subr.bf16.mxu0 %v8866_v35 }
 0x53b   :  { %v6928_v17 = vsel %vm6175_vm10, %v6926_v40, %v6927_v11  ;;  %v6930_v27 = vsel %vm6175_vm10, %v6927_v11, %v6929_v12  ;;  %v7308_v11 = vrot.slane %v5881_v5, 7 }
 0x53c   :  { %v8449_v53 = vpack.c.bf16 %v6930_v27, %v6928_v17 }
 0x53d   :  { %8419 = vmatpush3.bf16.msk.msra.mxu0 %vm8968_vm2, %v8417_v63  ;;  %v6931_v63 = vrot.slane %v5870_v13, 3 }
 0x53e   :  { %8420 = vmatprep.subr.bf16.mxu0 %v8866_v35 }
 0x53f   :  { %v6932_v57 = vsel %vm6175_vm10, %v6929_v12, %v6931_v63 }
 0x540   :  { %8068 = vmatmul.mubr.msk.f32.vlgmr.msra.gmra.mrb[10].mxu0 %vm113_vm3, %v6459_v58  ;;  %v7024_v58 = vrot.slane %v5872_v2, 4  ;;  %v8452_v36 = vpack.c.bf16 %v6931_v63, %v6932_v57  ;;  %v7205_v63 = vpop.permute.xlu1 %7204 }
 0x541   :  { %8422 = vmatpush3.bf16.msra.mxu0 %v8421_v42  ;;  %8078 = vmatprep.mubr.msk.f32.mxu0 %vm8867_vm4, %v8839_v7  ;;  %v7021_v42 = vrot.slane %v5870_v13, 4  ;;  %v7207_v2 = vsel %vm117_vm0, %v7202_v62, %v7205_v63  ;;  %v7404_v62 = vld [vmem:[%s10671_s8 + $0x60] sm:$0xff] }
 0x542   :  { %8423 = vmatprep.subr.bf16.mxu0 %v8866_v35  ;;  %v7025_v21 = vsel %vm6271_vm11, %v7022_v59, %v7024_v58  ;;  %v7027_v25 = vsel %vm6271_vm11, %v7024_v58, %v7026_v43  ;;  %v7490_v58 = vld [vmem:[%s10673_s10 + $0x8] sm:$0xff] }
 0x543   :  { %v7023_v0 = vsel %vm6271_vm11, %v7021_v42, %v7022_v59  ;;  %v8459_v3 = vpack.c.bf16 %v7026_v43, %v7027_v25  ;;  %v7405_v42 = vld [vmem:[%s10671_s8 + $0x68] sm:$0xff]  ;;  %v7491_v43 = vld [vmem:[%s10673_s10 + $0x10] sm:$0xff] }
 0x544   :  { %v8456_v54 = vpack.c.bf16 %v7025_v21, %v7023_v0  ;;  %v8502_v59 = vpack.c.bf16 %v7405_v42, %v7404_v62 }
 0x545   :  { %8426 = vmatpush3.bf16.msk.msra.mxu0 %vm8968_vm2, %v8424_v61  ;;  %v6827_v61 = vsel %vm117_vm0, %v6822_v50, %v6825_v18  ;;  %v5874_v50 = vld [vmem:[%s10669_s6 + $0x148] sm:$0xff] }
 0x546   :  { %8427 = vmatprep.subr.bf16.mxu0 %v8866_v35  ;;  %v7117_v56 = vrot.slane %v5874_v50, 5  ;;  %8503 = vmatpush3.bf16.msra.mxu1 %v8502_v59  ;;  %v7492_v50 = vld [vmem:[%s10673_s10 + $0x18] sm:$0xff] }
 0x547   :  { %8197 = vmatprep.subr.mxu1 %v8839_v7 }
 0x548   :  { %8079 = vmatmul.mubr.msk.f32.vlgmr.msra.gmra.mrb[10].mxu0 %vm113_vm3, %v6554_v39  ;;  %v7119_v39 = vrot.slane %v5875_v46, 5  ;;  %v7118_v4 = vsel %vm6367_vm13, %v7116_v34, %v7117_v56  ;;  %v8508_v46 = vpack.c.bf16 %v7492_v50, %v7491_v43  ;;  %v7495_v34 = vld [vmem:[%s10673_s10 + $0x30] sm:$0xff] }
 0x549   :  { %8429 = vmatpush3.bf16.msra.mxu0 %v8428_v33  ;;  %8089 = vmatprep.mubr.msk.f32.mxu0 %vm8867_vm4, %v8839_v7  ;;  %v6920_v33 = vpop.permute.xlu0 %6919 }
 0x54a   :  { %8430 = vmatprep.subr.bf16.mxu0 %v8866_v35  ;;  %v6922_v49 = vsel %vm117_vm0, %v6917_v60, %v6920_v33  ;;  %v7120_v48 = vsel %vm6367_vm13, %v7117_v56, %v7119_v39  ;;  %v5877_v60 = vld [vmem:[%s10669_s6 + $0x160] sm:$0xff]  ;;  %8198 = vmatpush3.msra.mxu1 %v7406_v16  ;;  %v7496_v56 = vld [vmem:[%s10673_s10 + $0x38] sm:$0xff] }
 0x54b   :  { %v7212_v26 = vrot.slane %v5877_v60, 6  ;;  %8504 = vmatprep.subr.bf16.mxu1 %v8866_v35  ;;  %v7493_v33 = vld [vmem:[%s10673_s10 + $0x20] sm:$0xff] }
 0x54d   :  { %8433 = vmatpush3.bf16.msk.msra.mxu0 %vm8968_vm2, %v8431_v52  ;;  %v5876_v52 = vld [vmem:[%s10669_s6 + $0x158] sm:$0xff]  ;;  %v7215_v30 = vsel %vm6463_vm14, %v7212_v26, %v7214_v28  ;;  %v7110_v8 = vpop.permute.xlu0 %7109 }
 0x54e   :  { %8434 = vmatprep.subr.bf16.mxu0 %v8866_v35  ;;  %v7121_v31 = vrot.slane %v5876_v52, 5  ;;  %v7211_v23 = vrot.slane %v5876_v52, 6  ;;  %v7112_v12 = vsel %vm117_vm0, %v7107_v1, %v7110_v8  ;;  %v7498_v52 = vld [vmem:[%s10673_s10 + $0x48] sm:$0xff] }
 0x550   :  { %8090 = vmatmul.mubr.msk.f32.vlgmr.msra.gmra.mrb[10].mxu0 %vm113_vm3, %v6649_v24  ;;  %v7122_v19 = vsel %vm6367_vm13, %v7119_v39, %v7121_v31  ;;  %v7017_v24 = vsel %vm117_vm0, %v7012_v55, %v7015_v10  ;;  %v7213_v51 = vsel %vm6463_vm14, %v7211_v23, %v7212_v26  ;;  %v5880_v55 = vld [vmem:[%s10669_s6 + $0x178] sm:$0xff]  ;;  %v8514_v39 = vpack.c.bf16 %v7496_v56, %v7495_v34 }
 0x551   :  { %8436 = vmatpush3.bf16.msra.mxu0 %v8435_v41  ;;  %8100 = vmatprep.mubr.msk.f32.mxu0 %vm8867_vm4, %v8839_v7  ;;  %v8463_v41 = vpack.c.bf16 %v7120_v48, %v7118_v4  ;;  %v8470_v9 = vpack.c.bf16 %v7215_v30, %v7213_v51  ;;  %v7306_v40 = vrot.slane %v5880_v55, 7  ;;  %v7499_v4 = vld [vmem:[%s10673_s10 + $0x50] sm:$0xf] }
 0x552   :  { %8437 = vmatprep.subr.bf16.mxu0 %v8866_v35 }
 0x553   :  { %v7309_v17 = vsel %vm117_vm0, %v7306_v40, %v7308_v11 }
 0x555   :  { %8440 = vmatpush3.bf16.msk.msra.mxu0 %vm8968_vm2, %v8438_v47  ;;  %v8466_v47 = vpack.c.bf16 %v7121_v31, %v7122_v19 }
 0x556   :  { %8441 = vmatprep.subr.bf16.mxu0 %v8866_v35 }
 0x558   :  { %8101 = vmatmul.mubr.msk.f32.vlgmr.msra.gmra.mrb[10].mxu0 %vm113_vm3, %v6732_v20  ;;  %v5882_v20 = vld [vmem:[%s10669_s6 + $0x188] sm:$0xff] }
 0x559   :  { %8443 = vmatpush3.bf16.msra.mxu0 %v8442_v6  ;;  %8111 = vmatprep.mubr.msk.f32.mxu0 %vm8867_vm4, %v8839_v7  ;;  %v7217_v6 = vsel %vm6463_vm14, %v7214_v28, %v7216_v37  ;;  %v7310_v27 = vrot.slane %v5882_v20, 7 }
 0x55a   :  { %8444 = vmatprep.subr.bf16.mxu0 %v8866_v35  ;;  %v8473_v13 = vpack.c.bf16 %v7216_v37, %v7217_v6 }
 0x55b   :  { %v7311_v45 = vsel %vm117_vm0, %v7308_v11, %v7310_v27 }
 0x55c   :  { %v8480_v18 = vpack.c.bf16 %v7310_v27, %v7311_v45 }
 0x55d   :  { %8447 = vmatpush3.bf16.msk.msra.mxu0 %vm8968_vm2, %v8445_v14  ;;  %v7307_v14 = vsel %vm117_vm0, %v7305_v38, %v7306_v40 }
 0x55e   :  { %8448 = vmatprep.subr.bf16.mxu0 %v8866_v35  ;;  %v8477_v1 = vpack.c.bf16 %v7309_v17, %v7307_v14 }
 0x560   :  { %8112 = vmatmul.mubr.msk.f32.vlgmr.msra.gmra.mrb[10].mxu0 %vm113_vm3, %v6827_v61 }
 0x561   :  { %8450 = vmatpush3.bf16.msra.mxu0 %v8449_v53  ;;  %8122 = vmatprep.mubr.msk.f32.mxu0 %vm8867_vm4, %v8839_v7  ;;  %v7299_v53 = vpop.permute.xlu0 %7298 }
 0x562   :  { %8451 = vmatprep.subr.bf16.mxu0 %v8866_v35  ;;  %v7301_v57 = vsel %vm117_vm0, %v6645_v44, %v7299_v53  ;;  %v7489_v44 = vld [vmem:[%s10673_s10] sm:$0xff]  ;;  %vm7414_vm0 = vcmask 982016  }
 0x563   :  { %v8505_v0 = vpack.c.bf16 %v7490_v58, %v7489_v44 }
 0x565   :  { %8454 = vmatpush3.bf16.msk.msra.mxu0 %vm8968_vm2, %v8452_v36 }
 0x566   :  { %8455 = vmatprep.subr.bf16.mxu0 %v8866_v35 }
 0x568   :  { %8123 = vmatmul.mubr.msk.f32.vlgmr.msra.gmra.mrb[10].mxu0 %vm113_vm3, %v6922_v49  ;;  %v7497_v49 = vld [vmem:[%s10673_s10 + $0x40] sm:$0xff] }
 0x569   :  { %8457 = vmatpush3.bf16.msra.mxu0 %v8456_v54  ;;  %8133 = vmatprep.mubr.msk.f32.mxu0 %vm8867_vm4, %v8839_v7  ;;  %v7494_v54 = vld [vmem:[%s10673_s10 + $0x28] sm:$0xff]  ;;  %s8815_s10 = scalar_lea.vmem %s7592_s2, 32 }
 0x56a   :  { %8458 = vmatprep.subr.bf16.mxu0 %v8866_v35  ;;  %v8511_v25 = vpack.c.bf16 %v7494_v54, %v7493_v33  ;;  %p8816_p0 = scmp.ne.s32.totalorder %s7592_s2, %s8815_s10  ;;  %p8821_p2 = scmp.lt.s32.totalorder %s8815_s10, %s8815_s10 }
 0x56c   :  { %p8822_p3 = por %p8821_p2, %p8820_p1 }
 0x56d   :  { %8461 = vmatpush3.bf16.msk.msra.mxu0 %vm8968_vm2, %v8459_v3  ;;  %v8517_v3 = vpack.c.bf16 %v7498_v52, %v7497_v49 }
 0x56e   :  { %8462 = vmatprep.subr.bf16.mxu0 %v8866_v35  ;;  %p8823_p4 = pnand %p8822_p3, %p8816_p0 }
 0x570   :  { %8134 = vmatmul.mubr.msk.f32.vlgmr.msra.gmra.mrb[10].mxu0 %vm113_vm3, %v7017_v24 }
 0x571   :  { %8464 = vmatpush3.bf16.msra.mxu0 %v8463_v41  ;;  %8144 = vmatprep.mubr.msk.f32.mxu0 %vm8867_vm4, %v8839_v7 }
 0x572   :  { %8465 = vmatprep.subr.bf16.mxu0 %v8866_v35 }
 0x575   :  { %8468 = vmatpush3.bf16.msk.msra.mxu0 %vm8968_vm2, %v8466_v47 }
 0x576   :  { %8469 = vmatprep.subr.bf16.mxu0 %v8866_v35 }
 0x578   :  { %8145 = vmatmul.mubr.msk.f32.vlgmr.msra.gmra.mrb[10].mxu0 %vm113_vm3, %v7112_v12 }
 0x579   :  { %8471 = vmatpush3.bf16.msra.mxu0 %v8470_v9  ;;  %8155 = vmatprep.mubr.msk.f32.mxu0 %vm8867_vm4, %v8839_v7 }
 0x57a   :  { %8472 = vmatprep.subr.bf16.mxu0 %v8866_v35 }
 0x57d   :  { %8475 = vmatpush3.bf16.msk.msra.mxu0 %vm8968_vm2, %v8473_v13 }
 0x57e   :  { %8476 = vmatprep.subr.bf16.mxu0 %v8866_v35 }
 0x580   :  { %8156 = vmatmul.mubr.msk.f32.vlgmr.msra.gmra.mrb[10].mxu0 %vm113_vm3, %v7207_v2 }
 0x581   :  { %8478 = vmatpush3.bf16.msra.mxu0 %v8477_v1  ;;  %8166 = vmatprep.mubr.msk.f32.mxu0 %vm8867_vm4, %v8839_v7 }
 0x582   :  { %8479 = vmatprep.subr.bf16.mxu0 %v8866_v35 }
 0x585   :  { %8482 = vmatpush3.bf16.msk.msra.mxu0 %vm8968_vm2, %v8480_v18  ;;  %vm7583_vm2 = vcmask 74752  }
 0x588   :  { %8167 = vmatmul.mubr.msk.f32.vlgmr.msra.gmra.mrb[10].mxu0 %vm113_vm3, %v7301_v57 }
 0x65b   :  { %v7386_v61 = vpop.f32.mrb[10].mxu0 }
 0x65c   :  { %v8519_v15 = vadd.f32 %v7771_v32, %v7386_v61  ;;  %v8168_v36 = vpop.f32.mrb[11].mxu0 }
 0x65e   :  { %v7391_v21 = vmax.f32 %v8519_v15, 0.0 }
 0x660   :  { %8200 = vmatmul.mubr.msk.f32.vlgmr.msra.gmra.mrb[22].mxu1 %vm7414_vm0, %v7391_v21 }
 0x661   :  { %8506 = vmatpush3.bf16.msra.mxu1 %v8505_v0  ;;  %8224 = vmatprep.mubr.msk.f32.mxu1 %vm8867_vm4, %v8839_v7 }
 0x662   :  { %8507 = vmatprep.subr.bf16.mxu1 %v8866_v35 }
 0x665   :  { %8509 = vmatpush3.bf16.msra.mxu1 %v8508_v46 }
 0x666   :  { %8510 = vmatprep.subr.bf16.mxu1 %v8866_v35 }
 0x669   :  { %8512 = vmatpush3.bf16.msra.mxu1 %v8511_v25 }
 0x66a   :  { %8513 = vmatprep.subr.bf16.mxu1 %v8866_v35 }
 0x66d   :  { %8515 = vmatpush3.bf16.msra.mxu1 %v8514_v39 }
 0x66e   :  { %8516 = vmatprep.subr.bf16.mxu1 %v8866_v35  ;;  %v7804_v35 = vld [vmem:[%s10672_s9] ss:$0 sm:$0xff] }
 0x671   :  { %8518 = vmatpush3.bf16.msra.mxu1 %v8517_v3 }
 0x672   :  { %8222 = vmatprep.subr.mxu1 %v8839_v7  ;;  %v7806_v7 = vld [vmem:[%s10674_s11] ss:$0 sm:$0xff] }
 0x675   :  { %8223 = vmatpush3.msk.msra.mxu1 %vm6271_vm11, %v7499_v4 }
 0x733   :  { %v7484_v48 = vpop.f32.mrb[22].mxu1 }
 0x734   :  { %v7485_v31 = vadd.f32 %v7804_v35, %v7484_v48  ;;  %v8201_v60 = vpop.f32.mrb[23].mxu1 }
 0x736   :  { %v7488_v22 = vmax.f32 %v7485_v31, 0.0 }
 0x738   :  { %8225 = vmatmul.mubr.msk.f32.vlgmr.msra.gmra.mrb[24].mxu1 %vm3956_vm12, %v7488_v22 }
 0x80b   :  { %v7579_v10 = vpop.f32.mrb[24].mxu1 }
 0x80c   :  { %v7580_v41 = vadd.f32 %v7806_v7, %v7579_v10  ;;  %v8226_v19 = vpop.f32.mrb[25].mxu1 }
 0x80e   :  { %7584 = vst.msk [vmem:[#allocation2] sm:$0x3] %vm7583_vm2, %v7580_v41 }
 0x80f   :  { %8826 = shalt.err (!%p8823_p4)
}
 0x810   :  { %s8827_s25 = scalar_lea.hbm %s10675_s12, 32 }
 0x811   :  { %p8828_p5 = scmp.ne.s32.totalorder %s10675_s12, %s8827_s25  ;;  %p8831_p6 = scmp.lt.u32.totalorder %s8827_s25, %s10675_s12 }
 0x813   :  { %p8833_p7 = pnand %p8831_p6, %p8828_p5 }
 0x815   :  { %8836 = shalt.err (!%p8833_p7)
}
 0x816   :  { %7594 = dma.vmem_to_hbm [thread:$0]  %s7592_s2, 32, %s10675_s12, [#allocation3]  }
 0x817   :  { %8837 = dma.done.wait [#allocation3], 32  }
 0x818   :  { %8838 = vsyncadd [#allocation3], 4294967264 }
 0x819   :  { %7598 = vsyncpa [#allocation3], 1 }

</bundles_post_ra>
